<compile_context>
chip_gen: v7x
topology: tpu7x:2x2x1
jax: 0.10.0
libtpu: 0.0.40
codegen_flags: <defaults>
</compile_context>

<pallas_src>
import numpy as np
import jax
import jax.numpy as jnp
from jax.experimental import pallas as pl
from jax.experimental.pallas import tpu as pltpu


_LANE = 128
_CHUNK_LANES = 8192      # target lanes per MXU push (rows are grouped to this)


def _round_up(x, m):
    return (x + m - 1) // m * m


def _pick_tile_h(H, Wp, max_rows=128):
    """Output rows produced per grid step.

    Single tile for small images; otherwise the largest divisor of H (<= 128
    rows, keeps the per-tile working set small enough for v7x's 64 MiB VMEM)
    whose flat output block (tile_h * Wp lanes) stays a multiple of 128 so the
    output BlockSpec is legal and stores stay unmasked.
    """
    if H <= max_rows:
        return H
    for th in range(min(H, max_rows), 0, -1):
        if H % th == 0 and (th * Wp) % _LANE == 0:
            return th
    return H


# ----------------------------------------------------------------------------
# Fused network kernel
# ----------------------------------------------------------------------------
def _make_fused_kernel(*, n_layers, n_feats, n_colors, tile_h, n_tiles,
                       Wp, He, L, L2, R):
    # 3x3 taps as flat lane offsets in a width-padded (Wp = W+2) layout.
    taps = [dy * Wp + dx for dy in range(3) for dx in range(3)]

    def conv_chunk(src_ref, w_ref, b_ref, p0, clen, cast_to_bf16):
        # im2col: 9 lane-shifted slices stacked on the contraction axis, so the
        # whole 3x3 conv for this chunk is a single K = 9*Cin MXU matmul.
        parts = []
        for off in taps:
            piece = src_ref[:, pl.ds(p0 + off, clen)]
            if cast_to_bf16:
                piece = piece.astype(jnp.bfloat16)
            parts.append(piece)
        patches = jnp.concatenate(parts, axis=0)               # (9*Cin, clen)
        acc = jnp.dot(w_ref[...], patches,
                      preferred_element_type=jnp.float32)      # (Cout, clen) f32
        return acc + b_ref[...]                                # bias folded in

    def kernel(*refs):
        x_ref, mask_ref = refs[0], refs[1]
        w_refs = [refs[2 + 2 * l] for l in range(n_layers)]
        b_refs = [refs[3 + 2 * l] for l in range(n_layers)]
        out_ref = refs[2 + 2 * n_layers]
        in_buf, buf_a, buf_b = refs[3 + 2 * n_layers:]

        # --- stage this tile's input window (3 channels, f32) into VMEM -----
        if n_tiles == 1:
            base = 0
        else:
            base = pl.program_id(1) * (tile_h * Wp)
        in_buf[:, pl.ds(0, L)] = x_ref[:, pl.ds(base, L)]

        # --- zero slack / ring regions the interior writes never touch ------
        in_buf[:, pl.ds(L, L2 - L)] = jnp.zeros((n_colors, L2 - L), jnp.float32)
        ring_lo = Wp + 1
        ring_hi = (He + 1) * Wp + 1
        for buf in (buf_a, buf_b):
            buf[:, pl.ds(0, ring_lo)] = jnp.zeros((n_feats, ring_lo),
                                                  jnp.bfloat16)
            buf[:, pl.ds(ring_hi, L2 - ring_hi)] = jnp.zeros(
                (n_feats, L2 - ring_hi), jnp.bfloat16)

        # --- head + body: conv + ReLU, activations stay in VMEM -------------
        src, dst = in_buf, buf_a
        cast_src = True                               # input window is f32
        for layer in range(n_layers - 1):
            w_ref, b_ref = w_refs[layer], b_refs[layer]
            for r0 in range(0, He, R):
                rows = min(R, He - r0)
                p0, clen = r0 * Wp, rows * Wp
                acc = conv_chunk(src, w_ref, b_ref, p0, clen, cast_src)
                acc = jnp.maximum(acc, 0.0)
                # {0,1} mask re-creates each layer's zero padding (image
                # top/bottom rows of this tile + the width ring columns).
                acc = acc * mask_ref[:, pl.ds(p0, clen)]
                dst[:, pl.ds(ring_lo + p0, clen)] = acc.astype(jnp.bfloat16)
            src = dst
            dst = buf_b if dst is buf_a else buf_a
            cast_src = False

        # --- tail: conv + residual add, streamed straight to the output -----
        w_ref, b_ref = w_refs[-1], b_refs[-1]
        for r0 in range(n_layers, n_layers + tile_h, R):
            rows = min(R, n_layers + tile_h - r0)
            p0, clen = r0 * Wp, rows * Wp
            acc = conv_chunk(src, w_ref, b_ref, p0, clen, False)
            acc = acc + in_buf[:, pl.ds(ring_lo + p0, clen)]   # res += x
            out_ref[:, pl.ds((r0 - n_layers) * Wp, clen)] = acc

    return kernel


# ----------------------------------------------------------------------------
# Bicubic upsample (PyTorch nn.Upsample(mode='bicubic', align_corners=False),
# cubic kernel a=-0.75, border clamped) - separable interpolation matrices,
# applied in plain JAX (glue, not the hot path).
# ----------------------------------------------------------------------------
def _cubic(x, a=-0.75):
    x = np.abs(x)
    w1 = ((a + 2.0) * x - (a + 3.0)) * x * x + 1.0
    w2 = ((a * x - 5.0 * a) * x + 8.0 * a) * x - 4.0 * a
    return np.where(x <= 1.0, w1, np.where(x < 2.0, w2, 0.0))


def _bicubic_matrix(in_size, out_size):
    j = np.arange(out_size, dtype=np.float64)
    src = (j + 0.5) * (in_size / out_size) - 0.5
    f = np.floor(src)
    taps = f[:, None] + np.arange(-1, 3)[None, :]            # (out, 4)
    w = _cubic(src[:, None] - taps)                          # (out, 4)
    idx = np.clip(taps.astype(np.int64), 0, in_size - 1)     # border clamp
    M = np.zeros((out_size, in_size), dtype=np.float64)
    np.add.at(M, (np.repeat(np.arange(out_size), 4), idx.ravel()), w.ravel())
    return jnp.asarray(M, dtype=jnp.float32)


def bicubic_upsample_nchw(x, scale):
    N, C, H, W = x.shape
    Mh = _bicubic_matrix(H, H * scale)
    Mw = _bicubic_matrix(W, W * scale)
    return jnp.einsum('oh,nchw,pw->ncop', Mh, x, Mw)


# ----------------------------------------------------------------------------
# VDSRR forward
# ----------------------------------------------------------------------------
_RGB_MEAN = np.array([0.4488, 0.4371, 0.4040], dtype=np.float32)  # rgb_std = 1


def vdsrr_forward(x_nchw, params, *, scale, rgb_range):
    N, n_colors, H0, W0 = x_nchw.shape
    n_feats = params['head_w'].shape[-1]
    n_layers = 2 + len(params['body'])          # head + body blocks + tail
    P = n_layers

    # ---- host glue: bicubic upsample (PyTorch semantics) + sub_mean --------
    x_up = bicubic_upsample_nchw(x_nchw.astype(jnp.float32), scale)
    mean = jnp.asarray(_RGB_MEAN) * rgb_range
    x = x_up - mean.reshape(1, n_colors, 1, 1)            # MeanShift(sign=-1)
    H, W = H0 * scale, W0 * scale

    # ---- fused-network geometry --------------------------------------------
    Wp = W + 2
    tile_h = _pick_tile_h(H, Wp)
    n_tiles = H // tile_h
    He = tile_h + 2 * P                 # rows computed per tile (halo = P)
    Hb = He + 2                         # + conv ring rows
    L = Hb * Wp                         # flat length of one tile's window
    L2 = _round_up(L + 2, _LANE)        # scratch length (+2: tap over-read)
    Pl = He * Wp                        # flat positions computed per layer
    R = max(1, min(He, _CHUNK_LANES // Wp))   # rows grouped per MXU push

    # ---- input: pad ONCE (3 channels), flatten spatial onto the lane axis --
    x_pad = jnp.pad(x, ((0, 0), (0, 0), (P + 1, P + 1), (1, 1)))
    x_flat = x_pad.reshape(N, n_colors, (H + 2 * P + 2) * Wp)

    # ---- per-tile {0,1} validity mask (re-creates per-layer zero padding) --
    rows = np.arange(He)
    col_ok = (np.arange(Wp) < W)
    mask_np = np.zeros((n_tiles, 1, Pl), np.float32)
    for t in range(n_tiles):
        img_rows = t * tile_h - P + rows
        row_ok = (img_rows >= 0) & (img_rows < H)
        mask_np[t, 0, :] = (row_ok[:, None] & col_ok[None, :]).reshape(-1)
    mask = jnp.asarray(mask_np)

    # ---- weights: host re-layout to fused (Cout, 9*Cin) bf16; biases f32 ---
    def fuse_w(w_hwio):
        cout = w_hwio.shape[-1]
        return jnp.transpose(w_hwio, (3, 0, 1, 2)).reshape(
            cout, -1).astype(jnp.bfloat16)

    ws = [fuse_w(params['head_w'])]
    bs = [params['head_b']]
    for (w, b) in params['body']:
        ws.append(fuse_w(w))
        bs.append(b)
    ws.append(fuse_w(params['tail_w']))
    bs.append(params['tail_b'] + mean)           # fold add_mean into tail bias
    bs = [jnp.asarray(b, jnp.float32).reshape(-1, 1) for b in bs]

    kernel = _make_fused_kernel(
        n_layers=P, n_feats=n_feats, n_colors=n_colors, tile_h=tile_h,
        n_tiles=n_tiles, Wp=Wp, He=He, L=L, L2=L2, R=R)

    in_specs = [
        # whole padded 3-channel input per image (only re-fetched when n
        # changes; the heavy 16-channel activations never leave VMEM)
        pl.BlockSpec((None, n_colors, x_flat.shape[-1]),
                     lambda n, t: (n, 0, 0)),
        pl.BlockSpec((None, 1, Pl), lambda n, t: (t, 0, 0)),
    ]
    args = [x_flat, mask]
    for w, b in zip(ws, bs):
        in_specs.append(pl.BlockSpec(w.shape, lambda n, t: (0, 0)))
        in_specs.append(pl.BlockSpec(b.shape, lambda n, t: (0, 0)))
        args.extend([w, b])

    y_flat = pl.pallas_call(
        kernel,
        out_shape=jax.ShapeDtypeStruct((N, n_colors, H * Wp), jnp.float32),
        grid=(N, n_tiles),
        in_specs=in_specs,
        out_specs=pl.BlockSpec((None, n_colors, tile_h * Wp),
                               lambda n, t: (n, 0, t)),
        scratch_shapes=[
            pltpu.VMEM((n_colors, L2), jnp.float32),    # staged input window
            pltpu.VMEM((n_feats, L2), jnp.bfloat16),    # ping activation buf
            pltpu.VMEM((n_feats, L2), jnp.bfloat16),    # pong activation buf
        ],
        compiler_params=pltpu.CompilerParams(
            dimension_semantics=("parallel", "parallel"),
            vmem_limit_bytes=32 * 1024 * 1024),
    )(*args)

    # un-flatten, strip the width padding columns -> NCHW
    return y_flat.reshape(N, n_colors, H, Wp)[:, :, :, :W]


# ----------------------------------------------------------------------------
# Deterministic parameter init (shapes match default_conv: 3x3, bias=True),
# stored as HWIO; the wrapper re-lays them out for the fused kernel.
# TODO(synk): AdaFM modulation inside BasicBlock_ is identity when
# args.adafm=False; only that path is implemented here.
# ----------------------------------------------------------------------------
def _init_conv(key, cin, cout):
    kw, kb = jax.random.split(key)
    fan_in = cin * 9
    bound = 1.0 / np.sqrt(fan_in)
    w = jax.random.uniform(kw, (3, 3, cin, cout), jnp.float32, -bound, bound)
    b = jax.random.uniform(kb, (cout,), jnp.float32, -bound, bound)
    return w, b


def init_vdsrr_params(key, *, n_colors, n_feats, n_resblocks):
    keys = jax.random.split(key, n_resblocks)
    head_w, head_b = _init_conv(keys[0], n_colors, n_feats)
    body = [_init_conv(keys[1 + i], n_feats, n_feats)
            for i in range(n_resblocks - 2)]
    tail_w, tail_b = _init_conv(keys[-1], n_feats, n_colors)
    return dict(head_w=head_w, head_b=head_b, body=body,
                tail_w=tail_w, tail_b=tail_b)


if __name__ == "__main__":
    # args: n_resblocks=4, n_feats=16, scale=[2], n_colors=3, rgb_range=255
    n_resblocks, n_feats, scale, n_colors, rgb_range = 4, 16, 2, 3, 255.0

    key = jax.random.PRNGKey(0)
    k_params, k_x = jax.random.split(key)
    params = init_vdsrr_params(k_params, n_colors=n_colors, n_feats=n_feats,
                               n_resblocks=n_resblocks)

    # small deterministic input, NCHW like the PyTorch module
    x = jax.random.uniform(k_x, (2, n_colors, 16, 16), jnp.float32,
                           0.0, rgb_range)

    y = vdsrr_forward(x, params, scale=scale, rgb_range=rgb_range)
    jax.block_until_ready(y)
    assert y.shape == (2, n_colors, 16 * scale, 16 * scale), y.shape
    assert bool(jnp.all(jnp.isfinite(y)))
    print("KERNEL_OK")
</pallas_src>

<mosaic_0001>
module attributes {stable_mosaic.version = 11 : i64} {
  func.func @kernel(%arg0: i32, %arg1: i32, %arg2: memref<1x3x1428xf32, #tpu.memory_space<vmem>>, %arg3: memref<1x1x1360xf32, #tpu.memory_space<vmem>>, %arg4: memref<16x27xbf16, #tpu.memory_space<vmem>>, %arg5: memref<16x1xf32, #tpu.memory_space<vmem>>, %arg6: memref<16x144xbf16, #tpu.memory_space<vmem>>, %arg7: memref<16x1xf32, #tpu.memory_space<vmem>>, %arg8: memref<16x144xbf16, #tpu.memory_space<vmem>>, %arg9: memref<16x1xf32, #tpu.memory_space<vmem>>, %arg10: memref<3x144xbf16, #tpu.memory_space<vmem>>, %arg11: memref<3x1xf32, #tpu.memory_space<vmem>>, %arg12: memref<1x3x1088xf32, #tpu.memory_space<vmem>>, %arg13: memref<3x1536xf32, #tpu.memory_space<vmem>>, %arg14: memref<16x1536xbf16, #tpu.memory_space<vmem>>, %arg15: memref<16x1536xbf16, #tpu.memory_space<vmem>>) attributes {dimension_semantics = [#tpu.dimension_semantics<parallel>, #tpu.dimension_semantics<parallel>], iteration_bounds = array<i64: 2, 1>, scalar_prefetch = 0 : i64, scratch_operands = 3 : i64, tpu.core_type = #tpu.core_type<tc>, window_params = [{transform_indices = @transform_0, window_bounds = array<i64: 1, 3, 1428>}, {transform_indices = @transform_1, window_bounds = array<i64: 1, 1, 1360>}, {pipeline_mode = #tpu.pipeline_mode<synchronous>, transform_indices = @transform_2, window_bounds = array<i64: 16, 27>}, {pipeline_mode = #tpu.pipeline_mode<synchronous>, transform_indices = @transform_3, window_bounds = array<i64: 16, 1>}, {pipeline_mode = #tpu.pipeline_mode<synchronous>, transform_indices = @transform_4, window_bounds = array<i64: 16, 144>}, {pipeline_mode = #tpu.pipeline_mode<synchronous>, transform_indices = @transform_5, window_bounds = array<i64: 16, 1>}, {pipeline_mode = #tpu.pipeline_mode<synchronous>, transform_indices = @transform_6, window_bounds = array<i64: 16, 144>}, {pipeline_mode = #tpu.pipeline_mode<synchronous>, transform_indices = @transform_7, window_bounds = array<i64: 16, 1>}, {pipeline_mode = #tpu.pipeline_mode<synchronous>, transform_indices = @transform_8, window_bounds = array<i64: 3, 144>}, {pipeline_mode = #tpu.pipeline_mode<synchronous>, transform_indices = @transform_9, window_bounds = array<i64: 3, 1>}, {transform_indices = @transform_10, window_bounds = array<i64: 1, 3, 1088>}]} {
    %c0 = arith.constant 0 : index
    %c0_0 = arith.constant 0 : index
    %c0_1 = arith.constant 0 : index
    %0 = vector.load %arg2[%c0, %c0_0, %c0_1] : memref<1x3x1428xf32, #tpu.memory_space<vmem>>, vector<1x3x1428xf32>
    %1 = vector.shape_cast %0 : vector<1x3x1428xf32> to vector<3x1428xf32>
    %c0_2 = arith.constant 0 : index
    %c0_3 = arith.constant 0 : index
    %2 = vector.load %arg13[%c0_2, %c0_3] : memref<3x1536xf32, #tpu.memory_space<vmem>>, vector<3x1428xf32>
    tpu.vector_store %arg13[%c0_2, %c0_3], %1 {strides = array<i32>} : memref<3x1536xf32, #tpu.memory_space<vmem>>, vector<3x1428xf32>,
    %cst = arith.constant 0.000000e+00 : f32
    %3 = vector.broadcast %cst : f32 to vector<3x108xf32>
    %c0_4 = arith.constant 0 : index
    %c1428 = arith.constant 1428 : index
    %4 = vector.load %arg13[%c0_4, %c1428] : memref<3x1536xf32, #tpu.memory_space<vmem>>, vector<3x108xf32>
    tpu.vector_store %arg13[%c0_4, %c1428], %3 {strides = array<i32>} : memref<3x1536xf32, #tpu.memory_space<vmem>>, vector<3x108xf32>,
    %cst_5 = arith.constant 0.000000e+00 : bf16
    %5 = vector.broadcast %cst_5 : bf16 to vector<16x35xbf16>
    %c0_6 = arith.constant 0 : index
    %c0_7 = arith.constant 0 : index
    %6 = vector.load %arg14[%c0_6, %c0_7] : memref<16x1536xbf16, #tpu.memory_space<vmem>>, vector<16x35xbf16>
    tpu.vector_store %arg14[%c0_6, %c0_7], %5 {strides = array<i32>} : memref<16x1536xbf16, #tpu.memory_space<vmem>>, vector<16x35xbf16>,
    %cst_8 = arith.constant 0.000000e+00 : bf16
    %7 = vector.broadcast %cst_8 : bf16 to vector<16x141xbf16>
    %c0_9 = arith.constant 0 : index
    %c1395 = arith.constant 1395 : index
    %8 = vector.load %arg14[%c0_9, %c1395] : memref<16x1536xbf16, #tpu.memory_space<vmem>>, vector<16x141xbf16>
    tpu.vector_store %arg14[%c0_9, %c1395], %7 {strides = array<i32>} : memref<16x1536xbf16, #tpu.memory_space<vmem>>, vector<16x141xbf16>,
    %cst_10 = arith.constant 0.000000e+00 : bf16
    %9 = vector.broadcast %cst_10 : bf16 to vector<16x35xbf16>
    %c0_11 = arith.constant 0 : index
    %c0_12 = arith.constant 0 : index
    %10 = vector.load %arg15[%c0_11, %c0_12] : memref<16x1536xbf16, #tpu.memory_space<vmem>>, vector<16x35xbf16>
    tpu.vector_store %arg15[%c0_11, %c0_12], %9 {strides = array<i32>} : memref<16x1536xbf16, #tpu.memory_space<vmem>>, vector<16x35xbf16>,
    %cst_13 = arith.constant 0.000000e+00 : bf16
    %11 = vector.broadcast %cst_13 : bf16 to vector<16x141xbf16>
    %c0_14 = arith.constant 0 : index
    %c1395_15 = arith.constant 1395 : index
    %12 = vector.load %arg15[%c0_14, %c1395_15] : memref<16x1536xbf16, #tpu.memory_space<vmem>>, vector<16x141xbf16>
    tpu.vector_store %arg15[%c0_14, %c1395_15], %11 {strides = array<i32>} : memref<16x1536xbf16, #tpu.memory_space<vmem>>, vector<16x141xbf16>,
    %c0_16 = arith.constant 0 : index
    %c0_17 = arith.constant 0 : index
    %13 = vector.load %arg13[%c0_16, %c0_17] : memref<3x1536xf32, #tpu.memory_space<vmem>>, vector<3x1360xf32>
    %14 = arith.truncf %13 : vector<3x1360xf32> to vector<3x1360xbf16>
    %c0_18 = arith.constant 0 : index
    %c1 = arith.constant 1 : index
    %15 = vector.load %arg13[%c0_18, %c1] : memref<3x1536xf32, #tpu.memory_space<vmem>>, vector<3x1360xf32>
    %16 = arith.truncf %15 : vector<3x1360xf32> to vector<3x1360xbf16>
    %c0_19 = arith.constant 0 : index
    %c2 = arith.constant 2 : index
    %17 = vector.load %arg13[%c0_19, %c2] : memref<3x1536xf32, #tpu.memory_space<vmem>>, vector<3x1360xf32>
    %18 = arith.truncf %17 : vector<3x1360xf32> to vector<3x1360xbf16>
    %c0_20 = arith.constant 0 : index
    %c34 = arith.constant 34 : index
    %19 = vector.load %arg13[%c0_20, %c34] : memref<3x1536xf32, #tpu.memory_space<vmem>>, vector<3x1360xf32>
    %20 = arith.truncf %19 : vector<3x1360xf32> to vector<3x1360xbf16>
    %c0_21 = arith.constant 0 : index
    %c35 = arith.constant 35 : index
    %21 = vector.load %arg13[%c0_21, %c35] : memref<3x1536xf32, #tpu.memory_space<vmem>>, vector<3x1360xf32>
    %22 = arith.truncf %21 : vector<3x1360xf32> to vector<3x1360xbf16>
    %c0_22 = arith.constant 0 : index
    %c36 = arith.constant 36 : index
    %23 = vector.load %arg13[%c0_22, %c36] : memref<3x1536xf32, #tpu.memory_space<vmem>>, vector<3x1360xf32>
    %24 = arith.truncf %23 : vector<3x1360xf32> to vector<3x1360xbf16>
    %c0_23 = arith.constant 0 : index
    %c68 = arith.constant 68 : index
    %25 = vector.load %arg13[%c0_23, %c68] : memref<3x1536xf32, #tpu.memory_space<vmem>>, vector<3x1360xf32>
    %26 = arith.truncf %25 : vector<3x1360xf32> to vector<3x1360xbf16>
    %c0_24 = arith.constant 0 : index
    %c69 = arith.constant 69 : index
    %27 = vector.load %arg13[%c0_24, %c69] : memref<3x1536xf32, #tpu.memory_space<vmem>>, vector<3x1360xf32>
    %28 = arith.truncf %27 : vector<3x1360xf32> to vector<3x1360xbf16>
    %c0_25 = arith.constant 0 : index
    %c70 = arith.constant 70 : index
    %29 = vector.load %arg13[%c0_25, %c70] : memref<3x1536xf32, #tpu.memory_space<vmem>>, vector<3x1360xf32>
    %30 = arith.truncf %29 : vector<3x1360xf32> to vector<3x1360xbf16>
    %31 = tpu.concatenate %14, %16, %18, %20, %22, %24, %26, %28, %30 in 0 : vector<3x1360xbf16>, vector<3x1360xbf16>, vector<3x1360xbf16>, vector<3x1360xbf16>, vector<3x1360xbf16>, vector<3x1360xbf16>, vector<3x1360xbf16>, vector<3x1360xbf16>, vector<3x1360xbf16> -> vector<27x1360xbf16>
    %c0_26 = arith.constant 0 : index
    %c0_27 = arith.constant 0 : index
    %32 = vector.load %arg4[%c0_26, %c0_27] : memref<16x27xbf16, #tpu.memory_space<vmem>>, vector<16x27xbf16>
    %cst_28 = arith.constant dense<0.000000e+00> : vector<16x1360xf32>
    %33 = tpu.matmul %32, %31, %cst_28 {dimension_numbers = #tpu.dot_dimension_numbers<[1], [0], [0], [1], [0, 0, 1, 1], [], []>} : vector<16x27xbf16>, vector<27x1360xbf16>, vector<16x1360xf32> -> vector<16x1360xf32>
    %c0_29 = arith.constant 0 : index
    %c0_30 = arith.constant 0 : index
    %34 = vector.load %arg5[%c0_29, %c0_30] : memref<16x1xf32, #tpu.memory_space<vmem>>, vector<16x1xf32>
    %35 = vector.broadcast %34 : vector<16x1xf32> to vector<16x1360xf32>
    %36 = arith.addf %33, %35 : vector<16x1360xf32>
    %cst_31 = arith.constant 0.000000e+00 : f32
    %37 = vector.broadcast %cst_31 : f32 to vector<16x1360xf32>
    %38 = arith.maximumf %36, %37 : vector<16x1360xf32>
    %c0_32 = arith.constant 0 : index
    %c0_33 = arith.constant 0 : index
    %c0_34 = arith.constant 0 : index
    %39 = vector.load %arg3[%c0_32, %c0_33, %c0_34] : memref<1x1x1360xf32, #tpu.memory_space<vmem>>, vector<1x1x1360xf32>
    %40 = vector.shape_cast %39 : vector<1x1x1360xf32> to vector<1x1360xf32>
    %41 = vector.broadcast %40 : vector<1x1360xf32> to vector<16x1360xf32>
    %42 = arith.mulf %38, %41 : vector<16x1360xf32>
    %43 = arith.truncf %42 : vector<16x1360xf32> to vector<16x1360xbf16>
    %c0_35 = arith.constant 0 : index
    %c35_36 = arith.constant 35 : index
    %44 = vector.load %arg14[%c0_35, %c35_36] : memref<16x1536xbf16, #tpu.memory_space<vmem>>, vector<16x1360xbf16>
    tpu.vector_store %arg14[%c0_35, %c35_36], %43 {strides = array<i32>} : memref<16x1536xbf16, #tpu.memory_space<vmem>>, vector<16x1360xbf16>,
    %c0_37 = arith.constant 0 : index
    %c0_38 = arith.constant 0 : index
    %45 = vector.load %arg14[%c0_37, %c0_38] : memref<16x1536xbf16, #tpu.memory_space<vmem>>, vector<16x1360xbf16>
    %c0_39 = arith.constant 0 : index
    %c1_40 = arith.constant 1 : index
    %46 = vector.load %arg14[%c0_39, %c1_40] : memref<16x1536xbf16, #tpu.memory_space<vmem>>, vector<16x1360xbf16>
    %c0_41 = arith.constant 0 : index
    %c2_42 = arith.constant 2 : index
    %47 = vector.load %arg14[%c0_41, %c2_42] : memref<16x1536xbf16, #tpu.memory_space<vmem>>, vector<16x1360xbf16>
    %c0_43 = arith.constant 0 : index
    %c34_44 = arith.constant 34 : index
    %48 = vector.load %arg14[%c0_43, %c34_44] : memref<16x1536xbf16, #tpu.memory_space<vmem>>, vector<16x1360xbf16>
    %c0_45 = arith.constant 0 : index
    %c35_46 = arith.constant 35 : index
    %49 = vector.load %arg14[%c0_45, %c35_46] : memref<16x1536xbf16, #tpu.memory_space<vmem>>, vector<16x1360xbf16>
    %c0_47 = arith.constant 0 : index
    %c36_48 = arith.constant 36 : index
    %50 = vector.load %arg14[%c0_47, %c36_48] : memref<16x1536xbf16, #tpu.memory_space<vmem>>, vector<16x1360xbf16>
    %c0_49 = arith.constant 0 : index
    %c68_50 = arith.constant 68 : index
    %51 = vector.load %arg14[%c0_49, %c68_50] : memref<16x1536xbf16, #tpu.memory_space<vmem>>, vector<16x1360xbf16>
    %c0_51 = arith.constant 0 : index
    %c69_52 = arith.constant 69 : index
    %52 = vector.load %arg14[%c0_51, %c69_52] : memref<16x1536xbf16, #tpu.memory_space<vmem>>, vector<16x1360xbf16>
    %c0_53 = arith.constant 0 : index
    %c70_54 = arith.constant 70 : index
    %53 = vector.load %arg14[%c0_53, %c70_54] : memref<16x1536xbf16, #tpu.memory_space<vmem>>, vector<16x1360xbf16>
    %54 = tpu.concatenate %45, %46, %47, %48, %49, %50, %51, %52, %53 in 0 : vector<16x1360xbf16>, vector<16x1360xbf16>, vector<16x1360xbf16>, vector<16x1360xbf16>, vector<16x1360xbf16>, vector<16x1360xbf16>, vector<16x1360xbf16>, vector<16x1360xbf16>, vector<16x1360xbf16> -> vector<144x1360xbf16>
    %c0_55 = arith.constant 0 : index
    %c0_56 = arith.constant 0 : index
    %55 = vector.load %arg6[%c0_55, %c0_56] : memref<16x144xbf16, #tpu.memory_space<vmem>>, vector<16x144xbf16>
    %cst_57 = arith.constant dense<0.000000e+00> : vector<16x1360xf32>
    %56 = tpu.matmul %55, %54, %cst_57 {dimension_numbers = #tpu.dot_dimension_numbers<[1], [0], [0], [1], [0, 0, 1, 1], [], []>} : vector<16x144xbf16>, vector<144x1360xbf16>, vector<16x1360xf32> -> vector<16x1360xf32>
    %c0_58 = arith.constant 0 : index
    %c0_59 = arith.constant 0 : index
    %57 = vector.load %arg7[%c0_58, %c0_59] : memref<16x1xf32, #tpu.memory_space<vmem>>, vector<16x1xf32>
    %58 = vector.broadcast %57 : vector<16x1xf32> to vector<16x1360xf32>
    %59 = arith.addf %56, %58 : vector<16x1360xf32>
    %cst_60 = arith.constant 0.000000e+00 : f32
    %60 = vector.broadcast %cst_60 : f32 to vector<16x1360xf32>
    %61 = arith.maximumf %59, %60 : vector<16x1360xf32>
    %c0_61 = arith.constant 0 : index
    %c0_62 = arith.constant 0 : index
    %c0_63 = arith.constant 0 : index
    %62 = vector.load %arg3[%c0_61, %c0_62, %c0_63] : memref<1x1x1360xf32, #tpu.memory_space<vmem>>, vector<1x1x1360xf32>
    %63 = vector.shape_cast %62 : vector<1x1x1360xf32> to vector<1x1360xf32>
    %64 = vector.broadcast %63 : vector<1x1360xf32> to vector<16x1360xf32>
    %65 = arith.mulf %61, %64 : vector<16x1360xf32>
    %66 = arith.truncf %65 : vector<16x1360xf32> to vector<16x1360xbf16>
    %c0_64 = arith.constant 0 : index
    %c35_65 = arith.constant 35 : index
    %67 = vector.load %arg15[%c0_64, %c35_65] : memref<16x1536xbf16, #tpu.memory_space<vmem>>, vector<16x1360xbf16>
    tpu.vector_store %arg15[%c0_64, %c35_65], %66 {strides = array<i32>} : memref<16x1536xbf16, #tpu.memory_space<vmem>>, vector<16x1360xbf16>,
    %c0_66 = arith.constant 0 : index
    %c0_67 = arith.constant 0 : index
    %68 = vector.load %arg15[%c0_66, %c0_67] : memref<16x1536xbf16, #tpu.memory_space<vmem>>, vector<16x1360xbf16>
    %c0_68 = arith.constant 0 : index
    %c1_69 = arith.constant 1 : index
    %69 = vector.load %arg15[%c0_68, %c1_69] : memref<16x1536xbf16, #tpu.memory_space<vmem>>, vector<16x1360xbf16>
    %c0_70 = arith.constant 0 : index
    %c2_71 = arith.constant 2 : index
    %70 = vector.load %arg15[%c0_70, %c2_71] : memref<16x1536xbf16, #tpu.memory_space<vmem>>, vector<16x1360xbf16>
    %c0_72 = arith.constant 0 : index
    %c34_73 = arith.constant 34 : index
    %71 = vector.load %arg15[%c0_72, %c34_73] : memref<16x1536xbf16, #tpu.memory_space<vmem>>, vector<16x1360xbf16>
    %c0_74 = arith.constant 0 : index
    %c35_75 = arith.constant 35 : index
    %72 = vector.load %arg15[%c0_74, %c35_75] : memref<16x1536xbf16, #tpu.memory_space<vmem>>, vector<16x1360xbf16>
    %c0_76 = arith.constant 0 : index
    %c36_77 = arith.constant 36 : index
    %73 = vector.load %arg15[%c0_76, %c36_77] : memref<16x1536xbf16, #tpu.memory_space<vmem>>, vector<16x1360xbf16>
    %c0_78 = arith.constant 0 : index
    %c68_79 = arith.constant 68 : index
    %74 = vector.load %arg15[%c0_78, %c68_79] : memref<16x1536xbf16, #tpu.memory_space<vmem>>, vector<16x1360xbf16>
    %c0_80 = arith.constant 0 : index
    %c69_81 = arith.constant 69 : index
    %75 = vector.load %arg15[%c0_80, %c69_81] : memref<16x1536xbf16, #tpu.memory_space<vmem>>, vector<16x1360xbf16>
    %c0_82 = arith.constant 0 : index
    %c70_83 = arith.constant 70 : index
    %76 = vector.load %arg15[%c0_82, %c70_83] : memref<16x1536xbf16, #tpu.memory_space<vmem>>, vector<16x1360xbf16>
    %77 = tpu.concatenate %68, %69, %70, %71, %72, %73, %74, %75, %76 in 0 : vector<16x1360xbf16>, vector<16x1360xbf16>, vector<16x1360xbf16>, vector<16x1360xbf16>, vector<16x1360xbf16>, vector<16x1360xbf16>, vector<16x1360xbf16>, vector<16x1360xbf16>, vector<16x1360xbf16> -> vector<144x1360xbf16>
    %c0_84 = arith.constant 0 : index
    %c0_85 = arith.constant 0 : index
    %78 = vector.load %arg8[%c0_84, %c0_85] : memref<16x144xbf16, #tpu.memory_space<vmem>>, vector<16x144xbf16>
    %cst_86 = arith.constant dense<0.000000e+00> : vector<16x1360xf32>
    %79 = tpu.matmul %78, %77, %cst_86 {dimension_numbers = #tpu.dot_dimension_numbers<[1], [0], [0], [1], [0, 0, 1, 1], [], []>} : vector<16x144xbf16>, vector<144x1360xbf16>, vector<16x1360xf32> -> vector<16x1360xf32>
    %c0_87 = arith.constant 0 : index
    %c0_88 = arith.constant 0 : index
    %80 = vector.load %arg9[%c0_87, %c0_88] : memref<16x1xf32, #tpu.memory_space<vmem>>, vector<16x1xf32>
    %81 = vector.broadcast %80 : vector<16x1xf32> to vector<16x1360xf32>
    %82 = arith.addf %79, %81 : vector<16x1360xf32>
    %cst_89 = arith.constant 0.000000e+00 : f32
    %83 = vector.broadcast %cst_89 : f32 to vector<16x1360xf32>
    %84 = arith.maximumf %82, %83 : vector<16x1360xf32>
    %c0_90 = arith.constant 0 : index
    %c0_91 = arith.constant 0 : index
    %c0_92 = arith.constant 0 : index
    %85 = vector.load %arg3[%c0_90, %c0_91, %c0_92] : memref<1x1x1360xf32, #tpu.memory_space<vmem>>, vector<1x1x1360xf32>
    %86 = vector.shape_cast %85 : vector<1x1x1360xf32> to vector<1x1360xf32>
    %87 = vector.broadcast %86 : vector<1x1360xf32> to vector<16x1360xf32>
    %88 = arith.mulf %84, %87 : vector<16x1360xf32>
    %89 = arith.truncf %88 : vector<16x1360xf32> to vector<16x1360xbf16>
    %c0_93 = arith.constant 0 : index
    %c35_94 = arith.constant 35 : index
    %90 = vector.load %arg14[%c0_93, %c35_94] : memref<16x1536xbf16, #tpu.memory_space<vmem>>, vector<16x1360xbf16>
    tpu.vector_store %arg14[%c0_93, %c35_94], %89 {strides = array<i32>} : memref<16x1536xbf16, #tpu.memory_space<vmem>>, vector<16x1360xbf16>,
    %c0_95 = arith.constant 0 : index
    %c136 = arith.constant 136 : index
    %91 = vector.load %arg14[%c0_95, %c136] : memref<16x1536xbf16, #tpu.memory_space<vmem>>, vector<16x1088xbf16>
    %c0_96 = arith.constant 0 : index
    %c137 = arith.constant 137 : index
    %92 = vector.load %arg14[%c0_96, %c137] : memref<16x1536xbf16, #tpu.memory_space<vmem>>, vector<16x1088xbf16>
    %c0_97 = arith.constant 0 : index
    %c138 = arith.constant 138 : index
    %93 = vector.load %arg14[%c0_97, %c138] : memref<16x1536xbf16, #tpu.memory_space<vmem>>, vector<16x1088xbf16>
    %c0_98 = arith.constant 0 : index
    %c170 = arith.constant 170 : index
    %94 = vector.load %arg14[%c0_98, %c170] : memref<16x1536xbf16, #tpu.memory_space<vmem>>, vector<16x1088xbf16>
    %c0_99 = arith.constant 0 : index
    %c171 = arith.constant 171 : index
    %95 = vector.load %arg14[%c0_99, %c171] : memref<16x1536xbf16, #tpu.memory_space<vmem>>, vector<16x1088xbf16>
    %c0_100 = arith.constant 0 : index
    %c172 = arith.constant 172 : index
    %96 = vector.load %arg14[%c0_100, %c172] : memref<16x1536xbf16, #tpu.memory_space<vmem>>, vector<16x1088xbf16>
    %c0_101 = arith.constant 0 : index
    %c204 = arith.constant 204 : index
    %97 = vector.load %arg14[%c0_101, %c204] : memref<16x1536xbf16, #tpu.memory_space<vmem>>, vector<16x1088xbf16>
    %c0_102 = arith.constant 0 : index
    %c205 = arith.constant 205 : index
    %98 = vector.load %arg14[%c0_102, %c205] : memref<16x1536xbf16, #tpu.memory_space<vmem>>, vector<16x1088xbf16>
    %c0_103 = arith.constant 0 : index
    %c206 = arith.constant 206 : index
    %99 = vector.load %arg14[%c0_103, %c206] : memref<16x1536xbf16, #tpu.memory_space<vmem>>, vector<16x1088xbf16>
    %100 = tpu.concatenate %91, %92, %93, %94, %95, %96, %97, %98, %99 in 0 : vector<16x1088xbf16>, vector<16x1088xbf16>, vector<16x1088xbf16>, vector<16x1088xbf16>, vector<16x1088xbf16>, vector<16x1088xbf16>, vector<16x1088xbf16>, vector<16x1088xbf16>, vector<16x1088xbf16> -> vector<144x1088xbf16>
    %c0_104 = arith.constant 0 : index
    %c0_105 = arith.constant 0 : index
    %101 = vector.load %arg10[%c0_104, %c0_105] : memref<3x144xbf16, #tpu.memory_space<vmem>>, vector<3x144xbf16>
    %cst_106 = arith.constant dense<0.000000e+00> : vector<3x1088xf32>
    %102 = tpu.matmul %101, %100, %cst_106 {dimension_numbers = #tpu.dot_dimension_numbers<[1], [0], [0], [1], [0, 0, 1, 1], [], []>} : vector<3x144xbf16>, vector<144x1088xbf16>, vector<3x1088xf32> -> vector<3x1088xf32>
    %c0_107 = arith.constant 0 : index
    %c0_108 = arith.constant 0 : index
    %103 = vector.load %arg11[%c0_107, %c0_108] : memref<3x1xf32, #tpu.memory_space<vmem>>, vector<3x1xf32>
    %104 = vector.broadcast %103 : vector<3x1xf32> to vector<3x1088xf32>
    %105 = arith.addf %102, %104 : vector<3x1088xf32>
    %c0_109 = arith.constant 0 : index
    %c171_110 = arith.constant 171 : index
    %106 = vector.load %arg13[%c0_109, %c171_110] : memref<3x1536xf32, #tpu.memory_space<vmem>>, vector<3x1088xf32>
    %107 = arith.addf %105, %106 : vector<3x1088xf32>
    %c0_111 = arith.constant 0 : index
    %c0_112 = arith.constant 0 : index
    %c0_113 = arith.constant 0 : index
    %108 = vector.load %arg12[%c0_111, %c0_112, %c0_113] : memref<1x3x1088xf32, #tpu.memory_space<vmem>>, vector<1x3x1088xf32>
    %109 = vector.shape_cast %108 : vector<1x3x1088xf32> to vector<3x1088xf32>
    %110 = vector.shape_cast %107 : vector<3x1088xf32> to vector<1x3x1088xf32>
    tpu.vector_store %arg12[%c0_111, %c0_112, %c0_113], %110 {strides = array<i32>} : memref<1x3x1088xf32, #tpu.memory_space<vmem>>, vector<1x3x1088xf32>,
    return
  }
  func.func @transform_0(%arg0: i32, %arg1: i32) -> (i32, i32, i32) {
    %c0_i32 = arith.constant 0 : i32
    %c0_i32_0 = arith.constant 0 : i32
    %c0_i32_1 = arith.constant 0 : i32
    return %arg0, %c0_i32, %c0_i32_0 : i32, i32, i32
  }
  func.func @transform_1(%arg0: i32, %arg1: i32) -> (i32, i32, i32) {
    %c0_i32 = arith.constant 0 : i32
    %c0_i32_0 = arith.constant 0 : i32
    %c0_i32_1 = arith.constant 0 : i32
    return %arg1, %c0_i32, %c0_i32_0 : i32, i32, i32
  }
  func.func @transform_2(%arg0: i32, %arg1: i32) -> (i32, i32) {
    %c0_i32 = arith.constant 0 : i32
    %c0_i32_0 = arith.constant 0 : i32
    %c0_i32_1 = arith.constant 0 : i32
    return %c0_i32, %c0_i32_0 : i32, i32
  }
  func.func @transform_3(%arg0: i32, %arg1: i32) -> (i32, i32) {
    %c0_i32 = arith.constant 0 : i32
    %c0_i32_0 = arith.constant 0 : i32
    %c0_i32_1 = arith.constant 0 : i32
    return %c0_i32, %c0_i32_0 : i32, i32
  }
  func.func @transform_4(%arg0: i32, %arg1: i32) -> (i32, i32) {
    %c0_i32 = arith.constant 0 : i32
    %c0_i32_0 = arith.constant 0 : i32
    %c0_i32_1 = arith.constant 0 : i32
    return %c0_i32, %c0_i32_0 : i32, i32
  }
  func.func @transform_5(%arg0: i32, %arg1: i32) -> (i32, i32) {
    %c0_i32 = arith.constant 0 : i32
    %c0_i32_0 = arith.constant 0 : i32
    %c0_i32_1 = arith.constant 0 : i32
    return %c0_i32, %c0_i32_0 : i32, i32
  }
  func.func @transform_6(%arg0: i32, %arg1: i32) -> (i32, i32) {
    %c0_i32 = arith.constant 0 : i32
    %c0_i32_0 = arith.constant 0 : i32
    %c0_i32_1 = arith.constant 0 : i32
    return %c0_i32, %c0_i32_0 : i32, i32
  }
  func.func @transform_7(%arg0: i32, %arg1: i32) -> (i32, i32) {
    %c0_i32 = arith.constant 0 : i32
    %c0_i32_0 = arith.constant 0 : i32
    %c0_i32_1 = arith.constant 0 : i32
    return %c0_i32, %c0_i32_0 : i32, i32
  }
  func.func @transform_8(%arg0: i32, %arg1: i32) -> (i32, i32) {
    %c0_i32 = arith.constant 0 : i32
    %c0_i32_0 = arith.constant 0 : i32
    %c0_i32_1 = arith.constant 0 : i32
    return %c0_i32, %c0_i32_0 : i32, i32
  }
  func.func @transform_9(%arg0: i32, %arg1: i32) -> (i32, i32) {
    %c0_i32 = arith.constant 0 : i32
    %c0_i32_0 = arith.constant 0 : i32
    %c0_i32_1 = arith.constant 0 : i32
    return %c0_i32, %c0_i32_0 : i32, i32
  }
  func.func @transform_10(%arg0: i32, %arg1: i32) -> (i32, i32, i32) {
    %c0_i32 = arith.constant 0 : i32
    %c0_i32_0 = arith.constant 0 : i32
    return %arg0, %c0_i32, %arg1 : i32, i32, i32
  }
}

</mosaic_0001>

<bundles_post_ra>
// kernel: tpu_custom_call.1
= control target key start
LH: loop header
LB: loop body
LE: loop exit
PB: predicated region body
PF: predicated region fallthrough
CT: control target
= control target key end

     0   :  { %s4678_s13 = smov 0   ;;  %s4680_s14 = smov 0   ;;  %s7210_s0 = inlined_call_operand.vmem [shape: f32[2,3,1428], index: 0, kind: input, shape index: {}]   ;;  %s7211_s1 = inlined_call_operand.vmem [shape: f32[1,1,1360], index: 1, kind: input, shape index: {}]   ;;  %s7212_s2 = inlined_call_operand.vmem [shape: bf16[16,27], index: 2, kind: input, shape index: {}]   ;;  %s7213_s3 = inlined_call_operand.vmem [shape: f32[16,1], index: 3, kind: input, shape index: {}]   ;;  %s7214_s4 = inlined_call_operand.vmem [shape: bf16[16,144], index: 4, kind: input, shape index: {}]   ;;  %s7215_s5 = inlined_call_operand.vmem [shape: f32[16,1], index: 5, kind: input, shape index: {}]   ;;  %s7216_s6 = inlined_call_operand.vmem [shape: bf16[16,144], index: 6, kind: input, shape index: {}]   ;;  %s7217_s7 = inlined_call_operand.vmem [shape: f32[16,1], index: 7, kind: input, shape index: {}]   ;;  %s7218_s8 = inlined_call_operand.vmem [shape: bf16[3,144], index: 8, kind: input, shape index: {}]   ;;  %s7219_s9 = inlined_call_operand.vmem [shape: f32[3,1], index: 9, kind: input, shape index: {}]   ;;  %s7220_s10 = inlined_call_operand.vmem [shape: f32[2,3,1088], index: 10, kind: output, shape index: {}]  }
   0x1   :  { %s4682_s15 = smov 0  }
   0x2 LB: > { %s32_s16 = sadd.s32 1, %s4602_s14  ;;  %p4451_p0 = scmp.ge.s32.totalorder %s4606_s15, 1  ;;  %s4606_s15 = sphi %s4682_s15, %s20_s15   ;;  %s4602_s14 = sphi %s4680_s14, %s7358_s14   ;;  %s4598_s13 = sphi %s4678_s13, %s7357_s13  }
   0x3   : > { %p34_p1 = scmp.ge.s32.totalorder %s32_s16, 2  ;;  %p335_p2 = scmp.lt.s32.totalorder %s4606_s15, 3 }
   0x5   : > { %s7360_s16 = smov (%p34_p1, %s32_s16), 0  ;;  %p336_p3 = pnand %p4451_p0, %p335_p2 }
   0x6   : > { %p381_p4 = scmp.lt.s32.totalorder (!%p336_p3), %s4598_s13, 1  ;;  %vm412_vm0 = vcmask (!%p336_p3), 1042432   ;;  %vm413_vm1 = vcmask (!%p336_p3), 161796   ;;  %s4608_s21 = smov (!%p336_p3), 126   ;;  %vm416_vm3 = vcmask (!%p336_p3), 1042592   ;;  %vm1061_vm4 = vcmask (!%p336_p3), 1041408  }
   0x7   : > { %339 = sbr.rel (%p336_p3) target bundleno = 2356 (0x934), region = 60  ;;  %vm414_vm2 = vmor (!%p336_p3), %vm413_vm1, %vm412_vm0  ;;  %s4609_s22 = smov (!%p336_p3), 93   ;;  %vm1062_vm5 = vsmask.f32 (!%p336_p3), 1280  ;;  %vm7223_vm6 = vcmask (!%p336_p3), 1039360   ;;  %vm7222_vm8 = vcmask (!%p336_p3), 1031168  }
   0x8   : > { %s4610_s23 = smov (!%p336_p3), 127   ;;  %s4611_s24 = smov (!%p336_p3), 94   ;;  %vm4956_vm7 = vmand (!%p336_p3), %vm1061_vm4, %vm1062_vm5  ;;  %vm706_vm9 = vcmask (!%p336_p3), 769024   ;;  %vm1119_vm10 = vcmask (!%p336_p3), 1044480   ;;  %vm1120_vm11 = vsmask.f32 (!%p336_p3), 4352 }
   0x9   : > { %s4612_s25 = smov (!%p336_p3), 92   ;;  %s4613_s26 = smov (!%p336_p3), 60   ;;  %vm1178_vm12 = vcmask (!%p336_p3), 1047552   ;;  %vm1179_vm13 = vsmask.f32 (!%p336_p3), 7424  ;;  %vm7221_vm14 = vcmask (!%p336_p3), 760832   ;;  %vm4976_vm15 = vmand (!%p336_p3), %vm1119_vm10, %vm1120_vm11 }
   0xa   : > { %s4614_s27 = smov (!%p336_p3), 59   ;;  %s4615_s28 = smov (!%p336_p3), 58   ;;  %vm838_vm1 = vcmask (!%p336_p3), 752640   ;;  %vm908_vm4 = vcmask (!%p336_p3), 490496   ;;  %vm990_vm5 = vcmask (!%p336_p3), 482304  }
   0xb   : > { %vm1238_vm11 = vsmask.f32 (!%p336_p3), 2304  ;;  %s4620_s29 = smov (!%p336_p3), 35  }
   0xe   : > { %s7362_s13 = smov (!%p381_p4, %s4598_s13), 1 }
   0xf   : > { %s4496_s17 = smul.u32 48, %s7362_s13 }
  0x11   : > { %s385_s20 = scalar_lea.vmem %s7210_s0, %s4496_s17 }
  0x12   : > { %v402_v0 = vld [vmem:[%s385_s20 + $0x8] sm:$0x77]  ;;  %v401_v1 = vld [vmem:[%s385_s20] sm:$0x77]  ;;  %v403_v2 = vld [vmem:[%s385_s20 + $0x10] sm:$0x77] }
  0x13   : > { %408 = vst [vmem:[#allocation2 + $0x8] sm:$0x77] %v402_v0  ;;  %407 = vst [vmem:[#allocation2] sm:$0x77] %v401_v1  ;;  %v404_v3 = vld [vmem:[%s385_s20 + $0x18] sm:$0x77] }
  0x14   : > { %409 = vst [vmem:[#allocation2 + $0x10] sm:$0x77] %v403_v2  ;;  %v405_v4 = vld [vmem:[%s385_s20 + $0x20] sm:$0x77]  ;;  %v406_v5 = vld [vmem:[%s385_s20 + $0x28] sm:$0x77] }
  0x15   : > { %410 = vst [vmem:[#allocation2 + $0x18] sm:$0x77] %v404_v3  ;;  %411 = vst [vmem:[#allocation2 + $0x20] sm:$0x77] %v405_v4 }
  0x16   : > { %415 = vst.msk [vmem:[#allocation2 + $0x28] sm:$0x77] %vm414_vm2, %v406_v5  ;;  %vm1133_vm2 = vcmask 1045504  }
  0x1a   : > { %v427_v6 = vld [vmem:[#allocation2 + $0x8] sm:$0x77]  ;;  %v426_v7 = vld [vmem:[#allocation2] sm:$0x77] }
  0x1b   : > { %v4703_v8 = vpack.c.bf16 %v427_v6, %v427_v6  ;;  %v4705_v9 = vpack.c.bf16 %v426_v7, %v426_v7  ;;  %v437_v10 = vcombine.high %v426_v7, %v426_v7  ;;  %v438_v34 = vcombine.high %v427_v6, %v427_v6  ;;  %v428_v61 = vld [vmem:[#allocation2 + $0x10] sm:$0x77] }
  0x1c   : > { %v4772_v62 = vpack.c.bf16 %v428_v61, %v428_v61 }
  0x1d   : > { %v609_v11 = vrot.slane %v4703_v8, 5  ;;  %v607_v12 = vrot.slane %v4705_v9, 5  ;;  %v4710_v13 = vshrl.u32 %v4703_v8, 16  ;;  %v4713_v14 = vshll.u32 %v4703_v8, 16 }
  0x1e   : > { %v4715_v15 = vpack.c.bf16 %v437_v10, %v437_v10  ;;  %v730_v16 = vrot.slane %v4703_v8, 2  ;;  %v728_v17 = vrot.slane %v4705_v9, 2  ;;  %v4722_v18 = vshrl.u32 %v4705_v9, 16 }
  0x1f   : > { %622 = vrot.lane.b32.xlu0 %v609_v11, %s4608_s21  ;;  %618 = vrot.lane.b32.xlu1 %v607_v12, %s4608_s21  ;;  %v4725_v19 = vshll.u32 %v4705_v9, 16  ;;  %v483_v20 = vrot.slane %v4710_v13, 6  ;;  %v486_v21 = vrot.slane %v4713_v14, 7  ;;  %v774_v32 = vrot.slane %v4713_v14, 1 }
  0x20   : > { %v608_v22 = vrot.slane %v4715_v15, 5  ;;  %v651_v24 = vrot.slane %v4722_v18, 3  ;;  %v476_v26 = vshll.u32 %v4715_v15, 16  ;;  %v729_v27 = vrot.slane %v4715_v15, 2 }
  0x21   : > { %v487_v23 = vor.u32 %v486_v21, %v483_v20  ;;  %v652_v25 = vrot.slane %v4725_v19, 4  ;;  %v467_v28 = vrot.slane %v4722_v18, 6  ;;  %v470_v29 = vrot.slane %v4725_v19, 7 }
  0x22   : > { %v773_v31 = vrot.slane %v476_v26, 1  ;;  %v473_v33 = vshrl.u32 %v4715_v15, 16  ;;  %v657_v36 = vrot.slane %v4710_v13, 3  ;;  %v658_v38 = vrot.slane %v4713_v14, 4 }
  0x23   : > { %743 = vrot.lane.b32.xlu0 %v730_v16, %s4609_s22  ;;  %739 = vrot.lane.b32.xlu1 %v728_v17, %s4609_s22  ;;  %v653_v30 = vor.u32 %v652_v25, %v651_v24  ;;  %v471_v35 = vor.u32 %v470_v29, %v467_v28  ;;  %v478_v40 = vrot.slane %v476_v26, 7  ;;  %v4746_v41 = vpack.c.bf16 %v438_v34, %v438_v34 }
  0x24   : > { %v4537_v37 = vpack.i.bf16 %v774_v32, %v773_v31  ;;  %v475_v39 = vrot.slane %v473_v33, 6  ;;  %v659_v42 = vor.u32 %v658_v38, %v657_v36  ;;  %v654_v44 = vrot.slane %v473_v33, 3 }
  0x25   : > { %v655_v45 = vrot.slane %v476_v26, 4  ;;  %v784_v46 = vor.u32 %v773_v31, %v473_v33  ;;  %v4753_v48 = vshll.u32 %v4746_v41, 16  ;;  %v873_v49 = vrot.slane %v4715_v15, 7 }
  0x26   : > { %v479_v43 = vor.u32 %v478_v40, %v475_v39  ;;  %v785_v50 = vor.u32 %v774_v32, %v4710_v13  ;;  %v772_v51 = vrot.slane %v4725_v19, 1  ;;  %v874_v54 = vrot.slane %v4703_v8, 7 }
  0x27   : > { %556 = vrot.lane.b32.xlu0 %v487_v23, %s4610_s23  ;;  %620 = vrot.lane.b32.xlu1 %v608_v22, %s4608_s21  ;;  %v656_v47 = vor.u32 %v655_v45, %v654_v44  ;;  %v775_v52 = vrot.slane %v4753_v48, 1  ;;  %v872_v55 = vrot.slane %v4705_v9, 7  ;;  %v926_v56 = vrot.slane %v4710_v13, 5 }
  0x28   : > { %v783_v57 = vor.u32 %v772_v51, %v4722_v18  ;;  %v927_v58 = vrot.slane %v4713_v14, 6  ;;  %v923_v59 = vrot.slane %v473_v33, 5  ;;  %v924_v60 = vrot.slane %v476_v26, 6 }
  0x29   : > { %v4542_v53 = vpack.i.bf16 %v775_v52, %v772_v51  ;;  %v920_v1 = vrot.slane %v4722_v18, 5  ;;  %v921_v2 = vrot.slane %v4725_v19, 6  ;;  %v1014_v3 = vrot.slane %v4715_v15, 4 }
  0x2a   : > { %v928_v63 = vor.u32 %v927_v58, %v926_v56  ;;  %v925_v0 = vor.u32 %v924_v60, %v923_v59  ;;  %v4782_v5 = vshrl.u32 %v4772_v62, 16  ;;  %v4785_v6 = vshll.u32 %v4772_v62, 16 }
  0x2b   : > { %684 = vrot.lane.b32.xlu0 %v653_v30, %s4611_s24  ;;  %741 = vrot.lane.b32.xlu1 %v729_v27, %s4609_s22  ;;  %v922_v4 = vor.u32 %v921_v2, %v920_v1  ;;  %v489_v7 = vshrl.u32 %v4746_v41, 16  ;;  %v1013_v10 = vrot.slane %v4705_v9, 4  ;;  %v1015_v11 = vrot.slane %v4703_v8, 4 }
  0x2c   : > { %v499_v12 = vrot.slane %v4782_v5, 6  ;;  %v502_v13 = vrot.slane %v4785_v6, 7  ;;  %v494_v16 = vrot.slane %v4753_v48, 7  ;;  %v439_v19 = vcombine.high %v428_v61, %v428_v61 }
  0x2d   : > { %v491_v14 = vrot.slane %v489_v7, 6  ;;  %v611_v20 = vrot.slane %v4772_v62, 5  ;;  %v610_v21 = vrot.slane %v4746_v41, 5  ;;  %v663_v22 = vrot.slane %v4782_v5, 3 }
  0x2e   : > { %v503_v17 = vor.u32 %v502_v13, %v499_v12  ;;  %v4616_v23 = vmov 0.0   ;;  %v664_v24 = vrot.slane %v4785_v6, 4  ;;  %v660_v25 = vrot.slane %v489_v7, 3 }
  0x2f   : > { %552 = vrot.lane.b32.xlu1 %v471_v35, %s4610_s23  ;;  %4538 = vrot.lane.b32.xlu0 %v4537_v37, %s4612_s25  ;;  %v495_v18 = vor.u32 %v494_v16, %v491_v14  ;;  %417 = vst.msk [vmem:[#allocation2 + $0x2c] sm:$0x7] %vm416_vm3, %v4616_v23  ;;  %v661_v26 = vrot.slane %v4753_v48, 4  ;;  %v4805_v27 = vpack.c.bf16 %v439_v19, %v439_v19  ;;  %v732_v31 = vrot.slane %v4772_v62, 2  ;;  %v430_v19 = vld [vmem:[#allocation2 + $0x20] sm:$0x77]  ;;  %vm4991_vm3 = vmand %vm1178_vm12, %vm1179_vm13 }
  0x30   : > { %v665_v28 = vor.u32 %v664_v24, %v663_v22  ;;  %v731_v32 = vrot.slane %v4746_v41, 2  ;;  %v776_v33 = vrot.slane %v4785_v6, 1  ;;  %v4617_v35 = vmov 0  }
  0x31   : > { %v662_v29 = vor.u32 %v661_v26, %v660_v25  ;;  %v4810_v30 = vshll.u32 %v4805_v27, 16  ;;  %422 = vst [vmem:[#allocation3 + $0x58] sm:$0xff] %v4617_v35  ;;  %1365 = vmatprep.mubr.bf16.mxu1 %v4617_v35  ;;  %1537 = vmatprep.mubr.bf16.mxu0 %v4617_v35  ;;  %v786_v36 = vor.u32 %v775_v52, %v489_v7  ;;  %v875_v38 = vrot.slane %v4746_v41, 7 }
  0x32   : > { %4563 = vset.pattern.permute.xlu0 %v4617_v35  ;;  %4562 = vset.pattern.permute.xlu1 %v4617_v35  ;;  %v787_v39 = vor.u32 %v776_v33, %v4782_v5  ;;  %v929_v40 = vrot.slane %v489_v7, 5  ;;  %v932_v44 = vrot.slane %v4782_v5, 5  ;;  %v933_v45 = vrot.slane %v4785_v6, 6 }
  0x33   : > { %688 = vrot.lane.b32.xlu1 %v659_v42, %s4611_s24  ;;  %554 = vrot.lane.b32.xlu0 %v479_v43, %s4610_s23  ;;  %v777_v34 = vrot.slane %v4810_v30, 1  ;;  %v930_v42 = vrot.slane %v4753_v48, 6  ;;  %v429_v43 = vld [vmem:[#allocation2 + $0x18] sm:$0x77]  ;;  %v1016_v51 = vrot.slane %v4746_v41, 4  ;;  %v1017_v58 = vrot.slane %v4772_v62, 4 }
  0x34   : > { %v934_v52 = vor.u32 %v933_v45, %v932_v44  ;;  %v440_v56 = vcombine.high %v429_v43, %v429_v43  ;;  %v612_v61 = vrot.slane %v4805_v27, 5  ;;  %v667_v1 = vrot.slane %v4810_v30, 4 }
  0x35   : > { %v4547_v37 = vpack.i.bf16 %v777_v34, %v776_v33  ;;  %v936_v26 = vrot.slane %v4810_v30, 6  ;;  %vm1192_vm12 = vcmask 1040384   ;;  %vm7225_vm13 = vcmask 474112  }
  0x36   : > { %v4855_v2 = vpack.c.bf16 %v440_v56, %v440_v56 }
  0x37   : > { %818 = vrot.lane.b32.xlu1 %v784_v46, %s4612_s25  ;;  %686 = vrot.lane.b32.xlu0 %v656_v47, %s4611_s24  ;;  %v931_v46 = vor.u32 %v930_v42, %v929_v40  ;;  %v876_v47 = vrot.slane %v4772_v62, 7  ;;  %v441_v42 = vcombine.high %v430_v19, %v430_v19 }
  0x38   : > { %v4861_v7 = vshll.u32 %v4855_v2, 16 }
  0x3a   : > { %v779_v13 = vrot.slane %v4861_v7, 1 }
  0x3b   : > { %886 = vrot.lane.b32.xlu1 %v873_v49, %s4613_s26  ;;  %820 = vrot.lane.b32.xlu0 %v785_v50, %s4612_s25  ;;  %v505_v49 = vshrl.u32 %v4805_v27, 16  ;;  %v4840_v50 = vpack.c.bf16 %v429_v43, %v429_v43  ;;  %v431_v43 = vld [vmem:[#allocation2 + $0x28] sm:$0x7] }
  0x3d   : > { %v507_v48 = vrot.slane %v505_v49, 6  ;;  %v734_v16 = vrot.slane %v4840_v50, 2  ;;  %v935_v25 = vrot.slane %v505_v49, 5 }
  0x3f   : > { %4543 = vrot.lane.b32.xlu1 %v4542_v53, %s4612_s25  ;;  %888 = vrot.lane.b32.xlu0 %v874_v54, %s4613_s26  ;;  %v510_v53 = vrot.slane %v4810_v30, 7  ;;  %v513_v54 = vshrl.u32 %v4840_v50, 16 }
  0x41   : > { %v515_v59 = vrot.slane %v513_v54, 6  ;;  %v669_v5 = vrot.slane %v513_v54, 3  ;;  %v938_v22 = vrot.slane %v513_v54, 5 }
  0x43   : > { %884 = vrot.lane.b32.xlu1 %v872_v55, %s4613_s26  ;;  %816 = vrot.lane.b32.xlu0 %v783_v57, %s4612_s25  ;;  %v516_v55 = vshll.u32 %v4840_v50, 16  ;;  %v511_v57 = vor.u32 %v510_v53, %v507_v48 }
  0x45   : > { %v518_v60 = vrot.slane %v516_v55, 7  ;;  %v670_v6 = vrot.slane %v516_v55, 4  ;;  %v778_v12 = vrot.slane %v516_v55, 1  ;;  %v939_v24 = vrot.slane %v516_v55, 6 }
  0x47   : > { %970 = vrot.lane.b32.xlu1 %v928_v63, %s4614_s27  ;;  %968 = vrot.lane.b32.xlu0 %v925_v0, %s4614_s27  ;;  %v519_v63 = vor.u32 %v518_v60, %v515_v59  ;;  %v666_v0 = vrot.slane %v505_v49, 3  ;;  %v4552_v14 = vpack.i.bf16 %v779_v13, %v778_v12 }
  0x4b   : > { %1027 = vrot.lane.b32.xlu1 %v1014_v3, %s4615_s28  ;;  %966 = vrot.lane.b32.xlu0 %v922_v4, %s4614_s27  ;;  %v613_v3 = vrot.slane %v4840_v50, 5  ;;  %v668_v4 = vor.u32 %v667_v1, %v666_v0 }
  0x4f   : > { %1025 = vrot.lane.b32.xlu1 %v1013_v10, %s4615_s28  ;;  %1029 = vrot.lane.b32.xlu0 %v1015_v11, %s4615_s28  ;;  %v733_v10 = vrot.slane %v4805_v27, 2  ;;  %v671_v11 = vor.u32 %v670_v6, %v669_v5 }
  0x53   : > { %560 = vrot.lane.b32.xlu1 %v503_v17, %s4610_s23  ;;  %558 = vrot.lane.b32.xlu0 %v495_v18, %s4610_s23  ;;  %v789_v17 = vor.u32 %v778_v12, %v513_v54  ;;  %v788_v18 = vor.u32 %v777_v34, %v505_v49  ;;  %v4908_v49 = vpack.c.bf16 %v431_v43, %v431_v43  ;;  %v614_v54 = vrot.slane %v4855_v2, 5 }
  0x55   : > { %v4925_v59 = vshrl.u32 %v4908_v49, 16  ;;  %v4928_v60 = vshll.u32 %v4908_v49, 16 }
  0x57   : > { %626 = vrot.lane.b32.xlu1 %v611_v20, %s4608_s21  ;;  %624 = vrot.lane.b32.xlu0 %v610_v21, %s4608_s21  ;;  %v878_v20 = vrot.slane %v4840_v50, 7  ;;  %v877_v21 = vrot.slane %v4805_v27, 7  ;;  %v547_v5 = vrot.slane %v4925_v59, 6  ;;  %v550_v6 = vrot.slane %v4928_v60, 7 }
  0x5b   : > { %692 = vrot.lane.b32.xlu1 %v665_v28, %s4611_s24  ;;  %690 = vrot.lane.b32.xlu0 %v662_v29, %s4611_s24  ;;  %v4881_v28 = vpack.c.bf16 %v430_v19, %v430_v19  ;;  %v4884_v29 = vshrl.u32 %v4855_v2, 16 }
  0x5d   : > { %v4889_v33 = vshrl.u32 %v4881_v28, 16  ;;  %v4892_v34 = vshll.u32 %v4881_v28, 16  ;;  %v523_v30 = vrot.slane %v4884_v29, 6  ;;  %v615_v53 = vrot.slane %v4881_v28, 5 }
  0x5f   : > { %747 = vrot.lane.b32.xlu1 %v732_v31, %s4609_s22  ;;  %745 = vrot.lane.b32.xlu0 %v731_v32, %s4609_s22  ;;  %v940_v31 = vor.u32 %v939_v24, %v938_v22  ;;  %v937_v32 = vor.u32 %v936_v26, %v935_v25  ;;  %v534_v40 = vrot.slane %v4892_v34, 7  ;;  %v675_v55 = vrot.slane %v4889_v33, 3 }
  0x60   : > { %v676_v56 = vrot.slane %v4892_v34, 4 }
  0x63   : > { %822 = vrot.lane.b32.xlu1 %v786_v36, %s4612_s25  ;;  %4548 = vrot.lane.b32.xlu0 %v4547_v37, %s4612_s25  ;;  %v1019_v36 = vrot.slane %v4840_v50, 4  ;;  %v526_v37 = vrot.slane %v4861_v7, 7 }
  0x67   : > { %890 = vrot.lane.b32.xlu1 %v875_v38, %s4613_s26  ;;  %824 = vrot.lane.b32.xlu0 %v787_v39, %s4612_s25  ;;  %v1018_v38 = vrot.slane %v4805_v27, 4  ;;  %v531_v39 = vrot.slane %v4889_v33, 6 }
  0x6b   : > { %972 = vrot.lane.b32.xlu1 %v931_v46, %s4614_s27  ;;  %892 = vrot.lane.b32.xlu0 %v876_v47, %s4613_s26  ;;  %v527_v46 = vor.u32 %v526_v37, %v523_v30  ;;  %v535_v47 = vor.u32 %v534_v40, %v531_v39  ;;  %v780_v30 = vrot.slane %v4892_v34, 1 }
  0x6f   : > { %1031 = vrot.lane.b32.xlu1 %v1016_v51, %s4615_s28  ;;  %974 = vrot.lane.b32.xlu0 %v934_v52, %s4614_s27  ;;  %v4910_v51 = vpack.c.bf16 %v441_v42, %v441_v42 }
  0x73   : > { %562 = vrot.lane.b32.xlu1 %v511_v57, %s4610_s23  ;;  %1033 = vrot.lane.b32.xlu0 %v1017_v58, %s4615_s28  ;;  %v672_v57 = vrot.slane %v4884_v29, 3  ;;  %v673_v58 = vrot.slane %v4861_v7, 4 }
  0x77   : > { %628 = vrot.lane.b32.xlu1 %v612_v61, %s4608_s21  ;;  %564 = vrot.lane.b32.xlu0 %v519_v63, %s4610_s23  ;;  %v4931_v61 = vshrl.u32 %v4910_v51, 16  ;;  %v4934_v63 = vshll.u32 %v4910_v51, 16 }
  0x79   : > { %v781_v37 = vrot.slane %v4934_v63, 1 }
  0x7b   : > { %694 = vrot.lane.b32.xlu1 %v668_v4, %s4611_s24  ;;  %630 = vrot.lane.b32.xlu0 %v613_v3, %s4608_s21  ;;  %v677_v3 = vor.u32 %v676_v56, %v675_v55  ;;  %v674_v4 = vor.u32 %v673_v58, %v672_v57  ;;  %v790_v55 = vor.u32 %v779_v13, %v4884_v29 }
  0x7c   : > { %v4557_v58 = vpack.i.bf16 %v781_v37, %v780_v30 }
  0x7f   : > { %749 = vrot.lane.b32.xlu1 %v733_v10, %s4609_s22  ;;  %696 = vrot.lane.b32.xlu0 %v671_v11, %s4611_s24  ;;  %v539_v10 = vrot.slane %v4931_v61, 6  ;;  %v542_v11 = vrot.slane %v4934_v63, 7 }
  0x83   : > { %4553 = vrot.lane.b32.xlu1 %v4552_v14, %s4612_s25  ;;  %751 = vrot.lane.b32.xlu0 %v734_v16, %s4609_s22  ;;  %v551_v16 = vor.u32 %v550_v6, %v547_v5 }
  0x87   : > { %828 = vrot.lane.b32.xlu1 %v789_v17, %s4612_s25  ;;  %826 = vrot.lane.b32.xlu0 %v788_v18, %s4612_s25  ;;  %v543_v17 = vor.u32 %v542_v11, %v539_v10 }
  0x8b   : > { %896 = vrot.lane.b32.xlu1 %v878_v20, %s4613_s26  ;;  %894 = vrot.lane.b32.xlu0 %v877_v21, %s4613_s26  ;;  %v736_v20 = vrot.slane %v4881_v28, 2  ;;  %v735_v21 = vrot.slane %v4855_v2, 2 }
  0x8f   : > { %978 = vrot.lane.b32.xlu1 %v940_v31, %s4614_s27  ;;  %976 = vrot.lane.b32.xlu0 %v937_v32, %s4614_s27  ;;  %v617_v31 = vrot.slane %v4908_v49, 5  ;;  %v616_v32 = vrot.slane %v4910_v51, 5 }
  0x91   : > { %v4902_v44 = vpop.permute.xlu0 %622  ;;  %v4904_v45 = vpop.permute.xlu1 %618 }
  0x93   : > { %1037 = vrot.lane.b32.xlu1 %v1019_v36, %s4615_s28  ;;  %1035 = vrot.lane.b32.xlu0 %v1018_v38, %s4615_s28 }
  0x95   : > { %v4912_v52 = vpop.permute.xlu0 %743  ;;  %v4914_v48 = vpop.permute.xlu1 %739 }
  0x97   : > { %568 = vrot.lane.b32.xlu1 %v535_v47, %s4610_s23  ;;  %566 = vrot.lane.b32.xlu0 %v527_v46, %s4610_s23 }
  0x99   : > { %v4936_v0 = vpop.permute.xlu0 %556  ;;  %v4938_v1 = vpop.permute.xlu1 %620 }
  0x9b   : > { %634 = vrot.lane.b32.xlu1 %v615_v53, %s4608_s21  ;;  %632 = vrot.lane.b32.xlu0 %v614_v54, %s4608_s21 }
  0x9d   : > { %v685_v12 = vpop.permute.xlu0 %684  ;;  %v4946_v14 = vpop.permute.xlu1 %741 }
  0x9e   : > { %v763_v56 = vsel %vm7221_vm14, %v4946_v14, %v4912_v52 }
  0x9f   : > { %700 = vrot.lane.b32.xlu1 %v677_v3, %s4611_s24  ;;  %698 = vrot.lane.b32.xlu0 %v674_v4, %s4611_s24 }
  0xa1   : > { %v553_v18 = vpop.permute.xlu1 %552  ;;  %v4950_v19 = vpop.permute.xlu0 %4538 }
  0xa2   : > { %v4541_v38 = vunpack.i.h.bf16 %v4950_v19  ;;  %v4540_v39 = vunpack.i.l.bf16 %v4950_v19  ;;  %v1288_v19 = vld [vmem:[%s7213_s3 + $0x8] sm:$0xff] }
  0xa3   : > { %572 = vrot.lane.b32.xlu1 %v551_v16, %s4610_s23  ;;  %570 = vrot.lane.b32.xlu0 %v543_v17, %s4610_s23  ;;  %v678_v16 = vrot.slane %v4931_v61, 3  ;;  %v679_v17 = vrot.slane %v4934_v63, 4 }
  0xa4   : > { %v840_v3 = vsel %vm838_vm1, %v4540_v39, %v4541_v38 }
  0xa5   : > { %v4960_v24 = vpop.permute.xlu1 %688  ;;  %v555_v25 = vpop.permute.xlu0 %554 }
  0xa6   : > { %v576_v26 = vsel %vm7223_vm6, %v555_v25, %v4936_v0  ;;  %v575_v46 = vsel %vm7223_vm6, %v553_v18, %v555_v25  ;;  %v641_v18 = vsel %vm7222_vm8, %v4904_v45, %v4938_v1  ;;  %v680_v45 = vor.u32 %v679_v17, %v678_v16 }
  0xa7   : > { %v1065_v36 = vsel %vm4956_vm7, %v4715_v15, %v576_v26  ;;  %755 = vrot.lane.b32.xlu1 %v736_v20, %s4609_s22  ;;  %753 = vrot.lane.b32.xlu0 %v735_v21, %s4609_s22  ;;  %v642_v15 = vsel %vm7222_vm8, %v4938_v1, %v4902_v44  ;;  %v1064_v4 = vsel %vm4956_vm7, %v4705_v9, %v575_v46  ;;  %v879_v9 = vrot.slane %v4855_v2, 7 }
  0xa8   : > { %v1081_v53 = vsel %vm412_vm0, %v1065_v36, %v642_v15  ;;  %v791_v20 = vor.u32 %v780_v30, %v4889_v33  ;;  %v1077_v21 = vsel %vm412_vm0, %v1064_v4, %v641_v18  ;;  %v880_v1 = vrot.slane %v4881_v28, 7 }
  0xa9   : > { %v4983_v42 = vpop.permute.xlu1 %818  ;;  %v687_v43 = vpop.permute.xlu0 %686  ;;  %v762_v36 = vsel %vm7221_vm14, %v4914_v48, %v4946_v14  ;;  %v942_v30 = vrot.slane %v4861_v7, 6  ;;  %v681_v15 = vrot.slane %v4925_v59, 3  ;;  %v944_v14 = vrot.slane %v4889_v33, 5  ;;  %vm5066_vm14 = vmand %vm412_vm0, %vm1238_vm11 }
  0xaa   : > { %v708_v47 = vsel %vm706_vm9, %v687_v43, %v4960_v24  ;;  %v707_v11 = vsel %vm706_vm9, %v685_v12, %v687_v43  ;;  %v682_v43 = vrot.slane %v4928_v60, 4  ;;  %vm1304_vm11 = vcmask 220160  }
  0xab   : > { %638 = vrot.lane.b32.xlu1 %v617_v31, %s4608_s21  ;;  %636 = vrot.lane.b32.xlu0 %v616_v32, %s4608_s21  ;;  %v1123_v57 = vsel %vm4976_vm15, %v1081_v53, %v708_v47  ;;  %v1122_v26 = vsel %vm4976_vm15, %v1077_v21, %v707_v11  ;;  %v941_v32 = vrot.slane %v4884_v29, 5  ;;  %v4618_v11 = vmov 65535  }
  0xac   : > { %v1140_v13 = vsel %vm1133_vm2, %v1123_v57, %v763_v56  ;;  %v1136_v47 = vsel %vm1133_vm2, %v1122_v26, %v762_v36  ;;  %v683_v7 = vor.u32 %v682_v43, %v681_v15  ;;  %v945_v56 = vrot.slane %v4892_v34, 6  ;;  %v458_v26 = vld [vmem:[#allocation2 + $0x28] sm:$0x77] }
  0xad   : > { %v887_v5 = vpop.permute.xlu1 %886  ;;  %v5014_v6 = vpop.permute.xlu0 %820  ;;  %v1182_v10 = vsel %vm4991_vm3, %v1140_v13, %v840_v3  ;;  %v943_v48 = vor.u32 %v942_v30, %v941_v32  ;;  %v1309_v16 = vsel %vm1119_vm10, 4294967295, %v4618_v11  ;;  %vm7224_vm10 = vcmask 1043456  }
  0xae   : > { %1333 = vmatprep.subr.bf16.mxu1 %v1182_v10  ;;  %v946_v3 = vor.u32 %v945_v56, %v944_v14  ;;  %v850_v21 = vsel %vm838_vm1, %v4983_v42, %v5014_v6  ;;  %v5085_v36 = vsel %vm1133_vm2, %v1309_v16, 0  ;;  %v782_v30 = vrot.slane %v4928_v60, 1 }
  0xaf   : > { %830 = vrot.lane.b32.xlu1 %v790_v55, %s4612_s25  ;;  %4558 = vrot.lane.b32.xlu0 %v4557_v58, %s4612_s25  ;;  %v737_v58 = vrot.slane %v4910_v51, 2  ;;  %v1021_v60 = vrot.slane %v4881_v28, 4  ;;  %v792_v56 = vor.u32 %v781_v37, %v4931_v61 }
  0xb1   : > { %v5029_v12 = vpop.permute.xlu1 %4543  ;;  %v5031_v25 = vpop.permute.xlu0 %888 }
  0xb2   : > { %v4545_v31 = vunpack.i.l.bf16 %v5029_v12  ;;  %v910_v33 = vsel %vm908_vm4, %v887_v5, %v5031_v25 }
  0xb3   : > { %898 = vrot.lane.b32.xlu1 %v879_v9, %s4613_s26  ;;  %832 = vrot.lane.b32.xlu0 %v791_v20, %s4612_s25  ;;  %v738_v20 = vrot.slane %v4908_v49, 2 }
  0xb4   : > { %v839_v46 = vsel %vm838_vm1, %v4545_v31, %v4540_v39  ;;  %v1199_v31 = vsel %vm1192_vm12, %v850_v21, %v910_v33 }
  0xb5   : > { %v885_v53 = vpop.permute.xlu1 %884  ;;  %v817_v29 = vpop.permute.xlu0 %816  ;;  %v1181_v55 = vsel %vm4991_vm3, %v1136_v47, %v839_v46 }
  0xb6   : > { %1334 = vmatpush1.bf16.msra.mxu1 %v1181_v55  ;;  %v909_v34 = vsel %vm908_vm4, %v885_v53, %v887_v5  ;;  %v849_v10 = vsel %vm838_vm1, %v817_v29, %v4983_v42  ;;  %v1020_v5 = vrot.slane %v4855_v2, 4  ;;  %v5100_v29 = vpack.c.bf16 %v458_v26, %v458_v26 }
  0xb7   : > { %702 = vrot.lane.b32.xlu1 %v680_v45, %s4611_s24  ;;  %900 = vrot.lane.b32.xlu0 %v880_v1, %s4613_s26  ;;  %v1195_v45 = vsel %vm1192_vm12, %v849_v10, %v909_v34  ;;  %v881_v34 = vrot.slane %v4910_v51, 7  ;;  %v947_v10 = vrot.slane %v4931_v61, 5 }
  0xb8   : > { %v882_v11 = vrot.slane %v5100_v29, 7 }
  0xb9   : > { %v5054_v57 = vpop.permute.xlu1 %970  ;;  %v969_v39 = vpop.permute.xlu0 %968 }
  0xba   : > { %v992_v18 = vsel %vm990_vm5, %v969_v39, %v5054_v57 }
  0xbb   : > { %980 = vrot.lane.b32.xlu1 %v943_v48, %s4614_s27  ;;  %704 = vrot.lane.b32.xlu0 %v683_v7, %s4611_s24  ;;  %v1241_v15 = vsel %vm5066_vm14, %v1199_v31, %v992_v18 }
  0xbd   : > { %v1028_v13 = vpop.permute.xlu1 %1027  ;;  %v967_v4 = vpop.permute.xlu0 %966 }
  0xbe   : > { %v991_v9 = vsel %vm990_vm5, %v967_v4, %v969_v39  ;;  %v793_v39 = vor.u32 %v782_v30, %v4925_v59  ;;  %v5117_v4 = vld [vmem:[%s7212_s2] sm:$0xff]   ;;  %v948_v59 = vrot.slane %v4934_v63, 6 }
  0xbf   : > { %757 = vrot.lane.b32.xlu1 %v737_v58, %s4609_s22  ;;  %982 = vrot.lane.b32.xlu0 %v946_v3, %s4614_s27  ;;  %v1240_v42 = vsel %vm5066_vm14, %v1195_v45, %v991_v9  ;;  %v460_v58 = vcombine.high %v458_v26, %v458_v26  ;;  %v951_v3 = vshrl.u32 %v5100_v29, 16 }
  0xc0   : > { %v949_v63 = vor.u32 %v948_v59, %v947_v10 }
  0xc1   : > { %v1026_v1 = vpop.permute.xlu1 %1025  ;;  %v5082_v32 = vpop.permute.xlu0 %1029  ;;  %v953_v16 = vrot.slane %v951_v3, 5  ;;  %v463_v9 = vpack.c.bf16 %v460_v58, %v460_v58 }
  0xc2   : > { %v1050_v43 = vsel %vm7225_vm13, %v1026_v1, %v1028_v13  ;;  %v1051_v46 = vsel %vm7225_vm13, %v1028_v13, %v5082_v32  ;;  %v954_v13 = vshll.u32 %v5100_v29, 16 }
  0xc3   : > { %v1254_v47 = vsel %vm7224_vm10, %v1240_v42, %v1050_v43  ;;  %1039 = vrot.lane.b32.xlu1 %v1020_v5, %s4615_s28  ;;  %759 = vrot.lane.b32.xlu0 %v738_v20, %s4609_s22  ;;  %v1257_v53 = vsel %vm7224_vm10, %v1241_v15, %v1051_v46  ;;  %v959_v21 = vshrl.u32 %v463_v9, 16  ;;  %v962_v26 = vshll.u32 %v463_v9, 16 }
  0xc4   : > { %v1313_v55 = vand.u32 %v5085_v36, %v1257_v53  ;;  %v1311_v48 = vand.u32 %v5085_v36, %v1254_v47  ;;  %v956_v18 = vrot.slane %v954_v13, 6  ;;  %v1023_v15 = vrot.slane %v5100_v29, 4 }
  0xc5   : > { %v5104_v7 = vpop.permute.xlu1 %560  ;;  %v559_v14 = vpop.permute.xlu0 %558  ;;  %v1022_v42 = vrot.slane %v4910_v51, 4  ;;  %v961_v47 = vrot.slane %v959_v21, 5  ;;  %v964_v53 = vrot.slane %v962_v26, 6  ;;  %v883_v13 = vrot.slane %v463_v9, 7 }
  0xc6   : > { %1335 = vmatprep.subr.bf16.mxu1 %v1313_v55  ;;  %v957_v61 = vor.u32 %v956_v18, %v953_v16  ;;  %v577_v1 = vsel %vm7223_vm6, %v4936_v0, %v559_v14 }
  0xc7   : > { %814 = vrot.lane.b32.xlu1 %v782_v30, %s4612_s25  ;;  %1041 = vrot.lane.b32.xlu0 %v1021_v60, %s4615_s28  ;;  %v578_v30 = vsel %vm7223_vm6, %v559_v14, %v5104_v7  ;;  %v1066_v29 = vsel %vm4956_vm7, %v4703_v8, %v577_v1  ;;  %v965_v3 = vor.u32 %v964_v53, %v961_v47 }
  0xc8   : > { %1336 = vmatpush1.bf16.msra.mxu1 %v1311_v48 }
  0xc9   : > { %v5119_v33 = vpop.permute.xlu1 %626  ;;  %v625_v37 = vpop.permute.xlu0 %624 }
  0xca   : > { %v643_v43 = vsel %vm7222_vm8, %v4902_v44, %v625_v37  ;;  %v644_v46 = vsel %vm7222_vm8, %v625_v37, %v5119_v33  ;;  %v1067_v44 = vsel %vm4956_vm7, %v4746_v41, %v578_v30  ;;  %vm7234_vm8 = vcmask 760832  }
  0xcb   : > { %836 = vrot.lane.b32.xlu1 %v793_v39, %s4612_s25  ;;  %834 = vrot.lane.b32.xlu0 %v792_v56, %s4612_s25  ;;  %vm7235_vm6 = vmmov %vm7234_vm8  ;;  %v1085_v39 = vsel %vm412_vm0, %v1066_v29, %v643_v43  ;;  %v1089_v58 = vsel %vm412_vm0, %v1067_v44, %v644_v46 }
  0xcc   : > { %4455 = vmatmul.mubr.msk.bf16.vlgmr.msra.gmra.mrb[0].mxu1 %vm1304_vm11, %v5117_v4 }
  0xcd   : > { %v5129_v5 = vpop.permute.xlu1 %692  ;;  %v691_v20 = vpop.permute.xlu0 %690  ;;  %1408 = vmatprep.mubr.bf16.mxu1 %v4617_v35 }
  0xce   : > { %v709_v0 = vsel %vm706_vm9, %v4960_v24, %v691_v20  ;;  %v710_v60 = vsel %vm706_vm9, %v691_v20, %v5129_v5  ;;  %v4546_v24 = vunpack.i.h.bf16 %v5029_v12  ;;  %v1024_v20 = vrot.slane %v463_v9, 4 }
  0xcf   : > { %904 = vrot.lane.b32.xlu1 %v882_v11, %s4613_s26  ;;  %902 = vrot.lane.b32.xlu0 %v881_v34, %s4613_s26  ;;  %v1124_v41 = vsel %vm4976_vm15, %v1085_v39, %v709_v0 }
  0xd0   : > { %v841_v16 = vsel %vm838_vm1, %v4541_v38, %v4546_v24 }
  0xd1   : > { %v5134_v31 = vpop.permute.xlu1 %747  ;;  %v746_v45 = vpop.permute.xlu0 %745 }
  0xd2   : > { %v764_v55 = vsel %vm7234_vm8, %v4912_v52, %v746_v45  ;;  %v765_v48 = vsel %vm7235_vm6, %v746_v45, %v5134_v31  ;;  %v1125_v52 = vsel %vm4976_vm15, %v1089_v58, %v710_v60  ;;  %vm7236_vm6 = vcmask 1039360  }
  0xd3   : > { %986 = vrot.lane.b32.xlu1 %v957_v61, %s4614_s27  ;;  %984 = vrot.lane.b32.xlu0 %v949_v63, %s4614_s27  ;;  %v1148_v37 = vsel %vm1133_vm2, %v1125_v52, %v765_v48  ;;  %v1144_v34 = vsel %vm1133_vm2, %v1124_v41, %v764_v55  ;;  %v1287_v61 = vld [vmem:[%s7213_s3] sm:$0xff]  ;;  %vm7237_vm8 = vmmov %vm7236_vm6 }
  0xd4   : > { %v1183_v18 = vsel %vm4991_vm3, %v1144_v34, %v841_v16 }
  0xd5   : > { %v823_v14 = vpop.permute.xlu1 %822  ;;  %v5162_v56 = vpop.permute.xlu0 %4548 }
  0xd6   : > { %v4550_v8 = vunpack.i.l.bf16 %v5162_v56  ;;  %v851_v30 = vsel %vm838_vm1, %v5014_v6, %v823_v14 }
  0xd7   : > { %1045 = vrot.lane.b32.xlu1 %v1023_v15, %s4615_s28  ;;  %1043 = vrot.lane.b32.xlu0 %v1022_v42, %s4615_s28 }
  0xd8   : > { %v842_v12 = vsel %vm838_vm1, %v4546_v24, %v4550_v8 }
  0xd9   : > { %v891_v10 = vpop.permute.xlu1 %890  ;;  %v5179_v59 = vpop.permute.xlu0 %824  ;;  %v1184_v11 = vsel %vm4991_vm3, %v1148_v37, %v842_v12 }
  0xda   : > { %1376 = vmatprep.subr.bf16.mxu1 %v1184_v11  ;;  %v911_v38 = vsel %vm908_vm4, %v5031_v25, %v891_v10  ;;  %v852_v43 = vsel %vm838_vm1, %v823_v14, %v5179_v59 }
  0xdb   : > { %988 = vrot.lane.b32.xlu1 %v965_v3, %s4614_s27  ;;  %906 = vrot.lane.b32.xlu0 %v883_v13, %s4613_s26  ;;  %v1203_v25 = vsel %vm1192_vm12, %v851_v30, %v911_v38 }
  0xdc   : > { %1377 = vmatpush1.bf16.msra.mxu1 %v1183_v18 }
  0xdd   : > { %v973_v63 = vpop.permute.xlu1 %972  ;;  %v5193_v21 = vpop.permute.xlu0 %892 }
  0xde   : > { %v993_v45 = vsel %vm990_vm5, %v5054_v57, %v973_v63  ;;  %v912_v1 = vsel %vm908_vm4, %v891_v10, %v5193_v21  ;;  %v4551_v10 = vunpack.i.h.bf16 %v5162_v56 }
  0xdf   : > { %1047 = vrot.lane.b32.xlu0 %v1024_v20, %s4615_s28  ;;  %1291 = vperm.xlu1 %4562, %v1287_v61   ;;  %v1242_v57 = vsel %vm5066_vm14, %v1203_v25, %v993_v45  ;;  %v1207_v46 = vsel %vm1192_vm12, %v852_v43, %v912_v1 }
  0xe0   : > { %v843_v1 = vsel %vm838_vm1, %v4550_v8, %v4551_v10 }
  0xe1   : > { %v1032_v26 = vpop.permute.xlu1 %1031  ;;  %v5201_v9 = vpop.permute.xlu0 %974 }
  0xe2   : > { %v1052_v15 = vsel %vm7225_vm13, %v5082_v32, %v1032_v26  ;;  %v994_v42 = vsel %vm990_vm5, %v973_v63, %v5201_v9 }
  0xe3   : > { %1296 = vperm.xlu0 %4563, %v1288_v19   ;;  %v1260_v6 = vsel %vm7224_vm10, %v1242_v57, %v1052_v15  ;;  %v1243_v32 = vsel %vm5066_vm14, %v1207_v46, %v994_v42 }
  0xe4   : > { %v1315_v44 = vand.u32 %v5085_v36, %v1260_v6 }
  0xe5   : > { %v563_v47 = vpop.permute.xlu1 %562  ;;  %v1034_v53 = vpop.permute.xlu0 %1033 }
  0xe6   : > { %v1053_v0 = vsel %vm7225_vm13, %v1032_v26, %v1034_v53  ;;  %v579_v39 = vsel %vm7236_vm6, %v5104_v7, %v563_v47  ;;  %vm7240_vm6 = vcmask 760832  }
  0xe7   : > { %v1263_v60 = vsel %vm7224_vm10, %v1243_v32, %v1053_v0  ;;  %vm7238_vm10 = vcmask 1031168   ;;  %v1068_v7 = vsel %vm4956_vm7, %v4772_v62, %v579_v39 }
  0xe8   : > { %v1317_v29 = vand.u32 %v5085_v36, %v1263_v60  ;;  %vm7239_vm13 = vmmov %vm7238_vm10 }
  0xe9   : > { %v629_v55 = vpop.permute.xlu1 %628  ;;  %v5226_v48 = vpop.permute.xlu0 %564 }
  0xea   : > { %1378 = vmatprep.subr.bf16.mxu1 %v1317_v29  ;;  %v580_v58 = vsel %vm7237_vm8, %v563_v47, %v5226_v48  ;;  %v645_v3 = vsel %vm7238_vm10, %v5119_v33, %v629_v55  ;;  %vm7242_vm10 = vcmask 474112  }
  0xeb   : > { %1379 = vmatpush1.bf16.msra.mxu1 %v1315_v44  ;;  %v1069_v34 = vsel %vm4956_vm7, %v4805_v27, %v580_v58  ;;  %v1093_v11 = vsel %vm412_vm0, %v1068_v7, %v645_v3  ;;  %vm7243_vm8 = vmmov %vm7242_vm10 }
  0xed   : > { %v695_v14 = vpop.permute.xlu1 %694  ;;  %v5228_v24 = vpop.permute.xlu0 %630 }
  0xee   : > { %4456 = vmatmul.mubr.msk.bf16.vlgmr.msra.gmra.mrb[4].mxu1 %vm1304_vm11, %v5117_v4  ;;  %v646_v13 = vsel %vm7239_vm13, %v629_v55, %v5228_v24  ;;  %v711_v12 = vsel %vm706_vm9, %v5129_v5, %v695_v14  ;;  %vm7241_vm13 = vmmov %vm7240_vm6 }
  0xef   : > { %1451 = vmatprep.mubr.bf16.mxu1 %v4617_v35  ;;  %v1097_v5 = vsel %vm412_vm0, %v1069_v34, %v646_v13  ;;  %v1126_v20 = vsel %vm4976_vm15, %v1093_v11, %v711_v12 }
  0xf1   : > { %v750_v41 = vpop.permute.xlu1 %749  ;;  %v5237_v52 = vpop.permute.xlu0 %696 }
  0xf2   : > { %v712_v37 = vsel %vm706_vm9, %v695_v14, %v5237_v52  ;;  %v766_v33 = vsel %vm7240_vm6, %v5134_v31, %v750_v41  ;;  %vm7244_vm6 = vcmask 1043456  }
  0xf3   : > { %v1127_v62 = vsel %vm4976_vm15, %v1097_v5, %v712_v37  ;;  %v1152_v63 = vsel %vm1133_vm2, %v1126_v20, %v766_v33 }
  0xf4   : > { %v1185_v30 = vsel %vm4991_vm3, %v1152_v63, %v843_v1 }
  0xf5   : > { %v5258_v16 = vpop.permute.xlu1 %4553  ;;  %v752_v18 = vpop.permute.xlu0 %751 }
  0xf6   : > { %v4555_v27 = vunpack.i.l.bf16 %v5258_v16  ;;  %v767_v61 = vsel %vm7241_vm13, %v750_v41, %v752_v18  ;;  %vm7245_vm13 = vmmov %vm7244_vm6 }
  0xf7   : > { %v1156_v31 = vsel %vm1133_vm2, %v1127_v62, %v767_v61 }
  0xf8   : > { %v844_v19 = vsel %vm838_vm1, %v4551_v10, %v4555_v27 }
  0xf9   : > { %v5271_v38 = vpop.permute.xlu1 %828  ;;  %v827_v26 = vpop.permute.xlu0 %826  ;;  %v1186_v45 = vsel %vm4991_vm3, %v1156_v31, %v844_v19 }
  0xfa   : > { %1419 = vmatprep.subr.bf16.mxu1 %v1186_v45  ;;  %v853_v47 = vsel %vm838_vm1, %v5179_v59, %v827_v26  ;;  %v854_v6 = vsel %vm838_vm1, %v827_v26, %v5271_v38  ;;  %v4556_v26 = vunpack.i.h.bf16 %v5258_v16 }
  0xfb   : > { %1420 = vmatpush1.bf16.msra.mxu1 %v1185_v30 }
  0xfd   : > { %v5280_v15 = vpop.permute.xlu1 %896  ;;  %v895_v42 = vpop.permute.xlu0 %894 }
  0xfe   : > { %v913_v57 = vsel %vm908_vm4, %v5193_v21, %v895_v42  ;;  %v914_v46 = vsel %vm908_vm4, %v895_v42, %v5280_v15 }
  0xff   : > { %v1211_v32 = vsel %vm1192_vm12, %v853_v47, %v913_v57  ;;  %v1215_v0 = vsel %vm1192_vm12, %v854_v6, %v914_v46  ;;  %v845_v6 = vsel %vm838_vm1, %v4555_v27, %v4556_v26 }
 0x101   : > { %v5282_v25 = vpop.permute.xlu1 %978  ;;  %v977_v43 = vpop.permute.xlu0 %976 }
 0x102   : > { %v995_v56 = vsel %vm990_vm5, %v5201_v9, %v977_v43  ;;  %v996_v8 = vsel %vm990_vm5, %v977_v43, %v5282_v25 }
 0x103   : > { %v1244_v29 = vsel %vm5066_vm14, %v1211_v32, %v995_v56  ;;  %v1245_v9 = vsel %vm5066_vm14, %v1215_v0, %v996_v8 }
 0x105   : > { %v5298_v21 = vpop.permute.xlu1 %1037  ;;  %v1036_v60 = vpop.permute.xlu0 %1035 }
 0x106   : > { %v1054_v44 = vsel %vm7242_vm10, %v1034_v53, %v1036_v60  ;;  %v1055_v59 = vsel %vm7243_vm8, %v1036_v60, %v5298_v21  ;;  %vm7246_vm10 = vcmask 1039360  }
 0x107   : > { %v1266_v55 = vsel %vm7244_vm6, %v1244_v29, %v1054_v44  ;;  %v1269_v14 = vsel %vm7245_vm13, %v1245_v9, %v1055_v59  ;;  %vm7247_vm8 = vmmov %vm7246_vm10  ;;  %vm7248_vm6 = vcmask 1031168  }
 0x108   : > { %v1319_v39 = vand.u32 %v5085_v36, %v1266_v55  ;;  %v1321_v58 = vand.u32 %v5085_v36, %v1269_v14  ;;  %vm7249_vm13 = vmmov %vm7248_vm6 }
 0x109   : > { %v569_v41 = vpop.permute.xlu1 %568  ;;  %v567_v3 = vpop.permute.xlu0 %566 }
 0x10a   : > { %1421 = vmatprep.subr.bf16.mxu1 %v1321_v58  ;;  %v581_v11 = vsel %vm7246_vm10, %v5226_v48, %v567_v3  ;;  %v582_v62 = vsel %vm7247_vm8, %v567_v3, %v569_v41  ;;  %vm7250_vm10 = vcmask 760832  }
 0x10b   : > { %1422 = vmatpush1.bf16.msra.mxu1 %v1319_v39  ;;  %v1070_v63 = vsel %vm4956_vm7, %v4840_v50, %v581_v11  ;;  %v1071_v45 = vsel %vm4956_vm7, %v4855_v2, %v582_v62  ;;  %vm7251_vm8 = vmmov %vm7250_vm10 }
 0x10d   : > { %v635_v13 = vpop.permute.xlu1 %634  ;;  %v633_v12 = vpop.permute.xlu0 %632 }
 0x10e   : > { %4457 = vmatmul.mubr.msk.bf16.vlgmr.msra.gmra.mrb[8].mxu1 %vm1304_vm11, %v5117_v4  ;;  %v647_v61 = vsel %vm7248_vm6, %v5228_v24, %v633_v12  ;;  %vm7252_vm6 = vcmask 1039360  }
 0x10f   : > { %1494 = vmatprep.mubr.bf16.mxu1 %v4617_v35  ;;  %v648_v35 = vsel %vm7249_vm13, %v633_v12, %v635_v13  ;;  %v1101_v24 = vsel %vm412_vm0, %v1070_v63, %v647_v61  ;;  %vm7253_vm13 = vmmov %vm7252_vm6 }
 0x110   : > { %v1105_v42 = vsel %vm412_vm0, %v1071_v45, %v648_v35 }
 0x111   : > { %v701_v53 = vpop.permute.xlu1 %700  ;;  %v699_v37 = vpop.permute.xlu0 %698 }
 0x112   : > { %v713_v31 = vsel %vm706_vm9, %v5237_v52, %v699_v37  ;;  %v714_v19 = vsel %vm706_vm9, %v699_v37, %v701_v53 }
 0x113   : > { %v1128_v50 = vsel %vm4976_vm15, %v1101_v24, %v713_v31 }
 0x115   : > { %v5314_v7 = vpop.permute.xlu1 %572  ;;  %v571_v34 = vpop.permute.xlu0 %570 }
 0x116   : > { %v583_v44 = vsel %vm7252_vm6, %v569_v41, %v571_v34  ;;  %v584_v59 = vsel %vm7253_vm13, %v571_v34, %v5314_v7  ;;  %vm7256_vm6 = vcmask 760832   ;;  %vm7257_vm13 = vcmask 474112  }
 0x117   : > { %v1072_v27 = vsel %vm4956_vm7, %v4881_v28, %v583_v44  ;;  %v1073_v39 = vsel %vm4956_vm7, %v4910_v51, %v584_v59 }
 0x119   : > { %v756_v33 = vpop.permute.xlu1 %755  ;;  %v754_v10 = vpop.permute.xlu0 %753 }
 0x11a   : > { %v768_v48 = vsel %vm7250_vm10, %v752_v18, %v754_v10  ;;  %v769_v1 = vsel %vm7251_vm8, %v754_v10, %v756_v33  ;;  %v1129_v18 = vsel %vm4976_vm15, %v1105_v42, %v714_v19  ;;  %vm7254_vm10 = vcmask 1031168  }
 0x11b   : > { %v1160_v57 = vsel %vm1133_vm2, %v1128_v50, %v768_v48  ;;  %v1164_v2 = vsel %vm1133_vm2, %v1129_v18, %v769_v1  ;;  %vm7255_vm8 = vmmov %vm7254_vm10 }
 0x11c   : > { %v1187_v32 = vsel %vm4991_vm3, %v1160_v57, %v845_v6 }
 0x11d   : > { %v5318_v5 = vpop.permute.xlu1 %638  ;;  %v637_v20 = vpop.permute.xlu0 %636 }
 0x11e   : > { %v649_v55 = vsel %vm7254_vm10, %v635_v13, %v637_v20  ;;  %v650_v58 = vsel %vm7255_vm8, %v637_v20, %v5318_v5  ;;  %vm7258_vm10 = vmmov %vm7256_vm6  ;;  %vm7259_vm8 = vcmask 1043456  }
 0x11f   : > { %v1109_v41 = vsel %vm412_vm0, %v1072_v27, %v649_v55  ;;  %v1113_v61 = vsel %vm412_vm0, %v1073_v39, %v650_v58 }
 0x121   : > { %v831_v30 = vpop.permute.xlu1 %830  ;;  %v4559_v52 = vpop.permute.xlu0 %4558 }
 0x122   : > { %v4560_v43 = vunpack.i.l.bf16 %v4559_v52  ;;  %v855_v3 = vsel %vm838_vm1, %v5271_v38, %v831_v30  ;;  %v4561_v20 = vunpack.i.h.bf16 %v4559_v52 }
 0x124   : > { %v846_v46 = vsel %vm838_vm1, %v4556_v26, %v4560_v43  ;;  %v847_v42 = vsel %vm838_vm1, %v4560_v43, %v4561_v20 }
 0x125   : > { %v899_v56 = vpop.permute.xlu1 %898  ;;  %v5345_v8 = vpop.permute.xlu0 %832  ;;  %v1188_v47 = vsel %vm4991_vm3, %v1164_v2, %v846_v46 }
 0x126   : > { %1462 = vmatprep.subr.bf16.mxu1 %v1188_v47  ;;  %v915_v13 = vsel %vm908_vm4, %v5280_v15, %v899_v56  ;;  %v856_v15 = vsel %vm838_vm1, %v831_v30, %v5345_v8  ;;  %v1074_v47 = vsel %vm4956_vm7, %v4908_v49, %v5314_v7  ;;  %vm4619_vm7 = vmmov 0  }
 0x127   : > { %1463 = vmatpush1.bf16.msra.mxu1 %v1187_v32  ;;  %v1117_v43 = vsel %vm412_vm0, %v1074_v47, %v5318_v5 }
 0x129   : > { %v703_v0 = vpop.permute.xlu1 %702  ;;  %v5354_v60 = vpop.permute.xlu0 %900 }
 0x12a   : > { %v715_v12 = vsel %vm706_vm9, %v701_v53, %v703_v0  ;;  %v916_v28 = vsel %vm908_vm4, %v899_v56, %v5354_v60 }
 0x12b   : > { %v1223_v35 = vsel %vm1192_vm12, %v856_v15, %v916_v28 }
 0x12d   : > { %v981_v29 = vpop.permute.xlu1 %980  ;;  %v705_v9 = vpop.permute.xlu0 %704 }
 0x12e   : > { %v997_v51 = vsel %vm990_vm5, %v5282_v25, %v981_v29  ;;  %v716_v10 = vsel %vm706_vm9, %v703_v0, %v705_v9  ;;  %v1219_v25 = vsel %vm1192_vm12, %v855_v3, %v915_v13  ;;  %v1132_v6 = vsel %vm4976_vm15, %v1117_v43, %v705_v9 }
 0x12f   : > { %v1246_v31 = vsel %vm5066_vm14, %v1219_v25, %v997_v51  ;;  %v5472_v25 = vld [vmem:[%s7211_s1] sm:$0xff] }
 0x131   : > { %v758_v16 = vpop.permute.xlu1 %757  ;;  %v5360_v14 = vpop.permute.xlu0 %982 }
 0x132   : > { %v770_v11 = vsel %vm7256_vm6, %v756_v33, %v758_v16  ;;  %v998_v38 = vsel %vm990_vm5, %v981_v29, %v5360_v14  ;;  %v1130_v33 = vsel %vm4976_vm15, %v1109_v41, %v715_v12  ;;  %vm7260_vm6 = vmmov %vm7257_vm13 }
 0x133   : > { %v1247_v63 = vsel %vm5066_vm14, %v1223_v35, %v998_v38  ;;  %v1168_v26 = vsel %vm1133_vm2, %v1130_v33, %v770_v11  ;;  %vm7262_vm0 = vmmov %vm7260_vm6 }
 0x134   : > { %v1189_v18 = vsel %vm4991_vm3, %v1168_v26, %v847_v42 }
 0x135   : > { %v1040_v37 = vpop.permute.xlu1 %1039  ;;  %v760_v34 = vpop.permute.xlu0 %759 }
 0x136   : > { %v1056_v53 = vsel %vm7257_vm13, %v5298_v21, %v1040_v37  ;;  %v771_v62 = vsel %vm7258_vm10, %v758_v16, %v760_v34  ;;  %v1131_v21 = vsel %vm4976_vm15, %v1113_v61, %v716_v10  ;;  %vm7261_vm13 = vmmov %vm7259_vm8  ;;  %v1176_v32 = vsel %vm1133_vm2, %v1132_v6, %v760_v34 }
 0x137   : > { %v1272_v45 = vsel %vm7259_vm8, %v1246_v31, %v1056_v53  ;;  %v1172_v30 = vsel %vm1133_vm2, %v1131_v21, %v771_v62  ;;  %vm7263_vm15 = vmmov %vm7262_vm0  ;;  %v1615_v53 = vlaneseq }
 0x138   : > { %v1323_v46 = vand.u32 %v5085_v36, %v1272_v45  ;;  %vm7264_vm2 = vmmov %vm7259_vm8 }
 0x139   : > { %v815_v19 = vpop.permute.xlu1 %814  ;;  %v1042_v48 = vpop.permute.xlu0 %1041  ;;  %vm7266_vm10 = vmmov %vm7262_vm0  ;;  %v5462_v62 = vshrl.u32 %v1615_v53, 7 }
 0x13a   : > { %v1057_v24 = vsel %vm7260_vm6, %v1040_v37, %v1042_v48  ;;  %v848_v1 = vsel %vm838_vm1, %v4561_v20, %v815_v19  ;;  %v1191_v49 = vsel %vm4991_vm3, %v1176_v32, %v815_v19  ;;  %vm7267_vm8 = vmmov %vm7264_vm2  ;;  %v5495_v32 = vld [vmem:[#allocation3 + $0x58] sm:$0xff]  ;;  %vm1769_vm6 = vcmask 941056  }
 0x13b   : > { %v1190_v52 = vsel %vm4991_vm3, %v1172_v30, %v848_v1  ;;  %v1275_v50 = vsel %vm7261_vm13, %v1247_v63, %v1057_v24  ;;  %vm7265_vm3 = vmmov %vm7264_vm2  ;;  %v5465_v61 = vsub.s32 0, %v5462_v62  ;;  %v5475_v35 = vsub.s32 1, %v5462_v62 }
 0x13c   : > { %1505 = vmatprep.subr.bf16.mxu0 %v1190_v52  ;;  %v1325_v57 = vand.u32 %v5085_v36, %v1275_v50  ;;  %v5490_v47 = vsub.s32 2, %v5462_v62  ;;  %v5493_v43 = vsub.s32 3, %v5462_v62  ;;  %vm2193_vm13 = vcmask 130048  }
 0x13d   : > { %v837_v2 = vpop.permute.xlu1 %836  ;;  %v835_v56 = vpop.permute.xlu0 %834  ;;  %1506 = vmatpush1.bf16.msra.mxu0 %v1189_v18  ;;  %v1618_v63 = vrot.slane %v5472_v25, %v5465_v61  ;;  %v1622_v21 = vrot.slane %v5472_v25, %v5475_v35 }
 0x13e   : > { %1464 = vmatprep.subr.bf16.mxu1 %v1325_v57  ;;  %v857_v54 = vsel %vm838_vm1, %v5345_v8, %v835_v56  ;;  %v858_v59 = vsel %vm838_vm1, %v835_v56, %v837_v2 }
 0x13f   : > { %1465 = vmatpush1.bf16.msra.mxu1 %v1323_v46 }
 0x140   : > { %4488 = vmatprep.subr.bf16.mxu1 %v4616_v23 }
 0x141   : > { %v905_v0 = vpop.permute.xlu1 %904  ;;  %v903_v29 = vpop.permute.xlu0 %902 }
 0x142   : > { %4458 = vmatmul.mubr.msk.bf16.vlgmr.msra.gmra.mrb[12].mxu1 %vm1304_vm11, %v5117_v4  ;;  %v917_v7 = vsel %vm908_vm4, %v5354_v60, %v903_v29  ;;  %v918_v5 = vsel %vm908_vm4, %v903_v29, %v905_v0  ;;  %v1626_v29 = vrot.slane %v5472_v25, %v5490_v47 }
 0x143   : > { %4489 = vmatpush3.bf16.msra.mxu1 %v1191_v49  ;;  %4492 = vmatprep.mubr.msk.bf16.mxu1 %vm4619_vm7, %v4616_v23  ;;  %v1227_v55 = vsel %vm1192_vm12, %v857_v54, %v917_v7  ;;  %vm7268_vm7 = vcmask 1039360  }
 0x144   : > { %4490 = vmatprep.subr.bf16.mxu1 %v4616_v23  ;;  %v1231_v23 = vsel %vm1192_vm12, %v858_v59, %v918_v5 }
 0x145   : > { %v987_v22 = vpop.permute.xlu1 %986  ;;  %v985_v40 = vpop.permute.xlu0 %984 }
 0x146   : > { %v999_v9 = vsel %vm990_vm5, %v5360_v14, %v985_v40  ;;  %v1000_v44 = vsel %vm990_vm5, %v985_v40, %v987_v22  ;;  %v1630_v40 = vrot.slane %v5472_v25, %v5493_v43 }
 0x147   : > { %v1248_v60 = vsel %vm5066_vm14, %v1227_v55, %v999_v9  ;;  %v1249_v39 = vsel %vm5066_vm14, %v1231_v23, %v1000_v44 }
 0x149   : > { %v1046_v16 = vpop.permute.xlu1 %1045  ;;  %v1044_v27 = vpop.permute.xlu0 %1043 }
 0x14a   : > { %v1058_v14 = vsel %vm7262_vm0, %v1042_v48, %v1044_v27  ;;  %v1059_v58 = vsel %vm7263_vm15, %v1044_v27, %v1046_v16  ;;  %vm7269_vm0 = vmmov %vm7268_vm7  ;;  %vm7270_vm15 = vcmask 1031168  }
 0x14b   : > { %v1281_v8 = vsel %vm7264_vm2, %v1249_v39, %v1059_v58  ;;  %v1278_v41 = vsel %vm7265_vm3, %v1248_v60, %v1058_v14  ;;  %vm7271_vm2 = vmmov %vm7270_vm15  ;;  %vm7272_vm3 = vcmask 760832  }
 0x14c   : > { %v1329_v3 = vand.u32 %v5085_v36, %v1281_v8  ;;  %v1327_v13 = vand.u32 %v5085_v36, %v1278_v41  ;;  %v5517_v8 = vsub.s32 4, %v5462_v62  ;;  %v5520_v41 = vsub.s32 5, %v5462_v62 }
 0x14d   : > { %v989_v12 = vpop.permute.xlu1 %988  ;;  %v907_v28 = vpop.permute.xlu0 %906 }
 0x14e   : > { %v919_v37 = vsel %vm908_vm4, %v905_v0, %v907_v28  ;;  %1507 = vmatprep.subr.bf16.mxu0 %v1329_v3  ;;  %v1001_v34 = vsel %vm990_vm5, %v987_v22, %v989_v12  ;;  %v1634_v12 = vrot.slane %v5472_v25, %v5517_v8 }
 0x14f   : > { %v1235_v51 = vsel %vm1192_vm12, %v837_v2, %v919_v37  ;;  %1508 = vmatpush1.bf16.msra.mxu0 %v1327_v13  ;;  %vm1758_vm12 = vcmask 1047832  }
 0x150   : > { %v1250_v11 = vsel %vm5066_vm14, %v1235_v51, %v1001_v34  ;;  %vm418_vm14 = vcmask 285696   ;;  %v1638_v34 = vrot.slane %v5472_v25, %v5520_v41 }
 0x151   : > { %v1048_v10 = vpop.permute.xlu0 %1047  ;;  %419 = vst.msk [vmem:[#allocation3] sm:$0xff] %vm418_vm14, %v5495_v32  ;;  %423 = vst.msk [vmem:[#allocation4] sm:$0xff] %vm418_vm14, %v5495_v32 }
 0x152   : > { %v1060_v38 = vsel %vm7266_vm10, %v1046_v16, %v1048_v10  ;;  %4459 = vmatmul.mubr.msk.bf16.vlgmr.msra.gmra.mrb[0].mxu0 %vm1304_vm11, %v5117_v4  ;;  %vm7273_vm10 = vmmov %vm7272_vm3 }
 0x153   : > { %v1284_v20 = vsel %vm7267_vm8, %v1250_v11, %v1060_v38  ;;  %vm7274_vm8 = vcmask 474112  }
 0x154   : > { %v1331_v15 = vand.u32 %v5085_v36, %v1284_v20 }
 0x156   : > { %4491 = vmatpush3.bf16.msra.mxu1 %v1331_v15 }
 0x159   : > { %4493 = vmatmul.mubr.msk.bf16.vlgmr.msra.gmra.mrb[16].mxu1 %vm1304_vm11, %v5117_v4  ;;  %vm420_vm11 = vcmask 1048472  }
 0x15a   : > { %421 = vst.msk [vmem:[#allocation3 + $0x50] sm:$0xff] %vm420_vm11, %v5495_v32  ;;  %424 = vst.msk [vmem:[#allocation4 + $0x50] sm:$0xff] %vm420_vm11, %v5495_v32 }
 0x15b   : > { %vm7275_vm11 = vmmov %vm7274_vm8 }
 0x15e   : > { %v5467_v17 = vpop.permute.xlu1 %1291 }
 0x162   : > { %v5477_v33 = vpop.permute.xlu0 %1296 }
 0x19f   : > { %v1367_v36 = vpop.f32.mrb[0].mxu1 }
 0x1a0   : > { %v1369_v4 = vpop.f32.mrb[1].mxu1  ;;  %v1368_v31 = vadd.f32 %v1367_v36, %v5467_v17 }
 0x1a1   : > { %v1371_v19 = vpop.f32.mrb[2].mxu1  ;;  %v1370_v48 = vadd.f32 %v1369_v4, %v5467_v17 }
 0x1a2   : > { %v1372_v26 = vadd.f32 %v1371_v19, %v5477_v33  ;;  %v1589_v45 = vmax.f32 %v1368_v31, 0.0  ;;  %v1373_v24 = vpop.f32.mrb[3].mxu1 }
 0x1a3   : > { %v1374_v1 = vadd.f32 %v1373_v24, %v5477_v33  ;;  %v1590_v30 = vmax.f32 %v1370_v48, 0.0  ;;  %v5541_v24 = vsub.s32 7, %v5462_v62 }
 0x1a4   : > { %v1600_v52 = vmax.f32 %v1372_v26, 0.0  ;;  %v1670_v42 = vmul.f32 %v1618_v63, %v1589_v45  ;;  %v5538_v26 = vsub.s32 6, %v5462_v62 }
 0x1a5   : > { %v1601_v50 = vmax.f32 %v1374_v1, 0.0  ;;  %v1671_v18 = vmul.f32 %v1622_v21, %v1590_v30 }
 0x1a6   : > { %v1681_v57 = vmul.f32 %v1618_v63, %v1600_v52 }
 0x1a7   : > { %v1682_v46 = vmul.f32 %v1622_v21, %v1601_v50 }
 0x1a8   : > { %v1692_v2 = vpack.c.bf16 %v1681_v57, %v1670_v42 }
 0x1a9   : > { %v1693_v56 = vpack.c.bf16 %v1682_v46, %v1671_v18  ;;  %v1642_v18 = vrot.slane %v5472_v25, %v5538_v26 }
 0x1aa   : > { %1714 = vrot.lane.b32.xlu1 %v1692_v2, %s4620_s29 }
 0x1ae   : > { %1716 = vrot.lane.b32.xlu1 %v1693_v56, %s4620_s29  ;;  %v1646_v56 = vrot.slane %v5472_v25, %v5541_v24 }
 0x1c1   : > { %v1410_v6 = vpop.f32.mrb[4].mxu1 }
 0x1c2   : > { %v1411_v0 = vadd.f32 %v1410_v6, %v5467_v17  ;;  %v1412_v49 = vpop.f32.mrb[5].mxu1 }
 0x1c3   : > { %v1413_v22 = vadd.f32 %v1412_v49, %v5467_v17  ;;  %v1414_v7 = vpop.f32.mrb[6].mxu1 }
 0x1c4   : > { %v1591_v5 = vmax.f32 %v1411_v0, 0.0  ;;  %v1415_v9 = vadd.f32 %v1414_v7, %v5477_v33  ;;  %v1416_v44 = vpop.f32.mrb[7].mxu1 }
 0x1c5   : > { %v1592_v54 = vmax.f32 %v1413_v22, 0.0  ;;  %v1417_v59 = vadd.f32 %v1416_v44, %v5477_v33 }
 0x1c6   : > { %v5509_v55 = vmul.f32 %v1626_v29, %v1591_v5  ;;  %v1602_v23 = vmax.f32 %v1415_v9, 0.0 }
 0x1c7   : > { %v1673_v16 = vmul.f32 %v1630_v40, %v1592_v54  ;;  %v1603_v27 = vmax.f32 %v1417_v59, 0.0 }
 0x1c8   : > { %v5511_v60 = vmul.f32 %v1626_v29, %v1602_v23  ;;  %v1612_v23 = vld [vmem:[%s7211_s1 + $0x8] sm:$0x7] }
 0x1c9   : > { %v1684_v39 = vmul.f32 %v1630_v40, %v1603_v27 }
 0x1ca   : > { %v1694_v14 = vpack.c.bf16 %v5511_v60, %v5509_v55 }
 0x1cb   : > { %v1695_v58 = vpack.c.bf16 %v1684_v39, %v1673_v16 }
 0x1cd   : > { %1720 = vrot.lane.b32.xlu1 %v1695_v58, %s4620_s29 }
 0x1e1   : > { %v1453_v3 = vpop.f32.mrb[8].mxu1 }
 0x1e2   : > { %v1454_v13 = vadd.f32 %v1453_v3, %v5467_v17  ;;  %v1455_v28 = vpop.f32.mrb[9].mxu1 }
 0x1e3   : > { %v1456_v37 = vadd.f32 %v1455_v28, %v5467_v17  ;;  %v1457_v51 = vpop.f32.mrb[10].mxu1 }
 0x1e4   : > { %v1593_v10 = vmax.f32 %v1454_v13, 0.0  ;;  %v1458_v11 = vadd.f32 %v1457_v51, %v5477_v33  ;;  %v1459_v38 = vpop.f32.mrb[11].mxu1  ;;  %v1650_v13 = vrot.slane %v1612_v23, %v5465_v61 }
 0x1e5   : > { %v1594_v20 = vmax.f32 %v1456_v37, 0.0  ;;  %v1460_v15 = vadd.f32 %v1459_v38, %v5477_v33 }
 0x1e6   : > { %v5530_v53 = vmul.f32 %v1634_v12, %v1593_v10  ;;  %v1604_v36 = vmax.f32 %v1458_v11, 0.0 }
 0x1e7   : > { %v1675_v4 = vmul.f32 %v1638_v34, %v1594_v20  ;;  %v1605_v31 = vmax.f32 %v1460_v15, 0.0 }
 0x1e8   : > { %v5532_v63 = vmul.f32 %v1634_v12, %v1604_v36 }
 0x1e9   : > { %v1686_v19 = vmul.f32 %v1638_v34, %v1605_v31  ;;  %v1654_v34 = vrot.slane %v1612_v23, %v5475_v35 }
 0x1ea   : > { %v1696_v48 = vpack.c.bf16 %v5532_v63, %v5530_v53 }
 0x1eb   : > { %v1697_v21 = vpack.c.bf16 %v1686_v19, %v1675_v4 }
 0x1ed   : > { %1724 = vrot.lane.b32.xlu1 %v1697_v21, %s4620_s29 }
 0x215   : > { %v1496_v45 = vpop.f32.mrb[12].mxu1 }
 0x216   : > { %v1497_v1 = vadd.f32 %v1496_v45, %v5467_v17  ;;  %v1498_v30 = vpop.f32.mrb[13].mxu1 }
 0x217   : > { %v1499_v52 = vadd.f32 %v1498_v30, %v5467_v17  ;;  %v1500_v42 = vpop.f32.mrb[14].mxu1 }
 0x218   : > { %v1595_v50 = vmax.f32 %v1497_v1, 0.0  ;;  %v1501_v57 = vadd.f32 %v1500_v42, %v5477_v33  ;;  %v1502_v46 = vpop.f32.mrb[15].mxu1 }
 0x219   : > { %v1596_v2 = vmax.f32 %v1499_v52, 0.0  ;;  %v1503_v62 = vadd.f32 %v1502_v46, %v5477_v33  ;;  %v1658_v52 = vrot.slane %v1612_v23, %v5490_v47 }
 0x21a   : > { %v1606_v6 = vmax.f32 %v1501_v57, 0.0  ;;  %v1676_v29 = vmul.f32 %v1642_v18, %v1595_v50 }
 0x21b   : > { %v1607_v0 = vmax.f32 %v1503_v62, 0.0  ;;  %v1677_v40 = vmul.f32 %v1646_v56, %v1596_v2 }
 0x21c   : > { %v1687_v49 = vmul.f32 %v1642_v18, %v1606_v6  ;;  %v1715_v22 = vpop.permute.xlu1 %1714  ;;  %v5624_v6 = vld [vmem:[%s7214_s4 + $0x4] ss:$8 sps:$4 sm:$0xff]  }
 0x21d   : > { %v1688_v7 = vmul.f32 %v1646_v56, %v1607_v0  ;;  %1759 = vst.msk [vmem:[#allocation3] sm:$0xff] %vm1758_vm12, %v1715_v22  ;;  %4463 = vmatprep.mubr.msk.bf16.mxu0 %vm2193_vm13, %v5624_v6  ;;  %4464 = vmatprep.mubr.msk.bf16.mxu1 %vm2193_vm13, %v5624_v6 }
 0x21e   : > { %v1698_v5 = vpack.c.bf16 %v1687_v49, %v1676_v29 }
 0x21f   : > { %v1699_v9 = vpack.c.bf16 %v1688_v7, %v1677_v40 }
 0x220   : > { %v5552_v44 = vpop.permute.xlu1 %1716 }
 0x221   : > { %1728 = vrot.lane.b32.xlu1 %v1699_v9, %s4620_s29  ;;  %v1737_v25 = vsel %vm418_vm14, %v1715_v22, %v5552_v44 }
 0x222   : > { %2197 = vmatprep.subr.bf16.mxu0 %v1737_v25 }
 0x224   : > { %v1771_v54 = vld [vmem:[#allocation3] sm:$0xff] }
 0x225   : > { %v1539_v59 = vpop.f32.mrb[0].mxu0  ;;  %2198 = vmatpush1.bf16.msra.mxu0 %v1771_v54 }
 0x226   : > { %v1540_v16 = vadd.f32 %v1539_v59, %v5467_v17  ;;  %v1541_v27 = vpop.f32.mrb[1].mxu0 }
 0x227   : > { %v1542_v39 = vadd.f32 %v1541_v27, %v5467_v17  ;;  %v1543_v58 = vpop.f32.mrb[2].mxu0 }
 0x228   : > { %v1597_v3 = vmax.f32 %v1540_v16, 0.0  ;;  %v1544_v12 = vadd.f32 %v1543_v58, %v5477_v33  ;;  %v1545_v28 = vpop.f32.mrb[3].mxu0 }
 0x229   : > { %v1598_v37 = vmax.f32 %v1542_v39, 0.0  ;;  %v1546_v51 = vadd.f32 %v1545_v28, %v5477_v33 }
 0x22a   : > { %v1608_v10 = vmax.f32 %v1544_v12, 0.0  ;;  %v1678_v38 = vmul.f32 %v1650_v13, %v1597_v3 }
 0x22b   : > { %v1609_v11 = vmax.f32 %v1546_v51, 0.0  ;;  %v1679_v36 = vmul.f32 %v1654_v34, %v1598_v37 }
 0x22c   : > { %v1689_v20 = vmul.f32 %v1650_v13, %v1608_v10  ;;  %v1582_v15 = vpop.f32.mrb[16].mxu1 }
 0x22d   : > { %v1690_v4 = vmul.f32 %v1654_v34, %v1609_v11  ;;  %v1583_v31 = vadd.f32 %v1582_v15, %v5467_v17  ;;  %v4494_v19 = vpop.f32.mrb[17].mxu1 }
 0x22e   : > { %v1700_v21 = vpack.c.bf16 %v1689_v20, %v1678_v38  ;;  %v1585_v45 = vpop.f32.mrb[18].mxu1 }
 0x22f   : > { %v1701_v1 = vpack.c.bf16 %v1690_v4, %v1679_v36  ;;  %v1599_v30 = vmax.f32 %v1583_v31, 0.0  ;;  %v1586_v42 = vadd.f32 %v1585_v45, %v5477_v33  ;;  %v4495_v50 = vpop.f32.mrb[19].mxu1 }
 0x230   : > { %1730 = vrot.lane.b32.xlu0 %v1700_v21, %s4620_s29 }
 0x231   : > { %v1610_v18 = vmax.f32 %v1586_v42, 0.0  ;;  %v1680_v57 = vmul.f32 %v1658_v52, %v1599_v30 }
 0x233   : > { %v1691_v46 = vmul.f32 %v1658_v52, %v1610_v18 }
 0x234   : > { %1732 = vrot.lane.b32.xlu0 %v1701_v1, %s4620_s29 }
 0x235   : > { %v1702_v2 = vpack.c.bf16 %v1691_v46, %v1680_v57 }
 0x237   : > { %1734 = vrot.lane.b32.xlu1 %v1702_v2, %s4620_s29 }
 0x238   : > { %1718 = vrot.lane.b32.xlu0 %v1694_v14, %s4620_s29 }
 0x23b   : > { %1805 = vrot.lane.b32.xlu1 %v1771_v54, %s4610_s23 }
 0x23c   : > { %1722 = vrot.lane.b32.xlu0 %v1696_v48, %s4620_s29 }
 0x23f   : > { %1891 = vrot.lane.b32.xlu1 %v1771_v54, %s4611_s24  ;;  %v1721_v17 = vpop.permute.xlu1 %1720 }
 0x240   : > { %1726 = vrot.lane.b32.xlu0 %v1698_v5, %s4620_s29 }
 0x243   : > { %1977 = vrot.lane.b32.xlu1 %v1771_v54, %s4612_s25 }
 0x244   : > { %1848 = vrot.lane.b32.xlu0 %v1771_v54, %s4608_s21 }
 0x247   : > { %2078 = vrot.lane.b32.xlu1 %v1771_v54, %s4614_s27 }
 0x248   : > { %1934 = vrot.lane.b32.xlu0 %v1771_v54, %s4609_s22 }
 0x24b   : > { %1807 = vrot.lane.b32.xlu1 %v1737_v25, %s4610_s23 }
 0x24c   : > { %2032 = vrot.lane.b32.xlu0 %v1771_v54, %s4613_s26 }
 0x24f   : > { %1893 = vrot.lane.b32.xlu1 %v1737_v25, %s4611_s24 }
 0x250   : > { %2124 = vrot.lane.b32.xlu0 %v1771_v54, %s4615_s28 }
 0x253   : > { %1979 = vrot.lane.b32.xlu1 %v1737_v25, %s4612_s25 }
 0x254   : > { %1850 = vrot.lane.b32.xlu0 %v1737_v25, %s4608_s21 }
 0x257   : > { %2080 = vrot.lane.b32.xlu1 %v1737_v25, %s4614_s27 }
 0x258   : > { %1936 = vrot.lane.b32.xlu0 %v1737_v25, %s4609_s22 }
 0x25c   : > { %2034 = vrot.lane.b32.xlu0 %v1737_v25, %s4613_s26 }
 0x25f   : > { %v1725_v33 = vpop.permute.xlu1 %1724 }
 0x260   : > { %2126 = vrot.lane.b32.xlu0 %v1737_v25, %s4615_s28 }
 0x293   : > { %v5601_v60 = vpop.permute.xlu1 %1728 }
 0x2a2   : > { %v5599_v55 = vpop.permute.xlu0 %1730 }
 0x2a3   : > { %v5702_v54 = vsel %vm418_vm14, %v5601_v60, %v5599_v55 }
 0x2a6   : > { %v5603_v14 = vpop.permute.xlu0 %1732 }
 0x2a7   : > { %v5747_v34 = vsel %vm418_vm14, %v5599_v55, %v5603_v14 }
 0x2a9   : > { %v1735_v53 = vpop.permute.xlu1 %1734 }
 0x2aa   : > { %v1746_v63 = vsel %vm418_vm14, %v5603_v14, %v1735_v53  ;;  %v1719_v48 = vpop.permute.xlu0 %1718 }
 0x2ab   : > { %1770 = vst.msk [vmem:[#allocation3 + $0x50] sm:$0xff] %vm1769_vm6, %v1746_v63  ;;  %v1738_v56 = vsel %vm418_vm14, %v5552_v44, %v1719_v48  ;;  %v1739_v62 = vsel %vm418_vm14, %v1719_v48, %v1721_v17 }
 0x2ac   : > { %2240 = vmatprep.subr.bf16.mxu1 %v1739_v62  ;;  %1852 = vrot.lane.b32.xlu1 %v1738_v56, %s4608_s21 }
 0x2ad   : > { %1809 = vrot.lane.b32.xlu0 %v1738_v56, %s4610_s23  ;;  %2241 = vmatpush1.bf16.msra.mxu1 %v1738_v56  ;;  %v1806_v7 = vpop.permute.xlu1 %1805 }
 0x2ae   : > { %v1723_v0 = vpop.permute.xlu0 %1722 }
 0x2af   : > { %v5637_v29 = vsel %vm418_vm14, %v1721_v17, %v1723_v0  ;;  %v5656_v22 = vsel %vm418_vm14, %v1723_v0, %v1725_v33 }
 0x2b0   : > { %1938 = vrot.lane.b32.xlu1 %v1738_v56, %s4609_s22 }
 0x2b1   : > { %1895 = vrot.lane.b32.xlu0 %v1738_v56, %s4611_s24  ;;  %v1892_v9 = vpop.permute.xlu1 %1891 }
 0x2b2   : > { %v1727_v49 = vpop.permute.xlu0 %1726  ;;  %v5761_v38 = vld [vmem:[#allocation3 + $0x50] sm:$0xff] }
 0x2b3   : > { %v5659_v40 = vsel %vm418_vm14, %v1725_v33, %v1727_v49  ;;  %v5697_v25 = vsel %vm418_vm14, %v1727_v49, %v5601_v60 }
 0x2b4   : > { %2036 = vrot.lane.b32.xlu1 %v1738_v56, %s4613_s26 }
 0x2b5   : > { %1981 = vrot.lane.b32.xlu0 %v1738_v56, %s4612_s25  ;;  %v5704_v59 = vpop.permute.xlu1 %1977 }
 0x2b6   : > { %v1849_v5 = vpop.permute.xlu0 %1848 }
 0x2b8   : > { %2128 = vrot.lane.b32.xlu1 %v1738_v56, %s4615_s28 }
 0x2b9   : > { %2082 = vrot.lane.b32.xlu0 %v1738_v56, %s4614_s27  ;;  %v5716_v16 = vpop.permute.xlu1 %2078 }
 0x2ba   : > { %v5689_v44 = vpop.permute.xlu0 %1934 }
 0x2bc   : > { %1854 = vrot.lane.b32.xlu1 %v1739_v62, %s4608_s21 }
 0x2bd   : > { %1811 = vrot.lane.b32.xlu0 %v1739_v62, %s4610_s23  ;;  %v1808_v39 = vpop.permute.xlu1 %1807 }
 0x2be   : > { %v5708_v23 = vpop.permute.xlu0 %2032  ;;  %v1827_v15 = vsel %vm7269_vm0, %v1806_v7, %v1808_v39 }
 0x2c0   : > { %1940 = vrot.lane.b32.xlu1 %v1739_v62, %s4609_s22 }
 0x2c1   : > { %1897 = vrot.lane.b32.xlu0 %v1739_v62, %s4611_s24  ;;  %v1894_v3 = vpop.permute.xlu1 %1893 }
 0x2c2   : > { %v5718_v27 = vpop.permute.xlu0 %2124  ;;  %v1913_v30 = vsel %vm706_vm9, %v1892_v9, %v1894_v3 }
 0x2c4   : > { %2038 = vrot.lane.b32.xlu1 %v1739_v62, %s4613_s26 }
 0x2c5   : > { %1983 = vrot.lane.b32.xlu0 %v1739_v62, %s4612_s25  ;;  %v1980_v12 = vpop.permute.xlu1 %1979 }
 0x2c6   : > { %v1851_v58 = vpop.permute.xlu0 %1850  ;;  %v1999_v17 = vsel %vm838_vm1, %v5704_v59, %v1980_v12 }
 0x2c7   : > { %v1870_v19 = vsel %vm7271_vm2, %v1849_v5, %v1851_v58  ;;  %v5845_v5 = vld [vmem:[%s7214_s4] ss:$8 sps:$4 sm:$0xff]  }
 0x2c8   : > { %2130 = vrot.lane.b32.xlu1 %v1739_v62, %s4615_s28 }
 0x2c9   : > { %2084 = vrot.lane.b32.xlu0 %v1739_v62, %s4614_s27  ;;  %v2081_v37 = vpop.permute.xlu1 %2080 }
 0x2ca   : > { %v1937_v13 = vpop.permute.xlu0 %1936  ;;  %v2102_v56 = vsel %vm990_vm5, %v5716_v16, %v2081_v37 }
 0x2cb   : > { %v1956_v18 = vsel %vm7273_vm10, %v5689_v44, %v1937_v13  ;;  %v2172_v44 = vld [vmem:[%s7215_s5] sm:$0xff]  ;;  %vm7278_vm10 = vmmov %vm7272_vm3 }
 0x2cc   : > { %1813 = vrot.lane.b32.xlu1 %v5637_v29, %s4610_s23 }
 0x2cd   : > { %1856 = vrot.lane.b32.xlu0 %v5637_v29, %s4608_s21 }
 0x2ce   : > { %v2035_v28 = vpop.permute.xlu0 %2034 }
 0x2cf   : > { %v2056_v14 = vsel %vm908_vm4, %v5708_v23, %v2035_v28 }
 0x2d0   : > { %1899 = vrot.lane.b32.xlu1 %v5637_v29, %s4611_s24 }
 0x2d1   : > { %1942 = vrot.lane.b32.xlu0 %v5637_v29, %s4609_s22 }
 0x2d2   : > { %v5749_v51 = vpop.permute.xlu0 %2126 }
 0x2d3   : > { %v2148_v7 = vsel %vm7275_vm11, %v5718_v27, %v5749_v51  ;;  %v2173_v27 = vld [vmem:[%s7215_s5 + $0x8] sm:$0xff]  ;;  %vm7280_vm11 = vmmov %vm7269_vm0 }
 0x2d4   : > { %1985 = vrot.lane.b32.xlu1 %v5637_v29, %s4612_s25 }
 0x2d5   : > { %2040 = vrot.lane.b32.xlu0 %v5637_v29, %s4613_s26 }
 0x2d8   : > { %2086 = vrot.lane.b32.xlu1 %v5637_v29, %s4614_s27 }
 0x2d9   : > { %2132 = vrot.lane.b32.xlu0 %v5637_v29, %s4615_s28 }
 0x2dc   : > { %1815 = vrot.lane.b32.xlu1 %v5656_v22, %s4610_s23 }
 0x2dd   : > { %1817 = vrot.lane.b32.xlu0 %v5659_v40, %s4610_s23 }
 0x2e0   : > { %1858 = vrot.lane.b32.xlu1 %v5656_v22, %s4608_s21 }
 0x2e1   : > { %1860 = vrot.lane.b32.xlu0 %v5659_v40, %s4608_s21 }
 0x2e4   : > { %1901 = vrot.lane.b32.xlu1 %v5656_v22, %s4611_s24 }
 0x2e5   : > { %1903 = vrot.lane.b32.xlu0 %v5659_v40, %s4611_s24 }
 0x2e8   : > { %1944 = vrot.lane.b32.xlu1 %v5656_v22, %s4609_s22 }
 0x2e9   : > { %1946 = vrot.lane.b32.xlu0 %v5659_v40, %s4609_s22 }
 0x2ec   : > { %1987 = vrot.lane.b32.xlu1 %v5656_v22, %s4612_s25 }
 0x2ed   : > { %1989 = vrot.lane.b32.xlu0 %v5659_v40, %s4612_s25 }
 0x2f0   : > { %2042 = vrot.lane.b32.xlu1 %v5656_v22, %s4613_s26 }
 0x2f1   : > { %2044 = vrot.lane.b32.xlu0 %v5659_v40, %s4613_s26 }
 0x2f4   : > { %2088 = vrot.lane.b32.xlu1 %v5656_v22, %s4614_s27 }
 0x2f5   : > { %2090 = vrot.lane.b32.xlu0 %v5659_v40, %s4614_s27 }
 0x2f8   : > { %2134 = vrot.lane.b32.xlu1 %v5656_v22, %s4615_s28 }
 0x2f9   : > { %2136 = vrot.lane.b32.xlu0 %v5659_v40, %s4615_s28 }
 0x2fc   : > { %1819 = vrot.lane.b32.xlu1 %v5697_v25, %s4610_s23 }
 0x2fd   : > { %1821 = vrot.lane.b32.xlu0 %v5702_v54, %s4610_s23 }
 0x300   : > { %1862 = vrot.lane.b32.xlu1 %v5697_v25, %s4608_s21 }
 0x301   : > { %1864 = vrot.lane.b32.xlu0 %v5702_v54, %s4608_s21 }
 0x304   : > { %1905 = vrot.lane.b32.xlu1 %v5697_v25, %s4611_s24 }
 0x305   : > { %1907 = vrot.lane.b32.xlu0 %v5702_v54, %s4611_s24 }
 0x308   : > { %1948 = vrot.lane.b32.xlu1 %v5697_v25, %s4609_s22 }
 0x309   : > { %1950 = vrot.lane.b32.xlu0 %v5702_v54, %s4609_s22 }
 0x30c   : > { %1991 = vrot.lane.b32.xlu1 %v5697_v25, %s4612_s25 }
 0x30d   : > { %1993 = vrot.lane.b32.xlu0 %v5702_v54, %s4612_s25 }
 0x310   : > { %2046 = vrot.lane.b32.xlu1 %v5697_v25, %s4613_s26 }
 0x311   : > { %2048 = vrot.lane.b32.xlu0 %v5702_v54, %s4613_s26 }
 0x314   : > { %2092 = vrot.lane.b32.xlu1 %v5697_v25, %s4614_s27 }
 0x315   : > { %2094 = vrot.lane.b32.xlu0 %v5702_v54, %s4614_s27 }
 0x318   : > { %2138 = vrot.lane.b32.xlu1 %v5697_v25, %s4615_s28 }
 0x319   : > { %2140 = vrot.lane.b32.xlu0 %v5702_v54, %s4615_s28 }
 0x31c   : > { %1823 = vrot.lane.b32.xlu1 %v5747_v34, %s4610_s23 }
 0x31d   : > { %2096 = vrot.lane.b32.xlu0 %v5747_v34, %s4614_s27 }
 0x31e   : > { %v5755_v10 = vpop.permute.xlu1 %1852 }
 0x31f   : > { %v5757_v11 = vpop.permute.xlu0 %1809  ;;  %v1871_v4 = vsel %vm7270_vm15, %v1851_v58, %v5755_v10  ;;  %vm7277_vm15 = vmmov %vm7271_vm2 }
 0x320   : > { %1866 = vrot.lane.b32.xlu1 %v5747_v34, %s4608_s21  ;;  %v1828_v20 = vsel %vm7268_vm7, %v1808_v39, %v5757_v11  ;;  %vm7276_vm7 = vmmov %vm7269_vm0 }
 0x321   : > { %1825 = vrot.lane.b32.xlu0 %v5761_v38, %s4610_s23  ;;  %2199 = vmatprep.subr.bf16.mxu0 %v1828_v20 }
 0x322   : > { %2200 = vmatpush1.bf16.msra.mxu0 %v1827_v15  ;;  %v5768_v36 = vpop.permute.xlu1 %1938 }
 0x323   : > { %2201 = vmatprep.subr.bf16.mxu0 %v1871_v4  ;;  %v5772_v31 = vpop.permute.xlu0 %1895  ;;  %v1957_v42 = vsel %vm7272_vm3, %v1937_v13, %v5768_v36 }
 0x324   : > { %1909 = vrot.lane.b32.xlu1 %v5747_v34, %s4611_s24  ;;  %v1914_v45 = vsel %vm706_vm9, %v1894_v3, %v5772_v31 }
 0x325   : > { %1868 = vrot.lane.b32.xlu0 %v5761_v38, %s4608_s21 }
 0x326   : > { %2202 = vmatpush1.bf16.msra.mxu0 %v1870_v19  ;;  %v5779_v21 = vpop.permute.xlu1 %2036 }
 0x327   : > { %2203 = vmatprep.subr.bf16.mxu0 %v1914_v45  ;;  %v5783_v1 = vpop.permute.xlu0 %1981  ;;  %v2057_v55 = vsel %vm908_vm4, %v2035_v28, %v5779_v21 }
 0x328   : > { %1952 = vrot.lane.b32.xlu1 %v5747_v34, %s4609_s22  ;;  %v2000_v46 = vsel %vm838_vm1, %v1980_v12, %v5783_v1 }
 0x329   : > { %1911 = vrot.lane.b32.xlu0 %v5761_v38, %s4611_s24 }
 0x32a   : > { %2204 = vmatpush1.bf16.msra.mxu0 %v1913_v30  ;;  %v5790_v52 = vpop.permute.xlu1 %2128 }
 0x32b   : > { %2205 = vmatprep.subr.bf16.mxu0 %v1957_v42  ;;  %v5794_v50 = vpop.permute.xlu0 %2082  ;;  %v2149_v0 = vsel %vm7274_vm8, %v5749_v51, %v5790_v52  ;;  %vm7279_vm8 = vmmov %vm7269_vm0 }
 0x32c   : > { %1995 = vrot.lane.b32.xlu1 %v5747_v34, %s4612_s25  ;;  %v2103_v63 = vsel %vm990_vm5, %v2081_v37, %v5794_v50 }
 0x32d   : > { %1954 = vrot.lane.b32.xlu0 %v5761_v38, %s4609_s22 }
 0x32e   : > { %2206 = vmatpush1.bf16.msra.mxu0 %v1956_v18  ;;  %v1855_v57 = vpop.permute.xlu1 %1854 }
 0x32f   : > { %2207 = vmatprep.subr.bf16.mxu0 %v2000_v46  ;;  %v1812_v2 = vpop.permute.xlu0 %1811  ;;  %v1872_v3 = vsel %vm7271_vm2, %v5755_v10, %v1855_v57 }
 0x330   : > { %2050 = vrot.lane.b32.xlu1 %v5747_v34, %s4613_s26  ;;  %v1829_v16 = vsel %vm7269_vm0, %v5757_v11, %v1812_v2  ;;  %vm7282_vm0 = vmmov %vm7271_vm2 }
 0x331   : > { %1997 = vrot.lane.b32.xlu0 %v5761_v38, %s4612_s25 }
 0x332   : > { %2208 = vmatpush1.bf16.msra.mxu0 %v1999_v17  ;;  %v1941_v33 = vpop.permute.xlu1 %1940 }
 0x333   : > { %2209 = vmatprep.subr.bf16.mxu0 %v2057_v55  ;;  %v1898_v60 = vpop.permute.xlu0 %1897  ;;  %v1958_v10 = vsel %vm7278_vm10, %v5768_v36, %v1941_v33 }
 0x334   : > { %2054 = vrot.lane.b32.xlu1 %v5495_v32, %s4613_s26 }
 0x335   : > { %2052 = vrot.lane.b32.xlu0 %v5761_v38, %s4613_s26 }
 0x336   : > { %2210 = vmatpush1.bf16.msra.mxu0 %v2056_v14  ;;  %v5818_v53 = vpop.permute.xlu1 %2038 }
 0x337   : > { %2211 = vmatprep.subr.bf16.mxu0 %v2103_v63  ;;  %v1984_v48 = vpop.permute.xlu0 %1983  ;;  %v2058_v46 = vsel %vm908_vm4, %v5779_v21, %v5818_v53 }
 0x338   : > { %2098 = vrot.lane.b32.xlu1 %v5761_v38, %s4614_s27  ;;  %v2001_v45 = vsel %vm838_vm1, %v5783_v1, %v1984_v48 }
 0x339   : > { %2100 = vrot.lane.b32.xlu0 %v5495_v32, %s4614_s27 }
 0x33a   : > { %2212 = vmatpush1.bf16.msra.mxu0 %v2102_v56  ;;  %v5828_v62 = vpop.permute.xlu1 %2130 }
 0x33b   : > { %2213 = vmatprep.subr.bf16.mxu0 %v2149_v0  ;;  %v5833_v49 = vpop.permute.xlu0 %2084 }
 0x33c   : > { %2142 = vrot.lane.b32.xlu1 %v5747_v34, %s4615_s28  ;;  %v2104_v21 = vsel %vm990_vm5, %v5794_v50, %v5833_v49 }
 0x33d   : > { %2144 = vrot.lane.b32.xlu0 %v5761_v38, %s4615_s28 }
 0x33e   : > { %2214 = vmatpush1.bf16.msra.mxu0 %v2148_v7  ;;  %v1814_v9 = vpop.permute.xlu1 %1813 }
 0x33f   : > { %2283 = vmatprep.subr.bf16.mxu0 %v5656_v22  ;;  %v1857_v59 = vpop.permute.xlu0 %1856  ;;  %v1830_v23 = vsel %vm7276_vm7, %v1812_v2, %v1814_v9  ;;  %vm7281_vm7 = vmmov %vm7271_vm2 }
 0x340   : > { %2146 = vrot.lane.b32.xlu1 %v5495_v32, %s4615_s28  ;;  %2242 = vmatprep.subr.bf16.mxu1 %v1830_v23  ;;  %v1873_v39 = vsel %vm7277_vm15, %v1855_v57, %v1857_v59  ;;  %vm7283_vm15 = vcmask 474112   ;;  %vm7284_vm2 = vmmov %vm7272_vm3 }
 0x341   : > { %2176 = vperm.xlu0 %4563, %v2172_v44   ;;  %2230 = vmatmul.mubr.bf16.vlgmr.msra.gmra.mrb[4].mxu0 %v5845_v5  ;;  %vm7286_vm10 = vmmov %vm7283_vm15 }
 0x342   : > { %2243 = vmatpush1.bf16.msra.mxu1 %v1829_v16  ;;  %2284 = vmatpush1.bf16.msra.mxu0 %v5637_v29  ;;  %v1900_v22 = vpop.permute.xlu1 %1899  ;;  %v1915_v29 = vsel %vm706_vm9, %v5772_v31, %v1898_v60  ;;  %v2150_v56 = vsel %vm7286_vm10, %v5790_v52, %v5828_v62 }
 0x343   : > { %2244 = vmatprep.subr.bf16.mxu1 %v1873_v39  ;;  %v1943_v58 = vpop.permute.xlu0 %1942  ;;  %4465 = vmatprep.mubr.msk.bf16.mxu0 %vm2193_vm13, %v5624_v6  ;;  %v1916_v12 = vsel %vm706_vm9, %v1898_v60, %v1900_v22 }
 0x344   : > { %2181 = vperm.xlu1 %4562, %v2173_v27   ;;  %v1959_v51 = vsel %vm7272_vm3, %v1941_v33, %v1943_v58  ;;  %vm7285_vm3 = vmmov %vm7284_vm2 }
 0x346   : > { %2245 = vmatpush1.bf16.msra.mxu1 %v1872_v3  ;;  %v1986_v13 = vpop.permute.xlu1 %1985 }
 0x347   : > { %2246 = vmatprep.subr.bf16.mxu1 %v1916_v12  ;;  %v2041_v28 = vpop.permute.xlu0 %2040  ;;  %v2002_v15 = vsel %vm838_vm1, %v1984_v48, %v1986_v13 }
 0x348   : > { %v2059_v36 = vsel %vm908_vm4, %v5818_v53, %v2041_v28 }
 0x34a   : > { %2247 = vmatpush1.bf16.msra.mxu1 %v1915_v29  ;;  %v5869_v37 = vpop.permute.xlu1 %2086 }
 0x34b   : > { %2248 = vmatprep.subr.bf16.mxu1 %v1959_v51  ;;  %v5872_v11 = vpop.permute.xlu0 %2132  ;;  %v2105_v2 = vsel %vm990_vm5, %v5833_v49, %v5869_v37 }
 0x34c   : > { %v2151_v14 = vsel %vm7283_vm15, %v5828_v62, %v5872_v11  ;;  %vm7291_vm15 = vcmask 1031168  }
 0x34e   : > { %2249 = vmatpush1.bf16.msra.mxu1 %v1958_v10  ;;  %v1816_v20 = vpop.permute.xlu1 %1815 }
 0x34f   : > { %2250 = vmatprep.subr.bf16.mxu1 %v2002_v15  ;;  %v5877_v4 = vpop.permute.xlu0 %1817  ;;  %v1831_v31 = vsel %vm7279_vm8, %v1814_v9, %v1816_v20  ;;  %vm7287_vm8 = vmmov %vm7286_vm10 }
 0x350   : > { %v1832_v19 = vsel %vm7280_vm11, %v1816_v20, %v5877_v4  ;;  %vm7288_vm11 = vmmov %vm7287_vm8 }
 0x351   : > { %2285 = vmatprep.subr.bf16.mxu0 %v1832_v19  ;;  %vm7293_vm10 = vmmov %vm7285_vm3 }
 0x352   : > { %2251 = vmatpush1.bf16.msra.mxu1 %v2001_v45  ;;  %2286 = vmatpush1.bf16.msra.mxu0 %v1831_v31  ;;  %v1859_v30 = vpop.permute.xlu1 %1858 }
 0x353   : > { %2252 = vmatprep.subr.bf16.mxu1 %v2059_v36  ;;  %v5886_v42 = vpop.permute.xlu0 %1860  ;;  %v1874_v18 = vsel %vm7281_vm7, %v1857_v59, %v1859_v30  ;;  %vm7289_vm7 = vcmask 1039360  }
 0x354   : > { %v1875_v57 = vsel %vm7282_vm0, %v1859_v30, %v5886_v42  ;;  %vm7290_vm0 = vmmov %vm7289_vm7 }
 0x355   : > { %2287 = vmatprep.subr.bf16.mxu0 %v1875_v57 }
 0x356   : > { %2253 = vmatpush1.bf16.msra.mxu1 %v2058_v46  ;;  %2288 = vmatpush1.bf16.msra.mxu0 %v1874_v18  ;;  %v1902_v1 = vpop.permute.xlu1 %1901 }
 0x357   : > { %2254 = vmatprep.subr.bf16.mxu1 %v2105_v2  ;;  %v5897_v17 = vpop.permute.xlu0 %1903  ;;  %v1917_v33 = vsel %vm706_vm9, %v1900_v22, %v1902_v1 }
 0x358   : > { %v1918_v55 = vsel %vm706_vm9, %v1902_v1, %v5897_v17 }
 0x359   : > { %2289 = vmatprep.subr.bf16.mxu0 %v1918_v55 }
 0x35a   : > { %2255 = vmatpush1.bf16.msra.mxu1 %v2104_v21  ;;  %2290 = vmatpush1.bf16.msra.mxu0 %v1917_v33  ;;  %v1945_v60 = vpop.permute.xlu1 %1944 }
 0x35b   : > { %2256 = vmatprep.subr.bf16.mxu1 %v2151_v14  ;;  %v1947_v53 = vpop.permute.xlu0 %1946  ;;  %v1960_v63 = vsel %vm7284_vm2, %v1943_v58, %v1945_v60  ;;  %vm7292_vm2 = vmmov %vm7291_vm15 }
 0x35c   : > { %v1961_v48 = vsel %vm7285_vm3, %v1945_v60, %v1947_v53 }
 0x35d   : > { %2291 = vmatprep.subr.bf16.mxu0 %v1961_v48 }
 0x35e   : > { %2257 = vmatpush1.bf16.msra.mxu1 %v2150_v56  ;;  %2292 = vmatpush1.bf16.msra.mxu0 %v1960_v63  ;;  %v1988_v50 = vpop.permute.xlu1 %1987 }
 0x35f   : > { %2326 = vmatprep.subr.bf16.mxu1 %v5697_v25  ;;  %v1990_v0 = vpop.permute.xlu0 %1989  ;;  %v2003_v49 = vsel %vm838_vm1, %v1986_v13, %v1988_v50 }
 0x360   : > { %v2004_v7 = vsel %vm838_vm1, %v1988_v50, %v1990_v0 }
 0x361   : > { %2273 = vmatmul.mubr.bf16.vlgmr.msra.gmra.mrb[20].mxu1 %v5845_v5  ;;  %2293 = vmatprep.subr.bf16.mxu0 %v2004_v7 }
 0x362   : > { %2294 = vmatpush1.bf16.msra.mxu0 %v2003_v49  ;;  %2327 = vmatpush1.bf16.msra.mxu1 %v5659_v40  ;;  %v2043_v9 = vpop.permute.xlu1 %2042 }
 0x363   : > { %v2045_v44 = vpop.permute.xlu0 %2044  ;;  %v2060_v52 = vsel %vm908_vm4, %v2041_v28, %v2043_v9  ;;  %4466 = vmatprep.mubr.msk.bf16.mxu1 %vm2193_vm13, %v5624_v6 }
 0x364   : > { %v2061_v25 = vsel %vm908_vm4, %v2043_v9, %v2045_v44 }
 0x365   : > { %2295 = vmatprep.subr.bf16.mxu0 %v2061_v25 }
 0x366   : > { %2296 = vmatpush1.bf16.msra.mxu0 %v2060_v52  ;;  %v2089_v62 = vpop.permute.xlu1 %2088 }
 0x367   : > { %v2091_v59 = vpop.permute.xlu0 %2090  ;;  %v2106_v23 = vsel %vm990_vm5, %v5869_v37, %v2089_v62 }
 0x368   : > { %v2107_v16 = vsel %vm990_vm5, %v2089_v62, %v2091_v59 }
 0x369   : > { %2297 = vmatprep.subr.bf16.mxu0 %v2107_v16 }
 0x36a   : > { %2298 = vmatpush1.bf16.msra.mxu0 %v2106_v23  ;;  %v2135_v40 = vpop.permute.xlu1 %2134 }
 0x36b   : > { %v2137_v27 = vpop.permute.xlu0 %2136  ;;  %v2152_v22 = vsel %vm7287_vm8, %v5872_v11, %v2135_v40 }
 0x36c   : > { %v2153_v39 = vsel %vm7288_vm11, %v2135_v40, %v2137_v27  ;;  %vm7294_vm11 = vmmov %vm7287_vm8 }
 0x36d   : > { %2299 = vmatprep.subr.bf16.mxu0 %v2153_v39 }
 0x36e   : > { %2300 = vmatpush1.bf16.msra.mxu0 %v2152_v22  ;;  %v1820_v58 = vpop.permute.xlu1 %1819 }
 0x36f   : > { %2369 = vmatprep.subr.bf16.mxu0 %v5747_v34  ;;  %v1822_v3 = vpop.permute.xlu0 %1821  ;;  %v1833_v13 = vsel %vm7289_vm7, %v5877_v4, %v1820_v58  ;;  %vm7295_vm7 = vmmov %vm7290_vm0 }
 0x370   : > { %v1834_v12 = vsel %vm7290_vm0, %v1820_v58, %v1822_v3 }
 0x371   : > { %2316 = vmatmul.mubr.bf16.vlgmr.msra.gmra.mrb[8].mxu0 %v5845_v5  ;;  %2328 = vmatprep.subr.bf16.mxu1 %v1834_v12 }
 0x372   : > { %2329 = vmatpush1.bf16.msra.mxu1 %v1833_v13  ;;  %2370 = vmatpush1.bf16.msra.mxu0 %v5702_v54  ;;  %v1863_v28 = vpop.permute.xlu1 %1862 }
 0x373   : > { %v1865_v29 = vpop.permute.xlu0 %1864  ;;  %v1876_v37 = vsel %vm7291_vm15, %v5886_v42, %v1863_v28  ;;  %4467 = vmatprep.mubr.msk.bf16.mxu0 %vm2193_vm13, %v5624_v6  ;;  %vm7296_vm15 = vmmov %vm7292_vm2 }
 0x374   : > { %v1877_v34 = vsel %vm7292_vm2, %v1863_v28, %v1865_v29 }
 0x375   : > { %2330 = vmatprep.subr.bf16.mxu1 %v1877_v34 }
 0x376   : > { %2331 = vmatpush1.bf16.msra.mxu1 %v1876_v37  ;;  %v1906_v51 = vpop.permute.xlu1 %1905 }
 0x377   : > { %v5939_v11 = vpop.permute.xlu0 %1907  ;;  %v1919_v10 = vsel %vm706_vm9, %v5897_v17, %v1906_v51 }
 0x378   : > { %v1920_v54 = vsel %vm706_vm9, %v1906_v51, %v5939_v11 }
 0x379   : > { %2332 = vmatprep.subr.bf16.mxu1 %v1920_v54 }
 0x37a   : > { %2333 = vmatpush1.bf16.msra.mxu1 %v1919_v10  ;;  %v1949_v20 = vpop.permute.xlu1 %1948 }
 0x37b   : > { %v5945_v15 = vpop.permute.xlu0 %1950  ;;  %v1962_v4 = vsel %vm7285_vm3, %v1947_v53, %v1949_v20 }
 0x37c   : > { %v1963_v31 = vsel %vm7293_vm10, %v1949_v20, %v5945_v15  ;;  %vm7297_vm10 = vmmov %vm7285_vm3 }
 0x37d   : > { %2334 = vmatprep.subr.bf16.mxu1 %v1963_v31 }
 0x37e   : > { %2335 = vmatpush1.bf16.msra.mxu1 %v1962_v4  ;;  %v1992_v19 = vpop.permute.xlu1 %1991 }
 0x37f   : > { %v5950_v45 = vpop.permute.xlu0 %1993  ;;  %v2005_v30 = vsel %vm838_vm1, %v1990_v0, %v1992_v19 }
 0x380   : > { %v2006_v36 = vsel %vm838_vm1, %v1992_v19, %v5950_v45 }
 0x381   : > { %2336 = vmatprep.subr.bf16.mxu1 %v2006_v36 }
 0x382   : > { %2337 = vmatpush1.bf16.msra.mxu1 %v2005_v30  ;;  %v2047_v42 = vpop.permute.xlu1 %2046  ;;  %v6017_v30 = vld [vmem:[%s7211_s1] sm:$0xff] }
 0x383   : > { %v5955_v18 = vpop.permute.xlu0 %2048  ;;  %v2062_v57 = vsel %vm908_vm4, %v2045_v44, %v2047_v42 }
 0x384   : > { %v2063_v46 = vsel %vm908_vm4, %v2047_v42, %v5955_v18 }
 0x385   : > { %2338 = vmatprep.subr.bf16.mxu1 %v2063_v46 }
 0x386   : > { %2339 = vmatpush1.bf16.msra.mxu1 %v2062_v57  ;;  %v2093_v1 = vpop.permute.xlu1 %2092 }
 0x387   : > { %v5960_v2 = vpop.permute.xlu0 %2094  ;;  %v2108_v17 = vsel %vm990_vm5, %v2091_v59, %v2093_v1 }
 0x388   : > { %v2109_v33 = vsel %vm990_vm5, %v2093_v1, %v5960_v2 }
 0x389   : > { %2340 = vmatprep.subr.bf16.mxu1 %v2109_v33 }
 0x38a   : > { %2341 = vmatpush1.bf16.msra.mxu1 %v2108_v17  ;;  %v2139_v55 = vpop.permute.xlu1 %2138 }
 0x38b   : > { %v5965_v21 = vpop.permute.xlu0 %2140  ;;  %v2154_v60 = vsel %vm7287_vm8, %v2137_v27, %v2139_v55 }
 0x38c   : > { %v2155_v14 = vsel %vm7294_vm11, %v2139_v55, %v5965_v21  ;;  %vm7298_vm11 = vmmov %vm7287_vm8  ;;  %v2486_v55 = vrot.slane %v6017_v30, %v5475_v35 }
 0x38d   : > { %2342 = vmatprep.subr.bf16.mxu1 %v2155_v14 }
 0x38e   : > { %2343 = vmatpush1.bf16.msra.mxu1 %v2154_v60  ;;  %v1824_v53 = vpop.permute.xlu1 %1823 }
 0x38f   : > { %v2097_v63 = vpop.permute.xlu0 %2096  ;;  %2412 = vmatprep.subr.bf16.mxu1 %v5495_v32  ;;  %v1835_v0 = vsel %vm7290_vm0, %v1822_v3, %v1824_v53 }
 0x391   : > { %2359 = vmatmul.mubr.bf16.vlgmr.msra.gmra.mrb[24].mxu1 %v5845_v5 }
 0x392   : > { %2413 = vmatpush1.bf16.msra.mxu1 %v5761_v38  ;;  %v1867_v48 = vpop.permute.xlu1 %1866  ;;  %4468 = vmatprep.mubr.msk.bf16.mxu1 %vm2193_vm13, %v5624_v6 }
 0x393   : > { %v1826_v56 = vpop.permute.xlu0 %1825  ;;  %2414 = vmatprep.subr.bf16.mxu1 %v5495_v32  ;;  %v1878_v9 = vsel %vm7292_vm2, %v1865_v29, %v1867_v48 }
 0x394   : > { %v1836_v50 = vsel %vm7295_vm7, %v1824_v53, %v1826_v56  ;;  %vm7299_vm7 = vmmov %vm7287_vm8 }
 0x395   : > { %2371 = vmatprep.subr.bf16.mxu0 %v1836_v50 }
 0x396   : > { %2372 = vmatpush1.bf16.msra.mxu0 %v1835_v0  ;;  %2415 = vmatpush1.bf16.msra.mxu1 %v1826_v56  ;;  %v1910_v49 = vpop.permute.xlu1 %1909 }
 0x397   : > { %v1869_v7 = vpop.permute.xlu0 %1868  ;;  %2416 = vmatprep.subr.bf16.mxu1 %v5495_v32  ;;  %v1921_v25 = vsel %vm706_vm9, %v5939_v11, %v1910_v49  ;;  %v2110_v11 = vsel %vm990_vm5, %v5960_v2, %v2097_v63 }
 0x398   : > { %v1879_v38 = vsel %vm7296_vm15, %v1867_v48, %v1869_v7  ;;  %vm7300_vm15 = vmmov %vm7290_vm0 }
 0x399   : > { %2373 = vmatprep.subr.bf16.mxu0 %v1879_v38 }
 0x39a   : > { %2374 = vmatpush1.bf16.msra.mxu0 %v1878_v9  ;;  %2417 = vmatpush1.bf16.msra.mxu1 %v1869_v7  ;;  %v1953_v6 = vpop.permute.xlu1 %1952 }
 0x39b   : > { %v1912_v44 = vpop.permute.xlu0 %1911  ;;  %2418 = vmatprep.subr.bf16.mxu1 %v5495_v32  ;;  %v1964_v16 = vsel %vm7297_vm10, %v5945_v15, %v1953_v6  ;;  %v6005_v15 = vld [vmem:[#allocation3 + $0x58] sm:$0xff] }
 0x39c   : > { %v1922_v52 = vsel %vm706_vm9, %v1910_v49, %v1912_v44 }
 0x39d   : > { %2375 = vmatprep.subr.bf16.mxu0 %v1922_v52  ;;  %v2490_v52 = vrot.slane %v6017_v30, %v5490_v47 }
 0x39e   : > { %2376 = vmatpush1.bf16.msra.mxu0 %v1921_v25  ;;  %2419 = vmatpush1.bf16.msra.mxu1 %v1912_v44  ;;  %v1996_v62 = vpop.permute.xlu1 %1995 }
 0x39f   : > { %v1955_v59 = vpop.permute.xlu0 %1954  ;;  %2420 = vmatprep.subr.bf16.mxu1 %v5495_v32  ;;  %v2007_v39 = vsel %vm838_vm1, %v5950_v45, %v1996_v62 }
 0x3a0   : > { %v1965_v23 = vsel %vm7285_vm3, %v1953_v6, %v1955_v59  ;;  %vm7301_vm3 = vmmov %vm7292_vm2 }
 0x3a1   : > { %2377 = vmatprep.subr.bf16.mxu0 %v1965_v23  ;;  %v2494_v23 = vrot.slane %v6017_v30, %v5493_v43 }
 0x3a2   : > { %2378 = vmatpush1.bf16.msra.mxu0 %v1964_v16  ;;  %2421 = vmatpush1.bf16.msra.mxu1 %v1955_v59  ;;  %v2051_v40 = vpop.permute.xlu1 %2050 }
 0x3a3   : > { %v1998_v27 = vpop.permute.xlu0 %1997  ;;  %2422 = vmatprep.subr.bf16.mxu1 %v5495_v32  ;;  %v2064_v28 = vsel %vm908_vm4, %v5955_v18, %v2051_v40 }
 0x3a4   : > { %v2008_v22 = vsel %vm838_vm1, %v1996_v62, %v1998_v27 }
 0x3a5   : > { %2379 = vmatprep.subr.bf16.mxu0 %v2008_v22 }
 0x3a6   : > { %2380 = vmatpush1.bf16.msra.mxu0 %v2007_v39  ;;  %2423 = vmatpush1.bf16.msra.mxu1 %v1998_v27  ;;  %v2055_v58 = vpop.permute.xlu1 %2054 }
 0x3a7   : > { %v2053_v3 = vpop.permute.xlu0 %2052  ;;  %2424 = vmatprep.subr.bf16.mxu1 %v5495_v32 }
 0x3a8   : > { %v2065_v13 = vsel %vm908_vm4, %v2051_v40, %v2053_v3  ;;  %v2066_v12 = vsel %vm908_vm4, %v2053_v3, %v2055_v58 }
 0x3a9   : > { %2381 = vmatprep.subr.bf16.mxu0 %v2065_v13 }
 0x3aa   : > { %2382 = vmatpush1.bf16.msra.mxu0 %v2064_v28  ;;  %2425 = vmatpush1.bf16.msra.mxu1 %v2066_v12  ;;  %v2099_v29 = vpop.permute.xlu1 %2098 }
 0x3ab   : > { %v2101_v37 = vpop.permute.xlu0 %2100  ;;  %v2111_v34 = vsel %vm990_vm5, %v2097_v63, %v2099_v29  ;;  %2426 = vmatprep.subr.bf16.mxu1 %v5495_v32 }
 0x3ac   : > { %v2112_v51 = vsel %vm990_vm5, %v2099_v29, %v2101_v37  ;;  %2383 = vmatprep.subr.bf16.mxu0 %v2111_v34 }
 0x3ae   : > { %2384 = vmatpush1.bf16.msra.mxu0 %v2110_v11  ;;  %2427 = vmatpush1.bf16.msra.mxu1 %v2112_v51  ;;  %v2143_v10 = vpop.permute.xlu1 %2142 }
 0x3af   : > { %v2145_v54 = vpop.permute.xlu0 %2144  ;;  %v2156_v20 = vsel %vm7287_vm8, %v5965_v21, %v2143_v10  ;;  %2428 = vmatprep.subr.bf16.mxu1 %v6005_v15  ;;  %vm7302_vm8 = vmmov %vm7297_vm10 }
 0x3b0   : > { %v2157_v4 = vsel %vm7298_vm11, %v2143_v10, %v2145_v54  ;;  %v2498_v10 = vrot.slane %v6017_v30, %v5517_v8  ;;  %vm7303_vm11 = vmmov %vm7290_vm0 }
 0x3b1   : > { %2385 = vmatprep.subr.bf16.mxu0 %v2157_v4 }
 0x3b2   : > { %2386 = vmatpush1.bf16.msra.mxu0 %v2156_v20  ;;  %v2147_v32 = vpop.permute.xlu1 %2146 }
 0x3b3   : > { %v2158_v31 = vsel %vm7299_vm7, %v2145_v54, %v2147_v32  ;;  %v2502_v32 = vrot.slane %v6017_v30, %v5520_v41  ;;  %vm7304_vm7 = vmmov %vm7290_vm0 }
 0x3b4   : > { %2429 = vmatpush1.bf16.msra.mxu1 %v2158_v31 }
 0x3b5   : > { %2402 = vmatmul.mubr.bf16.vlgmr.msra.gmra.mrb[12].mxu0 %v5845_v5 }
 0x3b7   : > { %2445 = vmatmul.mubr.bf16.vlgmr.msra.gmra.mrb[28].mxu1 %v5845_v5  ;;  %v2482_v5 = vrot.slane %v6017_v30, %v5465_v61 }
 0x3c0   : > { %v6012_v19 = vpop.permute.xlu0 %2176 }
 0x3c3   : > { %v6020_v18 = vpop.permute.xlu1 %2181 }
 0x414   : > { %v2231_v45 = vpop.f32.mrb[4].mxu0 }
 0x415   : > { %v2232_v36 = vadd.f32 %v2231_v45, %v6012_v19  ;;  %v2233_v42 = vpop.f32.mrb[5].mxu0 }
 0x416   : > { %v2234_v57 = vadd.f32 %v2233_v42, %v6012_v19  ;;  %v2235_v46 = vpop.f32.mrb[6].mxu0 }
 0x417   : > { %v2453_v1 = vmax.f32 %v2232_v36, 0.0  ;;  %v2236_v2 = vadd.f32 %v2235_v46, %v6020_v18  ;;  %v2237_v17 = vpop.f32.mrb[7].mxu0 }
 0x418   : > { %v2454_v33 = vmax.f32 %v2234_v57, 0.0  ;;  %v2238_v21 = vadd.f32 %v2237_v17, %v6020_v18 }
 0x419   : > { %v2464_v60 = vmax.f32 %v2236_v2, 0.0  ;;  %v2534_v53 = vmul.f32 %v2482_v5, %v2453_v1 }
 0x41a   : > { %v2465_v14 = vmax.f32 %v2238_v21, 0.0  ;;  %v2535_v48 = vmul.f32 %v2486_v55, %v2454_v33 }
 0x41b   : > { %v2545_v63 = vmul.f32 %v2482_v5, %v2464_v60 }
 0x41c   : > { %v2546_v56 = vmul.f32 %v2486_v55, %v2465_v14 }
 0x41d   : > { %v2556_v50 = vpack.c.bf16 %v2545_v63, %v2534_v53  ;;  %v2506_v53 = vrot.slane %v6017_v30, %v5538_v26 }
 0x41e   : > { %v2557_v0 = vpack.c.bf16 %v2546_v56, %v2535_v48 }
 0x41f   : > { %2578 = vrot.lane.b32.xlu0 %v2556_v50, %s4620_s29  ;;  %v2510_v50 = vrot.slane %v6017_v30, %v5541_v24 }
 0x420   : > { %2580 = vrot.lane.b32.xlu1 %v2557_v0, %s4620_s29 }
 0x434   : > { %v2274_v49 = vpop.f32.mrb[20].mxu1 }
 0x435   : > { %v2275_v7 = vadd.f32 %v2274_v49, %v6012_v19  ;;  %v2276_v38 = vpop.f32.mrb[21].mxu1 }
 0x436   : > { %v2277_v9 = vadd.f32 %v2276_v38, %v6012_v19  ;;  %v2278_v6 = vpop.f32.mrb[22].mxu1 }
 0x437   : > { %v2455_v44 = vmax.f32 %v2275_v7, 0.0  ;;  %v2279_v25 = vadd.f32 %v2278_v6, %v6020_v18  ;;  %v2280_v62 = vpop.f32.mrb[23].mxu1 }
 0x438   : > { %v2456_v59 = vmax.f32 %v2277_v9, 0.0  ;;  %v2281_v16 = vadd.f32 %v2280_v62, %v6020_v18 }
 0x439   : > { %v2466_v40 = vmax.f32 %v2279_v25, 0.0  ;;  %v2536_v22 = vmul.f32 %v2490_v52, %v2455_v44 }
 0x43a   : > { %v2467_v27 = vmax.f32 %v2281_v16, 0.0  ;;  %v2537_v58 = vmul.f32 %v2494_v23, %v2456_v59  ;;  %v2476_v59 = vld [vmem:[%s7211_s1 + $0x8] sm:$0x7] }
 0x43b   : > { %v2547_v39 = vmul.f32 %v2490_v52, %v2466_v40 }
 0x43c   : > { %v2548_v3 = vmul.f32 %v2494_v23, %v2467_v27 }
 0x43d   : > { %v2558_v13 = vpack.c.bf16 %v2547_v39, %v2536_v22  ;;  %v2514_v39 = vrot.slane %v2476_v59, %v5465_v61 }
 0x43e   : > { %v2559_v12 = vpack.c.bf16 %v2548_v3, %v2537_v58 }
 0x43f   : > { %2582 = vrot.lane.b32.xlu0 %v2558_v13, %s4620_s29 }
 0x440   : > { %2584 = vrot.lane.b32.xlu1 %v2559_v12, %s4620_s29 }
 0x444   : > { %v2317_v28 = vpop.f32.mrb[8].mxu0 }
 0x445   : > { %v2318_v29 = vadd.f32 %v2317_v28, %v6012_v19  ;;  %v2319_v37 = vpop.f32.mrb[9].mxu0 }
 0x446   : > { %v2320_v34 = vadd.f32 %v2319_v37, %v6012_v19  ;;  %v2321_v51 = vpop.f32.mrb[10].mxu0 }
 0x447   : > { %v2457_v11 = vmax.f32 %v2318_v29, 0.0  ;;  %v2322_v54 = vadd.f32 %v2321_v51, %v6020_v18  ;;  %v2323_v20 = vpop.f32.mrb[11].mxu0  ;;  %v2518_v29 = vrot.slane %v2476_v59, %v5475_v35 }
 0x448   : > { %v2458_v4 = vmax.f32 %v2320_v34, 0.0  ;;  %v2324_v31 = vadd.f32 %v2323_v20, %v6020_v18 }
 0x449   : > { %v2468_v45 = vmax.f32 %v2322_v54, 0.0  ;;  %v2538_v42 = vmul.f32 %v2498_v10, %v2457_v11 }
 0x44a   : > { %v2469_v36 = vmax.f32 %v2324_v31, 0.0  ;;  %v2539_v46 = vmul.f32 %v2502_v32, %v2458_v4 }
 0x44b   : > { %v2549_v57 = vmul.f32 %v2498_v10, %v2468_v45  ;;  %v2522_v10 = vrot.slane %v2476_v59, %v5490_v47 }
 0x44c   : > { %v2550_v1 = vmul.f32 %v2502_v32, %v2469_v36 }
 0x44d   : > { %v2560_v5 = vpack.c.bf16 %v2549_v57, %v2538_v42 }
 0x44e   : > { %v2561_v2 = vpack.c.bf16 %v2550_v1, %v2539_v46 }
 0x44f   : > { %2586 = vrot.lane.b32.xlu0 %v2560_v5, %s4620_s29 }
 0x450   : > { %2588 = vrot.lane.b32.xlu1 %v2561_v2, %s4620_s29 }
 0x464   : > { %v2360_v17 = vpop.f32.mrb[24].mxu1 }
 0x465   : > { %v2361_v33 = vadd.f32 %v2360_v17, %v6012_v19  ;;  %v2362_v55 = vpop.f32.mrb[25].mxu1 }
 0x466   : > { %v2363_v21 = vadd.f32 %v2362_v55, %v6012_v19  ;;  %v2364_v60 = vpop.f32.mrb[26].mxu1 }
 0x467   : > { %v2459_v14 = vmax.f32 %v2361_v33, 0.0  ;;  %v2365_v63 = vadd.f32 %v2364_v60, %v6020_v18  ;;  %v2366_v48 = vpop.f32.mrb[27].mxu1 }
 0x468   : > { %v2460_v56 = vmax.f32 %v2363_v21, 0.0  ;;  %v2367_v0 = vadd.f32 %v2366_v48, %v6020_v18 }
 0x469   : > { %v2470_v49 = vmax.f32 %v2365_v63, 0.0  ;;  %v2540_v38 = vmul.f32 %v2506_v53, %v2459_v14 }
 0x46a   : > { %v2471_v7 = vmax.f32 %v2367_v0, 0.0  ;;  %v2541_v6 = vmul.f32 %v2510_v50, %v2460_v56 }
 0x46b   : > { %v2551_v9 = vmul.f32 %v2506_v53, %v2470_v49 }
 0x46c   : > { %v2552_v44 = vmul.f32 %v2510_v50, %v2471_v7  ;;  %v6116_v50 = vld [vmem:[%s7216_s6 + $0x4] ss:$8 sps:$4 sm:$0xff]  }
 0x46d   : > { %v2562_v52 = vpack.c.bf16 %v2551_v9, %v2540_v38  ;;  %4471 = vmatprep.mubr.msk.bf16.mxu0 %vm2193_vm13, %v6116_v50  ;;  %4472 = vmatprep.mubr.msk.bf16.mxu1 %vm2193_vm13, %v6116_v50 }
 0x46e   : > { %v2563_v25 = vpack.c.bf16 %v2552_v44, %v2541_v6 }
 0x46f   : > { %2590 = vrot.lane.b32.xlu0 %v2562_v52, %s4620_s29 }
 0x473   : > { %2592 = vrot.lane.b32.xlu0 %v2563_v25, %s4620_s29 }
 0x488   : > { %v2403_v62 = vpop.f32.mrb[12].mxu0 }
 0x489   : > { %v2404_v30 = vadd.f32 %v2403_v62, %v6012_v19  ;;  %v2405_v23 = vpop.f32.mrb[13].mxu0 }
 0x48a   : > { %v2406_v16 = vadd.f32 %v2405_v23, %v6012_v19  ;;  %v2407_v40 = vpop.f32.mrb[14].mxu0  ;;  %v2446_v27 = vpop.f32.mrb[28].mxu1 }
 0x48b   : > { %v2461_v22 = vmax.f32 %v2404_v30, 0.0  ;;  %v2408_v58 = vadd.f32 %v2407_v40, %v6020_v18  ;;  %v2409_v3 = vpop.f32.mrb[15].mxu0  ;;  %v2447_v13 = vadd.f32 %v2446_v27, %v6012_v19  ;;  %v2448_v12 = vpop.f32.mrb[29].mxu1 }
 0x48c   : > { %v2462_v28 = vmax.f32 %v2406_v16, 0.0  ;;  %v2410_v37 = vadd.f32 %v2409_v3, %v6020_v18  ;;  %v2449_v34 = vpop.f32.mrb[30].mxu1 }
 0x48d   : > { %v2472_v51 = vmax.f32 %v2408_v58, 0.0  ;;  %v2463_v11 = vmax.f32 %v2447_v13, 0.0  ;;  %v2450_v54 = vadd.f32 %v2449_v34, %v6020_v18  ;;  %v2451_v20 = vpop.f32.mrb[31].mxu1  ;;  %v2542_v32 = vmul.f32 %v2514_v39, %v2461_v22 }
 0x48e   : > { %v2473_v4 = vmax.f32 %v2410_v37, 0.0  ;;  %v2543_v36 = vmul.f32 %v2518_v29, %v2462_v28 }
 0x48f   : > { %v2553_v31 = vmul.f32 %v2514_v39, %v2472_v51  ;;  %v2474_v45 = vmax.f32 %v2450_v54, 0.0  ;;  %v2544_v57 = vmul.f32 %v2522_v10, %v2463_v11 }
 0x490   : > { %v2554_v19 = vmul.f32 %v2518_v29, %v2473_v4 }
 0x491   : > { %v2564_v42 = vpack.c.bf16 %v2553_v31, %v2542_v32  ;;  %v2555_v46 = vmul.f32 %v2522_v10, %v2474_v45  ;;  %v2579_v1 = vpop.permute.xlu0 %2578 }
 0x492   : > { %v2565_v5 = vpack.c.bf16 %v2554_v19, %v2543_v36  ;;  %2621 = vst.msk [vmem:[#allocation4] sm:$0xff] %vm1758_vm12, %v2579_v1  ;;  %v2581_v2 = vpop.permute.xlu1 %2580 }
 0x493   : > { %v2566_v17 = vpack.c.bf16 %v2555_v46, %v2544_v57  ;;  %v2600_v33 = vsel %vm418_vm14, %v2579_v1, %v2581_v2  ;;  %2594 = vrot.lane.b32.xlu1 %v2564_v42, %s4620_s29 }
 0x494   : > { %2596 = vrot.lane.b32.xlu0 %v2565_v5, %s4620_s29  ;;  %3057 = vmatprep.subr.bf16.mxu0 %v2600_v33 }
 0x497   : > { %2598 = vrot.lane.b32.xlu1 %v2566_v17, %s4620_s29 }
 0x499   : > { %v2632_v18 = vld [vmem:[#allocation4] sm:$0xff] }
 0x49a   : > { %2709 = vrot.lane.b32.xlu0 %v2632_v18, %s4608_s21  ;;  %3058 = vmatpush1.bf16.msra.mxu0 %v2632_v18 }
 0x49b   : > { %2666 = vrot.lane.b32.xlu1 %v2632_v18, %s4610_s23 }
 0x49e   : > { %2795 = vrot.lane.b32.xlu0 %v2632_v18, %s4609_s22 }
 0x49f   : > { %2752 = vrot.lane.b32.xlu1 %v2632_v18, %s4611_s24 }
 0x4a2   : > { %2893 = vrot.lane.b32.xlu0 %v2632_v18, %s4613_s26 }
 0x4a3   : > { %2838 = vrot.lane.b32.xlu1 %v2632_v18, %s4612_s25 }
 0x4a6   : > { %2985 = vrot.lane.b32.xlu0 %v2632_v18, %s4615_s28 }
 0x4a7   : > { %2939 = vrot.lane.b32.xlu1 %v2632_v18, %s4614_s27 }
 0x4aa   : > { %2711 = vrot.lane.b32.xlu0 %v2600_v33, %s4608_s21 }
 0x4ab   : > { %2668 = vrot.lane.b32.xlu1 %v2600_v33, %s4610_s23 }
 0x4ae   : > { %2797 = vrot.lane.b32.xlu0 %v2600_v33, %s4609_s22 }
 0x4af   : > { %2754 = vrot.lane.b32.xlu1 %v2600_v33, %s4611_s24 }
 0x4b1   : > { %v2583_v55 = vpop.permute.xlu0 %2582 }
 0x4b2   : > { %v2601_v21 = vsel %vm418_vm14, %v2581_v2, %v2583_v55  ;;  %v2585_v60 = vpop.permute.xlu1 %2584  ;;  %2895 = vrot.lane.b32.xlu0 %v2600_v33, %s4613_s26 }
 0x4b3   : > { %v2602_v14 = vsel %vm418_vm14, %v2583_v55, %v2585_v60  ;;  %2840 = vrot.lane.b32.xlu1 %v2600_v33, %s4612_s25 }
 0x4b4   : > { %3100 = vmatprep.subr.bf16.mxu1 %v2602_v14 }
 0x4b5   : > { %3101 = vmatpush1.bf16.msra.mxu1 %v2601_v21 }
 0x4b6   : > { %2987 = vrot.lane.b32.xlu0 %v2600_v33, %s4615_s28 }
 0x4b7   : > { %2941 = vrot.lane.b32.xlu1 %v2600_v33, %s4614_s27 }
 0x4ba   : > { %2670 = vrot.lane.b32.xlu0 %v2601_v21, %s4610_s23 }
 0x4bb   : > { %2713 = vrot.lane.b32.xlu1 %v2601_v21, %s4608_s21 }
 0x4be   : > { %2756 = vrot.lane.b32.xlu0 %v2601_v21, %s4611_s24 }
 0x4bf   : > { %2799 = vrot.lane.b32.xlu1 %v2601_v21, %s4609_s22 }
 0x4c1   : > { %v2587_v53 = vpop.permute.xlu0 %2586 }
 0x4c2   : > { %v6101_v63 = vsel %vm418_vm14, %v2585_v60, %v2587_v53  ;;  %v2589_v48 = vpop.permute.xlu1 %2588  ;;  %2842 = vrot.lane.b32.xlu0 %v2601_v21, %s4612_s25 }
 0x4c3   : > { %v6105_v56 = vsel %vm418_vm14, %v2587_v53, %v2589_v48  ;;  %2897 = vrot.lane.b32.xlu1 %v2601_v21, %s4613_s26 }
 0x4c6   : > { %2943 = vrot.lane.b32.xlu0 %v2601_v21, %s4614_s27 }
 0x4c7   : > { %2989 = vrot.lane.b32.xlu1 %v2601_v21, %s4615_s28 }
 0x4ca   : > { %2674 = vrot.lane.b32.xlu0 %v6101_v63, %s4610_s23 }
 0x4cb   : > { %2672 = vrot.lane.b32.xlu1 %v2602_v14, %s4610_s23 }
 0x4ce   : > { %2717 = vrot.lane.b32.xlu0 %v6101_v63, %s4608_s21 }
 0x4cf   : > { %2715 = vrot.lane.b32.xlu1 %v2602_v14, %s4608_s21 }
 0x4d2   : > { %2760 = vrot.lane.b32.xlu0 %v6101_v63, %s4611_s24 }
 0x4d3   : > { %2758 = vrot.lane.b32.xlu1 %v2602_v14, %s4611_s24 }
 0x4d6   : > { %2803 = vrot.lane.b32.xlu0 %v6101_v63, %s4609_s22 }
 0x4d7   : > { %2801 = vrot.lane.b32.xlu1 %v2602_v14, %s4609_s22 }
 0x4da   : > { %2846 = vrot.lane.b32.xlu0 %v6101_v63, %s4612_s25 }
 0x4db   : > { %2844 = vrot.lane.b32.xlu1 %v2602_v14, %s4612_s25 }
 0x4de   : > { %2901 = vrot.lane.b32.xlu0 %v6101_v63, %s4613_s26 }
 0x4df   : > { %2899 = vrot.lane.b32.xlu1 %v2602_v14, %s4613_s26 }
 0x4e1   : > { %v2591_v0 = vpop.permute.xlu0 %2590 }
 0x4e2   : > { %v6138_v49 = vsel %vm418_vm14, %v2589_v48, %v2591_v0  ;;  %2947 = vrot.lane.b32.xlu0 %v6101_v63, %s4614_s27 }
 0x4e3   : > { %2945 = vrot.lane.b32.xlu1 %v2602_v14, %s4614_s27 }
 0x4e5   : > { %v2593_v7 = vpop.permute.xlu0 %2592 }
 0x4e6   : > { %v6144_v38 = vsel %vm418_vm14, %v2591_v0, %v2593_v7  ;;  %2993 = vrot.lane.b32.xlu0 %v6101_v63, %s4615_s28 }
 0x4e7   : > { %2991 = vrot.lane.b32.xlu1 %v2602_v14, %s4615_s28 }
 0x4ea   : > { %2678 = vrot.lane.b32.xlu0 %v6138_v49, %s4610_s23 }
 0x4eb   : > { %2676 = vrot.lane.b32.xlu1 %v6105_v56, %s4610_s23 }
 0x4ee   : > { %2721 = vrot.lane.b32.xlu0 %v6138_v49, %s4608_s21 }
 0x4ef   : > { %2719 = vrot.lane.b32.xlu1 %v6105_v56, %s4608_s21 }
 0x4f2   : > { %2764 = vrot.lane.b32.xlu0 %v6138_v49, %s4611_s24 }
 0x4f3   : > { %2762 = vrot.lane.b32.xlu1 %v6105_v56, %s4611_s24 }
 0x4f6   : > { %2807 = vrot.lane.b32.xlu0 %v6138_v49, %s4609_s22 }
 0x4f7   : > { %2805 = vrot.lane.b32.xlu1 %v6105_v56, %s4609_s22 }
 0x4fa   : > { %2850 = vrot.lane.b32.xlu0 %v6138_v49, %s4612_s25 }
 0x4fb   : > { %2848 = vrot.lane.b32.xlu1 %v6105_v56, %s4612_s25 }
 0x4fe   : > { %2905 = vrot.lane.b32.xlu0 %v6138_v49, %s4613_s26 }
 0x4ff   : > { %2903 = vrot.lane.b32.xlu1 %v6105_v56, %s4613_s26 }
 0x502   : > { %2951 = vrot.lane.b32.xlu0 %v6138_v49, %s4614_s27 }
 0x503   : > { %2949 = vrot.lane.b32.xlu1 %v6105_v56, %s4614_s27 }
 0x505   : > { %v2595_v9 = vpop.permute.xlu1 %2594 }
 0x506   : > { %v6178_v6 = vsel %vm418_vm14, %v2593_v7, %v2595_v9  ;;  %v2597_v44 = vpop.permute.xlu0 %2596  ;;  %2997 = vrot.lane.b32.xlu0 %v6138_v49, %s4615_s28 }
 0x507   : > { %v6183_v52 = vsel %vm418_vm14, %v2595_v9, %v2597_v44  ;;  %2995 = vrot.lane.b32.xlu1 %v6105_v56, %s4615_s28 }
 0x509   : > { %v2599_v25 = vpop.permute.xlu1 %2598 }
 0x50a   : > { %v2609_v62 = vsel %vm418_vm14, %v2597_v44, %v2599_v25  ;;  %2682 = vrot.lane.b32.xlu0 %v6178_v6, %s4610_s23 }
 0x50b   : > { %2631 = vst.msk [vmem:[#allocation4 + $0x50] sm:$0xff] %vm1769_vm6, %v2609_v62  ;;  %2680 = vrot.lane.b32.xlu1 %v6144_v38, %s4610_s23 }
 0x50c   : > { %v2710_v59 = vpop.permute.xlu0 %2709 }
 0x50d   : > { %v2667_v30 = vpop.permute.xlu1 %2666 }
 0x50e   : > { %2725 = vrot.lane.b32.xlu0 %v6178_v6, %s4608_s21 }
 0x50f   : > { %2723 = vrot.lane.b32.xlu1 %v6144_v38, %s4608_s21 }
 0x510   : > { %v2796_v23 = vpop.permute.xlu0 %2795 }
 0x511   : > { %v2753_v16 = vpop.permute.xlu1 %2752 }
 0x512   : > { %2768 = vrot.lane.b32.xlu0 %v6178_v6, %s4611_s24  ;;  %v6235_v51 = vld [vmem:[#allocation4 + $0x50] sm:$0xff] }
 0x513   : > { %2766 = vrot.lane.b32.xlu1 %v6144_v38, %s4611_s24 }
 0x514   : > { %v6201_v40 = vpop.permute.xlu0 %2893 }
 0x515   : > { %v6203_v27 = vpop.permute.xlu1 %2838 }
 0x516   : > { %2811 = vrot.lane.b32.xlu0 %v6178_v6, %s4609_s22 }
 0x517   : > { %2809 = vrot.lane.b32.xlu1 %v6144_v38, %s4609_s22 }
 0x518   : > { %v6209_v22 = vpop.permute.xlu0 %2985 }
 0x519   : > { %v6211_v39 = vpop.permute.xlu1 %2939 }
 0x51a   : > { %2854 = vrot.lane.b32.xlu0 %v6178_v6, %s4612_s25 }
 0x51b   : > { %2852 = vrot.lane.b32.xlu1 %v6144_v38, %s4612_s25 }
 0x51c   : > { %v2712_v58 = vpop.permute.xlu0 %2711 }
 0x51d   : > { %v2669_v3 = vpop.permute.xlu1 %2668  ;;  %v2731_v45 = vsel %vm7301_vm3, %v2710_v59, %v2712_v58  ;;  %vm7308_vm3 = vmmov %vm7302_vm8 }
 0x51e   : > { %2909 = vrot.lane.b32.xlu0 %v6178_v6, %s4613_s26  ;;  %v2688_v20 = vsel %vm7300_vm15, %v2667_v30, %v2669_v3 }
 0x51f   : > { %2907 = vrot.lane.b32.xlu1 %v6144_v38, %s4613_s26 }
 0x520   : > { %v2798_v13 = vpop.permute.xlu0 %2797 }
 0x521   : > { %v2755_v12 = vpop.permute.xlu1 %2754  ;;  %v2817_v2 = vsel %vm7302_vm8, %v2796_v23, %v2798_v13 }
 0x522   : > { %2955 = vrot.lane.b32.xlu0 %v6178_v6, %s4614_s27  ;;  %v2774_v57 = vsel %vm706_vm9, %v2753_v16, %v2755_v12 }
 0x523   : > { %2953 = vrot.lane.b32.xlu1 %v6144_v38, %s4614_s27 }
 0x524   : > { %v6225_v28 = vpop.permute.xlu0 %2895 }
 0x525   : > { %v2841_v29 = vpop.permute.xlu1 %2840  ;;  %v2917_v9 = vsel %vm908_vm4, %v6201_v40, %v6225_v28 }
 0x526   : > { %3001 = vrot.lane.b32.xlu0 %v6178_v6, %s4615_s28  ;;  %v2860_v60 = vsel %vm838_vm1, %v6203_v27, %v2841_v29 }
 0x527   : > { %2999 = vrot.lane.b32.xlu1 %v6144_v38, %s4615_s28 }
 0x528   : > { %v6231_v37 = vpop.permute.xlu0 %2987 }
 0x529   : > { %v6233_v34 = vpop.permute.xlu1 %2941 }
 0x52a   : > { %2686 = vrot.lane.b32.xlu0 %v6235_v51, %s4610_s23  ;;  %v2963_v23 = vsel %vm990_vm5, %v6211_v39, %v6233_v34 }
 0x52b   : > { %2684 = vrot.lane.b32.xlu1 %v6183_v52, %s4610_s23 }
 0x52c   : > { %v2671_v11 = vpop.permute.xlu0 %2670 }
 0x52d   : > { %v2714_v10 = vpop.permute.xlu1 %2713  ;;  %v2689_v54 = vsel %vm7290_vm0, %v2669_v3, %v2671_v11  ;;  %vm7305_vm0 = vmmov %vm7292_vm2 }
 0x52e   : > { %3059 = vmatprep.subr.bf16.mxu0 %v2689_v54  ;;  %v2732_v4 = vsel %vm7292_vm2, %v2712_v58, %v2714_v10  ;;  %2729 = vrot.lane.b32.xlu0 %v6235_v51, %s4608_s21  ;;  %vm7306_vm15 = vmmov %vm7305_vm0  ;;  %vm7307_vm2 = vcmask 474112  }
 0x52f   : > { %2727 = vrot.lane.b32.xlu1 %v6183_v52, %s4608_s21  ;;  %3060 = vmatpush1.bf16.msra.mxu0 %v2688_v20  ;;  %vm7310_vm8 = vmmov %vm7307_vm2 }
 0x530   : > { %3061 = vmatprep.subr.bf16.mxu0 %v2732_v4  ;;  %v2757_v32 = vpop.permute.xlu0 %2756  ;;  %v3009_v39 = vsel %vm7310_vm8, %v6209_v22, %v6231_v37 }
 0x531   : > { %v6248_v31 = vpop.permute.xlu1 %2799  ;;  %v2775_v36 = vsel %vm706_vm9, %v2755_v12, %v2757_v32  ;;  %v3033_v12 = vld [vmem:[%s7217_s7] sm:$0xff] }
 0x532   : > { %2772 = vrot.lane.b32.xlu0 %v6235_v51, %s4611_s24  ;;  %v2818_v46 = vsel %vm7297_vm10, %v2798_v13, %v6248_v31  ;;  %vm7309_vm10 = vmmov %vm7308_vm3  ;;  %v6338_v13 = vld [vmem:[%s7216_s6] ss:$8 sps:$4 sm:$0xff]  }
 0x533   : > { %2770 = vrot.lane.b32.xlu1 %v6183_v52, %s4611_s24  ;;  %3062 = vmatpush1.bf16.msra.mxu0 %v2731_v45  ;;  %vm7317_vm8 = vmmov %vm7309_vm10 }
 0x534   : > { %3063 = vmatprep.subr.bf16.mxu0 %v2775_v36  ;;  %v6256_v19 = vpop.permute.xlu0 %2842 }
 0x535   : > { %v6258_v42 = vpop.permute.xlu1 %2897  ;;  %v2861_v17 = vsel %vm838_vm1, %v2841_v29, %v6256_v19 }
 0x536   : > { %2815 = vrot.lane.b32.xlu0 %v6235_v51, %s4609_s22  ;;  %v2918_v14 = vsel %vm908_vm4, %v6225_v28, %v6258_v42 }
 0x537   : > { %2813 = vrot.lane.b32.xlu1 %v6183_v52, %s4609_s22  ;;  %3064 = vmatpush1.bf16.msra.mxu0 %v2774_v57 }
 0x538   : > { %3065 = vmatprep.subr.bf16.mxu0 %v2818_v46  ;;  %v6267_v1 = vpop.permute.xlu0 %2943 }
 0x539   : > { %v6269_v5 = vpop.permute.xlu1 %2989  ;;  %v2964_v44 = vsel %vm990_vm5, %v6233_v34, %v6267_v1 }
 0x53a   : > { %2858 = vrot.lane.b32.xlu0 %v6235_v51, %s4612_s25  ;;  %v3010_v16 = vsel %vm7307_vm2, %v6231_v37, %v6269_v5 }
 0x53b   : > { %2856 = vrot.lane.b32.xlu1 %v6183_v52, %s4612_s25  ;;  %3066 = vmatpush1.bf16.msra.mxu0 %v2817_v2 }
 0x53c   : > { %3067 = vmatprep.subr.bf16.mxu0 %v2861_v17  ;;  %v6278_v33 = vpop.permute.xlu0 %2674 }
 0x53d   : > { %v2673_v18 = vpop.permute.xlu1 %2672 }
 0x53e   : > { %v2691_v55 = vsel %vm7303_vm11, %v2673_v18, %v6278_v33  ;;  %v2690_v21 = vsel %vm7304_vm7, %v2671_v11, %v2673_v18  ;;  %2913 = vrot.lane.b32.xlu0 %v6235_v51, %s4613_s26  ;;  %vm7311_vm11 = vmmov %vm7307_vm2 }
 0x53f   : > { %2911 = vrot.lane.b32.xlu1 %v6183_v52, %s4613_s26  ;;  %3102 = vmatprep.subr.bf16.mxu1 %v2691_v55  ;;  %vm7312_vm7 = vmmov %vm7307_vm2  ;;  %vm7315_vm2 = vcmask 1031168  }
 0x540   : > { %3068 = vmatpush1.bf16.msra.mxu0 %v2860_v60  ;;  %3103 = vmatpush1.bf16.msra.mxu1 %v2690_v21  ;;  %v6292_v53 = vpop.permute.xlu0 %2717 }
 0x541   : > { %v2716_v48 = vpop.permute.xlu1 %2715  ;;  %3069 = vmatprep.subr.bf16.mxu0 %v2918_v14 }
 0x542   : > { %v2734_v0 = vsel %vm7305_vm0, %v2716_v48, %v6292_v53  ;;  %v2733_v7 = vsel %vm7306_vm15, %v2714_v10, %v2716_v48  ;;  %2959 = vrot.lane.b32.xlu0 %v6235_v51, %s4614_s27  ;;  %vm7313_vm0 = vcmask 1039360  }
 0x543   : > { %2957 = vrot.lane.b32.xlu1 %v6183_v52, %s4614_s27  ;;  %3104 = vmatprep.subr.bf16.mxu1 %v2734_v0  ;;  %vm7314_vm15 = vmmov %vm7313_vm0 }
 0x544   : > { %3070 = vmatpush1.bf16.msra.mxu0 %v2917_v9  ;;  %3105 = vmatpush1.bf16.msra.mxu1 %v2733_v7  ;;  %v6307_v25 = vpop.permute.xlu0 %2760 }
 0x545   : > { %v2759_v62 = vpop.permute.xlu1 %2758  ;;  %3071 = vmatprep.subr.bf16.mxu0 %v2964_v44 }
 0x546   : > { %v2777_v59 = vsel %vm706_vm9, %v2759_v62, %v6307_v25  ;;  %v2776_v30 = vsel %vm706_vm9, %v2757_v32, %v2759_v62  ;;  %3005 = vrot.lane.b32.xlu0 %v6235_v51, %s4615_s28 }
 0x547   : > { %3003 = vrot.lane.b32.xlu1 %v6183_v52, %s4615_s28  ;;  %3106 = vmatprep.subr.bf16.mxu1 %v2777_v59 }
 0x548   : > { %3072 = vmatpush1.bf16.msra.mxu0 %v2963_v23  ;;  %3107 = vmatpush1.bf16.msra.mxu1 %v2776_v30  ;;  %v6322_v40 = vpop.permute.xlu0 %2803 }
 0x549   : > { %v2802_v27 = vpop.permute.xlu1 %2801  ;;  %3073 = vmatprep.subr.bf16.mxu0 %v3010_v16 }
 0x54a   : > { %v2820_v58 = vsel %vm7308_vm3, %v2802_v27, %v6322_v40  ;;  %v2819_v3 = vsel %vm7309_vm10, %v6248_v31, %v2802_v27  ;;  %2961 = vrot.lane.b32.xlu0 %v6005_v15, %s4614_s27  ;;  %vm7316_vm3 = vmmov %vm7315_vm2 }
 0x54b   : > { %2915 = vrot.lane.b32.xlu1 %v6005_v15, %s4613_s26  ;;  %3108 = vmatprep.subr.bf16.mxu1 %v2820_v58 }
 0x54c   : > { %3074 = vmatpush1.bf16.msra.mxu0 %v3009_v39  ;;  %3109 = vmatpush1.bf16.msra.mxu1 %v2819_v3  ;;  %v6343_v28 = vpop.permute.xlu0 %2846 }
 0x54d   : > { %v2845_v29 = vpop.permute.xlu1 %2844  ;;  %3143 = vmatprep.subr.bf16.mxu0 %v6105_v56  ;;  %v3034_v56 = vld [vmem:[%s7217_s7 + $0x8] sm:$0xff] }
 0x54e   : > { %v2863_v34 = vsel %vm838_vm1, %v2845_v29, %v6343_v28  ;;  %v2862_v22 = vsel %vm838_vm1, %v6256_v19, %v2845_v29  ;;  %3037 = vperm.xlu0 %4563, %v3033_v12  }
 0x54f   : > { %3007 = vrot.lane.b32.xlu1 %v6005_v15, %s4615_s28  ;;  %3090 = vmatmul.mubr.bf16.vlgmr.msra.gmra.mrb[16].mxu0 %v6338_v13 }
 0x550   : > { %3110 = vmatprep.subr.bf16.mxu1 %v2863_v34  ;;  %3144 = vmatpush1.bf16.msra.mxu0 %v6101_v63  ;;  %v2902_v37 = vpop.permute.xlu0 %2901 }
 0x551   : > { %3111 = vmatpush1.bf16.msra.mxu1 %v2862_v22  ;;  %v2900_v11 = vpop.permute.xlu1 %2899  ;;  %4473 = vmatprep.mubr.msk.bf16.mxu0 %vm2193_vm13, %v6116_v50 }
 0x552   : > { %v2920_v10 = vsel %vm908_vm4, %v2900_v11, %v2902_v37  ;;  %v2919_v54 = vsel %vm908_vm4, %v6258_v42, %v2900_v11 }
 0x553   : > { %3042 = vperm.xlu1 %4562, %v3034_v56   ;;  %3112 = vmatprep.subr.bf16.mxu1 %v2920_v10 }
 0x554   : > { %v2948_v20 = vpop.permute.xlu0 %2947 }
 0x555   : > { %3113 = vmatpush1.bf16.msra.mxu1 %v2919_v54  ;;  %v2946_v63 = vpop.permute.xlu1 %2945 }
 0x556   : > { %v2966_v4 = vsel %vm990_vm5, %v2946_v63, %v2948_v20  ;;  %v2965_v32 = vsel %vm990_vm5, %v6267_v1, %v2946_v63 }
 0x557   : > { %3114 = vmatprep.subr.bf16.mxu1 %v2966_v4 }
 0x558   : > { %v2994_v31 = vpop.permute.xlu0 %2993 }
 0x559   : > { %3115 = vmatpush1.bf16.msra.mxu1 %v2965_v32  ;;  %v2992_v45 = vpop.permute.xlu1 %2991 }
 0x55a   : > { %v3012_v36 = vsel %vm7311_vm11, %v2992_v45, %v2994_v31  ;;  %v3011_v19 = vsel %vm7312_vm7, %v6269_v5, %v2992_v45  ;;  %vm7318_vm11 = vmmov %vm7312_vm7 }
 0x55b   : > { %3116 = vmatprep.subr.bf16.mxu1 %v3012_v36 }
 0x55c   : > { %v2679_v42 = vpop.permute.xlu0 %2678 }
 0x55d   : > { %3117 = vmatpush1.bf16.msra.mxu1 %v3011_v19  ;;  %v2677_v57 = vpop.permute.xlu1 %2676 }
 0x55e   : > { %3186 = vmatprep.subr.bf16.mxu1 %v6144_v38  ;;  %v2693_v46 = vsel %vm7313_vm0, %v2677_v57, %v2679_v42  ;;  %v2692_v1 = vsel %vm7314_vm15, %v6278_v33, %v2677_v57  ;;  %vm7319_vm15 = vmmov %vm7313_vm0 }
 0x55f   : > { %3145 = vmatprep.subr.bf16.mxu0 %v2693_v46 }
 0x560   : > { %3133 = vmatmul.mubr.bf16.vlgmr.msra.gmra.mrb[32].mxu1 %v6338_v13  ;;  %3146 = vmatpush1.bf16.msra.mxu0 %v2692_v1  ;;  %v2722_v2 = vpop.permute.xlu0 %2721 }
 0x561   : > { %3187 = vmatpush1.bf16.msra.mxu1 %v6138_v49  ;;  %v2720_v17 = vpop.permute.xlu1 %2719  ;;  %4474 = vmatprep.mubr.msk.bf16.mxu1 %vm2193_vm13, %v6116_v50 }
 0x562   : > { %v2736_v5 = vsel %vm7315_vm2, %v2720_v17, %v2722_v2  ;;  %v2735_v38 = vsel %vm7316_vm3, %v6292_v53, %v2720_v17  ;;  %vm7320_vm3 = vmmov %vm7315_vm2 }
 0x563   : > { %3147 = vmatprep.subr.bf16.mxu0 %v2736_v5 }
 0x564   : > { %3148 = vmatpush1.bf16.msra.mxu0 %v2735_v38  ;;  %v2765_v18 = vpop.permute.xlu0 %2764 }
 0x565   : > { %v2763_v33 = vpop.permute.xlu1 %2762 }
 0x566   : > { %v2779_v55 = vsel %vm706_vm9, %v2763_v33, %v2765_v18  ;;  %v2778_v21 = vsel %vm706_vm9, %v6307_v25, %v2763_v33 }
 0x567   : > { %3149 = vmatprep.subr.bf16.mxu0 %v2779_v55 }
 0x568   : > { %3150 = vmatpush1.bf16.msra.mxu0 %v2778_v21  ;;  %v2808_v49 = vpop.permute.xlu0 %2807 }
 0x569   : > { %v2806_v60 = vpop.permute.xlu1 %2805 }
 0x56a   : > { %v2822_v14 = vsel %vm7309_vm10, %v2806_v60, %v2808_v49  ;;  %v2821_v48 = vsel %vm7317_vm8, %v6322_v40, %v2806_v60  ;;  %vm7321_vm10 = vmmov %vm7317_vm8 }
 0x56b   : > { %3151 = vmatprep.subr.bf16.mxu0 %v2822_v14 }
 0x56c   : > { %3152 = vmatpush1.bf16.msra.mxu0 %v2821_v48  ;;  %v2851_v53 = vpop.permute.xlu0 %2850 }
 0x56d   : > { %v2849_v0 = vpop.permute.xlu1 %2848 }
 0x56e   : > { %v2865_v7 = vsel %vm838_vm1, %v2849_v0, %v2851_v53  ;;  %v2864_v9 = vsel %vm838_vm1, %v6343_v28, %v2849_v0 }
 0x56f   : > { %3153 = vmatprep.subr.bf16.mxu0 %v2865_v7 }
 0x570   : > { %3154 = vmatpush1.bf16.msra.mxu0 %v2864_v9  ;;  %v2906_v44 = vpop.permute.xlu0 %2905 }
 0x571   : > { %v2904_v25 = vpop.permute.xlu1 %2903 }
 0x572   : > { %v2922_v62 = vsel %vm908_vm4, %v2904_v25, %v2906_v44  ;;  %v2921_v59 = vsel %vm908_vm4, %v2902_v37, %v2904_v25 }
 0x573   : > { %3155 = vmatprep.subr.bf16.mxu0 %v2922_v62 }
 0x574   : > { %3156 = vmatpush1.bf16.msra.mxu0 %v2921_v59  ;;  %v2952_v30 = vpop.permute.xlu0 %2951 }
 0x575   : > { %v2950_v23 = vpop.permute.xlu1 %2949 }
 0x576   : > { %v2968_v16 = vsel %vm990_vm5, %v2950_v23, %v2952_v30  ;;  %v2967_v40 = vsel %vm990_vm5, %v2948_v20, %v2950_v23 }
 0x577   : > { %3157 = vmatprep.subr.bf16.mxu0 %v2968_v16 }
 0x578   : > { %3158 = vmatpush1.bf16.msra.mxu0 %v2967_v40  ;;  %v2998_v27 = vpop.permute.xlu0 %2997 }
 0x579   : > { %v2996_v58 = vpop.permute.xlu1 %2995 }
 0x57a   : > { %v3014_v3 = vsel %vm7318_vm11, %v2996_v58, %v2998_v27  ;;  %v3013_v39 = vsel %vm7312_vm7, %v2994_v31, %v2996_v58  ;;  %vm7322_vm11 = vmmov %vm7312_vm7 }
 0x57b   : > { %3159 = vmatprep.subr.bf16.mxu0 %v3014_v3 }
 0x57c   : > { %3160 = vmatpush1.bf16.msra.mxu0 %v3013_v39  ;;  %v2683_v12 = vpop.permute.xlu0 %2682 }
 0x57d   : > { %v2681_v28 = vpop.permute.xlu1 %2680  ;;  %3229 = vmatprep.subr.bf16.mxu0 %v6183_v52 }
 0x57e   : > { %v2695_v29 = vsel %vm7313_vm0, %v2681_v28, %v2683_v12  ;;  %v2694_v34 = vsel %vm7319_vm15, %v2679_v42, %v2681_v28  ;;  %vm7323_vm15 = vmmov %vm7313_vm0 }
 0x57f   : > { %3176 = vmatmul.mubr.bf16.vlgmr.msra.gmra.mrb[20].mxu0 %v6338_v13  ;;  %3188 = vmatprep.subr.bf16.mxu1 %v2695_v29 }
 0x580   : > { %3230 = vmatpush1.bf16.msra.mxu0 %v6178_v6  ;;  %3189 = vmatpush1.bf16.msra.mxu1 %v2694_v34  ;;  %v2726_v22 = vpop.permute.xlu0 %2725 }
 0x581   : > { %v2724_v37 = vpop.permute.xlu1 %2723  ;;  %4475 = vmatprep.mubr.msk.bf16.mxu0 %vm2193_vm13, %v6116_v50 }
 0x582   : > { %v2738_v56 = vsel %vm7315_vm2, %v2724_v37, %v2726_v22  ;;  %v2737_v11 = vsel %vm7320_vm3, %v2722_v2, %v2724_v37  ;;  %vm7324_vm3 = vmmov %vm7315_vm2 }
 0x583   : > { %3190 = vmatprep.subr.bf16.mxu1 %v2738_v56 }
 0x584   : > { %3191 = vmatpush1.bf16.msra.mxu1 %v2737_v11  ;;  %v2769_v52 = vpop.permute.xlu0 %2768 }
 0x585   : > { %v2767_v10 = vpop.permute.xlu1 %2766 }
 0x586   : > { %v2781_v54 = vsel %vm706_vm9, %v2767_v10, %v2769_v52  ;;  %v2780_v20 = vsel %vm706_vm9, %v2765_v18, %v2767_v10 }
 0x587   : > { %3192 = vmatprep.subr.bf16.mxu1 %v2781_v54 }
 0x588   : > { %3193 = vmatpush1.bf16.msra.mxu1 %v2780_v20  ;;  %v2812_v6 = vpop.permute.xlu0 %2811 }
 0x589   : > { %v2810_v63 = vpop.permute.xlu1 %2809 }
 0x58a   : > { %v2824_v4 = vsel %vm7321_vm10, %v2810_v63, %v2812_v6  ;;  %v2823_v32 = vsel %vm7317_vm8, %v2808_v49, %v2810_v63  ;;  %vm7325_vm10 = vmmov %vm7317_vm8 }
 0x58b   : > { %3194 = vmatprep.subr.bf16.mxu1 %v2824_v4 }
 0x58c   : > { %3195 = vmatpush1.bf16.msra.mxu1 %v2823_v32  ;;  %v6407_v31 = vpop.permute.xlu0 %2854 }
 0x58d   : > { %v2853_v45 = vpop.permute.xlu1 %2852 }
 0x58e   : > { %v2867_v36 = vsel %vm838_vm1, %v2853_v45, %v6407_v31  ;;  %v2866_v19 = vsel %vm838_vm1, %v2851_v53, %v2853_v45 }
 0x58f   : > { %3196 = vmatprep.subr.bf16.mxu1 %v2867_v36  ;;  %v6464_v36 = vld [vmem:[%s7211_s1] sm:$0xff] }
 0x590   : > { %3197 = vmatpush1.bf16.msra.mxu1 %v2866_v19  ;;  %v6412_v42 = vpop.permute.xlu0 %2909 }
 0x591   : > { %v2908_v57 = vpop.permute.xlu1 %2907 }
 0x592   : > { %v2924_v46 = vsel %vm908_vm4, %v2908_v57, %v6412_v42  ;;  %v2923_v1 = vsel %vm908_vm4, %v2906_v44, %v2908_v57 }
 0x593   : > { %3198 = vmatprep.subr.bf16.mxu1 %v2924_v46 }
 0x594   : > { %3199 = vmatpush1.bf16.msra.mxu1 %v2923_v1  ;;  %v6417_v2 = vpop.permute.xlu0 %2955 }
 0x595   : > { %v2954_v17 = vpop.permute.xlu1 %2953 }
 0x596   : > { %v2970_v5 = vsel %vm990_vm5, %v2954_v17, %v6417_v2  ;;  %v2969_v38 = vsel %vm990_vm5, %v2952_v30, %v2954_v17  ;;  %v4582_v30 = vld [vmem:[#allocation3 + $0x58] sm:$0xff] }
 0x597   : > { %3200 = vmatprep.subr.bf16.mxu1 %v2970_v5 }
 0x598   : > { %3201 = vmatpush1.bf16.msra.mxu1 %v2969_v38  ;;  %v6422_v18 = vpop.permute.xlu0 %3001 }
 0x599   : > { %v3000_v33 = vpop.permute.xlu1 %2999 }
 0x59a   : > { %v3016_v55 = vsel %vm7322_vm11, %v3000_v33, %v6422_v18  ;;  %v3015_v21 = vsel %vm7312_vm7, %v2998_v27, %v3000_v33  ;;  %vm7326_vm11 = vmmov %vm7312_vm7 }
 0x59b   : > { %3202 = vmatprep.subr.bf16.mxu1 %v3016_v55 }
 0x59c   : > { %3203 = vmatpush1.bf16.msra.mxu1 %v3015_v21  ;;  %v2687_v49 = vpop.permute.xlu0 %2686 }
 0x59d   : > { %v2685_v60 = vpop.permute.xlu1 %2684  ;;  %3272 = vmatprep.subr.bf16.mxu1 %v6005_v15 }
 0x59e   : > { %v2697_v14 = vsel %vm7313_vm0, %v2685_v60, %v2687_v49  ;;  %v2696_v48 = vsel %vm7323_vm15, %v2683_v12, %v2685_v60  ;;  %vm7327_vm0 = vmmov %vm7312_vm7 }
 0x59f   : > { %3219 = vmatmul.mubr.bf16.vlgmr.msra.gmra.mrb[36].mxu1 %v6338_v13  ;;  %3231 = vmatprep.subr.bf16.mxu0 %v2697_v14 }
 0x5a0   : > { %3232 = vmatpush1.bf16.msra.mxu0 %v2696_v48  ;;  %3273 = vmatpush1.bf16.msra.mxu1 %v6235_v51  ;;  %v2730_v53 = vpop.permute.xlu0 %2729 }
 0x5a1   : > { %v2728_v0 = vpop.permute.xlu1 %2727  ;;  %3274 = vmatprep.subr.bf16.mxu1 %v6005_v15  ;;  %4476 = vmatprep.mubr.msk.bf16.mxu1 %vm2193_vm13, %v6116_v50 }
 0x5a2   : > { %v2740_v7 = vsel %vm7315_vm2, %v2728_v0, %v2730_v53  ;;  %v2739_v9 = vsel %vm7324_vm3, %v2726_v22, %v2728_v0  ;;  %vm7331_vm3 = vmmov %vm7327_vm0 }
 0x5a3   : > { %3233 = vmatprep.subr.bf16.mxu0 %v2740_v7 }
 0x5a4   : > { %3234 = vmatpush1.bf16.msra.mxu0 %v2739_v9  ;;  %3275 = vmatpush1.bf16.msra.mxu1 %v2687_v49  ;;  %v2773_v44 = vpop.permute.xlu0 %2772 }
 0x5a5   : > { %v2771_v25 = vpop.permute.xlu1 %2770  ;;  %3276 = vmatprep.subr.bf16.mxu1 %v6005_v15 }
 0x5a6   : > { %v2783_v51 = vsel %vm706_vm9, %v2771_v25, %v2773_v44  ;;  %v2782_v62 = vsel %vm706_vm9, %v2769_v52, %v2771_v25 }
 0x5a7   : > { %3235 = vmatprep.subr.bf16.mxu0 %v2783_v51 }
 0x5a8   : > { %3236 = vmatpush1.bf16.msra.mxu0 %v2782_v62  ;;  %3277 = vmatpush1.bf16.msra.mxu1 %v2730_v53  ;;  %v2816_v59 = vpop.permute.xlu0 %2815 }
 0x5a9   : > { %v2814_v50 = vpop.permute.xlu1 %2813  ;;  %3278 = vmatprep.subr.bf16.mxu1 %v4582_v30 }
 0x5aa   : > { %v2826_v23 = vsel %vm7325_vm10, %v2814_v50, %v2816_v59  ;;  %v2825_v16 = vsel %vm7317_vm8, %v2812_v6, %v2814_v50 }
 0x5ab   : > { %3237 = vmatprep.subr.bf16.mxu0 %v2826_v23 }
 0x5ac   : > { %3238 = vmatpush1.bf16.msra.mxu0 %v2825_v16  ;;  %3279 = vmatpush1.bf16.msra.mxu1 %v2773_v44  ;;  %v2859_v40 = vpop.permute.xlu0 %2858  ;;  %v3354_v16 = vrot.slane %v6464_v36, %v5493_v43 }
 0x5ad   : > { %v2857_v15 = vpop.permute.xlu1 %2856  ;;  %3280 = vmatprep.subr.bf16.mxu1 %v4582_v30 }
 0x5ae   : > { %v2869_v27 = vsel %vm838_vm1, %v2857_v15, %v2859_v40  ;;  %v2868_v58 = vsel %vm838_vm1, %v6407_v31, %v2857_v15 }
 0x5af   : > { %3239 = vmatprep.subr.bf16.mxu0 %v2869_v27 }
 0x5b0   : > { %3240 = vmatpush1.bf16.msra.mxu0 %v2868_v58  ;;  %3281 = vmatpush1.bf16.msra.mxu1 %v2816_v59  ;;  %v2914_v3 = vpop.permute.xlu0 %2913  ;;  %v3350_v59 = vrot.slane %v6464_v36, %v5490_v47 }
 0x5b1   : > { %v2912_v39 = vpop.permute.xlu1 %2911  ;;  %3282 = vmatprep.subr.bf16.mxu1 %v4582_v30 }
 0x5b2   : > { %v2926_v12 = vsel %vm908_vm4, %v2912_v39, %v2914_v3  ;;  %v2925_v28 = vsel %vm908_vm4, %v6412_v42, %v2912_v39 }
 0x5b3   : > { %3241 = vmatprep.subr.bf16.mxu0 %v2926_v12 }
 0x5b4   : > { %3242 = vmatpush1.bf16.msra.mxu0 %v2925_v28  ;;  %3283 = vmatpush1.bf16.msra.mxu1 %v2859_v40  ;;  %v2960_v29 = vpop.permute.xlu0 %2959 }
 0x5b5   : > { %v2958_v34 = vpop.permute.xlu1 %2957  ;;  %3284 = vmatprep.subr.bf16.mxu1 %v4582_v30 }
 0x5b6   : > { %v2972_v22 = vsel %vm990_vm5, %v2958_v34, %v2960_v29  ;;  %v2971_v37 = vsel %vm990_vm5, %v6417_v2, %v2958_v34 }
 0x5b7   : > { %3243 = vmatprep.subr.bf16.mxu0 %v2972_v22 }
 0x5b8   : > { %3244 = vmatpush1.bf16.msra.mxu0 %v2971_v37  ;;  %v3006_v56 = vpop.permute.xlu0 %3005 }
 0x5b9   : > { %v3004_v11 = vpop.permute.xlu1 %3003 }
 0x5ba   : > { %v3018_v52 = vsel %vm7326_vm11, %v3004_v11, %v3006_v56  ;;  %v3017_v10 = vsel %vm7312_vm7, %v6422_v18, %v3004_v11  ;;  %v3346_v18 = vrot.slane %v6464_v36, %v5475_v35 }
 0x5bb   : > { %3245 = vmatprep.subr.bf16.mxu0 %v3018_v52  ;;  %v3358_v52 = vrot.slane %v6464_v36, %v5517_v8 }
 0x5bc   : > { %3246 = vmatpush1.bf16.msra.mxu0 %v3017_v10  ;;  %v2962_v6 = vpop.permute.xlu0 %2961 }
 0x5bd   : > { %v2916_v54 = vpop.permute.xlu1 %2915  ;;  %v2973_v63 = vsel %vm990_vm5, %v2960_v29, %v2962_v6  ;;  %v3362_v6 = vrot.slane %v6464_v36, %v5520_v41 }
 0x5be   : > { %v2927_v20 = vsel %vm908_vm4, %v2914_v3, %v2916_v54 }
 0x5bf   : > { %3285 = vmatpush1.bf16.msra.mxu1 %v2927_v20  ;;  %3262 = vmatmul.mubr.bf16.vlgmr.msra.gmra.mrb[24].mxu0 %v6338_v13 }
 0x5c0   : > { %3286 = vmatprep.subr.bf16.mxu1 %v4582_v30 }
 0x5c1   : > { %v3008_v4 = vpop.permute.xlu1 %3007 }
 0x5c2   : > { %v3019_v32 = vsel %vm7327_vm0, %v3006_v56, %v3008_v4 }
 0x5c3   : > { %3287 = vmatpush1.bf16.msra.mxu1 %v2973_v63 }
 0x5c4   : > { %3288 = vmatprep.subr.bf16.mxu1 %v4582_v30 }
 0x5c7   : > { %3289 = vmatpush1.bf16.msra.mxu1 %v3019_v32 }
 0x5ca   : > { %3305 = vmatmul.mubr.bf16.vlgmr.msra.gmra.mrb[40].mxu1 %v6338_v13  ;;  %v3342_v13 = vrot.slane %v6464_v36, %v5465_v61 }
 0x5cd   : > { %v6459_v31 = vpop.permute.xlu0 %3037 }
 0x5d2   : > { %v6467_v57 = vpop.permute.xlu1 %3042 }
 0x622   : > { %v3091_v45 = vpop.f32.mrb[16].mxu0 }
 0x623   : > { %v3092_v19 = vadd.f32 %v3091_v45, %v6459_v31  ;;  %v3093_v42 = vpop.f32.mrb[17].mxu0 }
 0x624   : > { %v3094_v46 = vadd.f32 %v3093_v42, %v6459_v31  ;;  %v3095_v1 = vpop.f32.mrb[18].mxu0 }
 0x625   : > { %v3313_v2 = vmax.f32 %v3092_v19, 0.0  ;;  %v3096_v17 = vadd.f32 %v3095_v1, %v6467_v57  ;;  %v3097_v5 = vpop.f32.mrb[19].mxu0 }
 0x626   : > { %v3314_v38 = vmax.f32 %v3094_v46, 0.0  ;;  %v3098_v33 = vadd.f32 %v3097_v5, %v6467_v57 }
 0x627   : > { %v3324_v55 = vmax.f32 %v3096_v17, 0.0  ;;  %v3394_v49 = vmul.f32 %v3342_v13, %v3313_v2 }
 0x628   : > { %v3325_v21 = vmax.f32 %v3098_v33, 0.0  ;;  %v3395_v14 = vmul.f32 %v3346_v18, %v3314_v38 }
 0x629   : > { %v3405_v60 = vmul.f32 %v3342_v13, %v3324_v55 }
 0x62a   : > { %v3406_v48 = vmul.f32 %v3346_v18, %v3325_v21  ;;  %v3366_v18 = vrot.slane %v6464_v36, %v5538_v26 }
 0x62b   : > { %v3416_v53 = vpack.c.bf16 %v3405_v60, %v3394_v49  ;;  %v3370_v49 = vrot.slane %v6464_v36, %v5541_v24 }
 0x62c   : > { %v3417_v0 = vpack.c.bf16 %v3406_v48, %v3395_v14 }
 0x62d   : > { %3438 = vrot.lane.b32.xlu0 %v3416_v53, %s4620_s29 }
 0x631   : > { %3440 = vrot.lane.b32.xlu0 %v3417_v0, %s4620_s29 }
 0x633   : > { %v3134_v7 = vpop.f32.mrb[32].mxu1 }
 0x634   : > { %v3135_v9 = vadd.f32 %v3134_v7, %v6459_v31  ;;  %v3136_v44 = vpop.f32.mrb[33].mxu1 }
 0x635   : > { %v3137_v25 = vadd.f32 %v3136_v44, %v6459_v31  ;;  %v3138_v51 = vpop.f32.mrb[34].mxu1 }
 0x636   : > { %v3315_v62 = vmax.f32 %v3135_v9, 0.0  ;;  %v3139_v50 = vadd.f32 %v3138_v51, %v6467_v57  ;;  %v3140_v30 = vpop.f32.mrb[35].mxu1  ;;  %v3336_v51 = vld [vmem:[%s7211_s1 + $0x8] sm:$0x7] }
 0x637   : > { %v3316_v23 = vmax.f32 %v3137_v25, 0.0  ;;  %v3141_v40 = vadd.f32 %v3140_v30, %v6467_v57  ;;  %v3374_v30 = vrot.slane %v3336_v51, %v5465_v61 }
 0x638   : > { %v3326_v15 = vmax.f32 %v3139_v50, 0.0  ;;  %v3396_v58 = vmul.f32 %v3350_v59, %v3315_v62 }
 0x639   : > { %v3327_v27 = vmax.f32 %v3141_v40, 0.0  ;;  %v3397_v39 = vmul.f32 %v3354_v16, %v3316_v23 }
 0x63a   : > { %v3407_v3 = vmul.f32 %v3350_v59, %v3326_v15  ;;  %v3378_v15 = vrot.slane %v3336_v51, %v5475_v35 }
 0x63b   : > { %v3408_v12 = vmul.f32 %v3354_v16, %v3327_v27 }
 0x63c   : > { %v3418_v28 = vpack.c.bf16 %v3407_v3, %v3396_v58 }
 0x63d   : > { %v3419_v29 = vpack.c.bf16 %v3408_v12, %v3397_v39 }
 0x63e   : > { %3442 = vrot.lane.b32.xlu1 %v3418_v28, %s4620_s29 }
 0x63f   : > { %3444 = vrot.lane.b32.xlu0 %v3419_v29, %s4620_s29 }
 0x652   : > { %v3177_v34 = vpop.f32.mrb[20].mxu0 }
 0x653   : > { %v3178_v22 = vadd.f32 %v3177_v34, %v6459_v31  ;;  %v3179_v37 = vpop.f32.mrb[21].mxu0 }
 0x654   : > { %v3180_v43 = vadd.f32 %v3179_v37, %v6459_v31  ;;  %v3181_v56 = vpop.f32.mrb[22].mxu0 }
 0x655   : > { %v3317_v11 = vmax.f32 %v3178_v22, 0.0  ;;  %v3182_v10 = vadd.f32 %v3181_v56, %v6467_v57  ;;  %v3183_v54 = vpop.f32.mrb[23].mxu0 }
 0x656   : > { %v3318_v20 = vmax.f32 %v3180_v43, 0.0  ;;  %v3184_v63 = vadd.f32 %v3183_v54, %v6467_v57 }
 0x657   : > { %v3328_v4 = vmax.f32 %v3182_v10, 0.0  ;;  %v3398_v45 = vmul.f32 %v3358_v52, %v3317_v11 }
 0x658   : > { %v3329_v32 = vmax.f32 %v3184_v63, 0.0  ;;  %v3399_v42 = vmul.f32 %v3362_v6, %v3318_v20 }
 0x659   : > { %v3409_v19 = vmul.f32 %v3358_v52, %v3328_v4  ;;  %v3382_v52 = vrot.slane %v3336_v51, %v5490_v47 }
 0x65a   : > { %v3410_v46 = vmul.f32 %v3362_v6, %v3329_v32 }
 0x65b   : > { %v3420_v1 = vpack.c.bf16 %v3409_v19, %v3398_v45 }
 0x65c   : > { %v3421_v2 = vpack.c.bf16 %v3410_v46, %v3399_v42 }
 0x65d   : > { %3446 = vrot.lane.b32.xlu1 %v3420_v1, %s4620_s29 }
 0x661   : > { %3448 = vrot.lane.b32.xlu1 %v3421_v2, %s4620_s29 }
 0x672   : > { %v3220_v8 = vpop.f32.mrb[36].mxu1 }
 0x673   : > { %v3221_v13 = vadd.f32 %v3220_v8, %v6459_v31  ;;  %v3222_v17 = vpop.f32.mrb[37].mxu1 }
 0x674   : > { %v3223_v41 = vadd.f32 %v3222_v17, %v6459_v31  ;;  %v3224_v5 = vpop.f32.mrb[38].mxu1 }
 0x675   : > { %v3319_v38 = vmax.f32 %v3221_v13, 0.0  ;;  %v3225_v33 = vadd.f32 %v3224_v5, %v6467_v57  ;;  %v3226_v55 = vpop.f32.mrb[39].mxu1 }
 0x676   : > { %v3320_v21 = vmax.f32 %v3223_v41, 0.0  ;;  %v3227_v60 = vadd.f32 %v3226_v55, %v6467_v57 }
 0x677   : > { %v3330_v14 = vmax.f32 %v3225_v33, 0.0  ;;  %v3400_v53 = vmul.f32 %v3366_v18, %v3319_v38 }
 0x678   : > { %v3331_v48 = vmax.f32 %v3227_v60, 0.0  ;;  %v3401_v7 = vmul.f32 %v3370_v49, %v3320_v21 }
 0x679   : > { %v3411_v0 = vmul.f32 %v3366_v18, %v3330_v14 }
 0x67a   : > { %v3412_v9 = vmul.f32 %v3370_v49, %v3331_v48 }
 0x67b   : > { %v3422_v44 = vpack.c.bf16 %v3411_v0, %v3400_v53 }
 0x67c   : > { %v3423_v25 = vpack.c.bf16 %v3412_v9, %v3401_v7 }
 0x67d   : > { %3450 = vrot.lane.b32.xlu0 %v3422_v44, %s4620_s29 }
 0x67e   : > { %3452 = vrot.lane.b32.xlu1 %v3423_v25, %s4620_s29 }
 0x692   : > { %v3263_v26 = vpop.f32.mrb[24].mxu0 }
 0x693   : > { %v3264_v24 = vadd.f32 %v3263_v26, %v6459_v31  ;;  %v3265_v36 = vpop.f32.mrb[25].mxu0 }
 0x694   : > { %v3266_v62 = vadd.f32 %v3265_v36, %v6459_v31  ;;  %v3267_v59 = vpop.f32.mrb[26].mxu0 }
 0x695   : > { %v3321_v50 = vmax.f32 %v3264_v24, 0.0  ;;  %v3268_v23 = vadd.f32 %v3267_v59, %v6467_v57  ;;  %v3269_v16 = vpop.f32.mrb[27].mxu0 }
 0x696   : > { %v3322_v40 = vmax.f32 %v3266_v62, 0.0  ;;  %v3270_v27 = vadd.f32 %v3269_v16, %v6467_v57 }
 0x697   : > { %v3332_v58 = vmax.f32 %v3268_v23, 0.0  ;;  %v3402_v39 = vmul.f32 %v3374_v30, %v3321_v50 }
 0x698   : > { %v3333_v3 = vmax.f32 %v3270_v27, 0.0  ;;  %v3403_v28 = vmul.f32 %v3378_v15, %v3322_v40 }
 0x699   : > { %v3413_v12 = vmul.f32 %v3374_v30, %v3332_v58 }
 0x69a   : > { %v3414_v29 = vmul.f32 %v3378_v15, %v3333_v3 }
 0x69b   : > { %v3424_v34 = vpack.c.bf16 %v3413_v12, %v3402_v39 }
 0x69c   : > { %v3425_v22 = vpack.c.bf16 %v3414_v29, %v3403_v28 }
 0x69d   : > { %v3306_v37 = vpop.f32.mrb[40].mxu1  ;;  %3454 = vrot.lane.b32.xlu0 %v3424_v34, %s4620_s29 }
 0x69e   : > { %v3307_v61 = vadd.f32 %v3306_v37, %v6459_v31  ;;  %v3308_v43 = vpop.f32.mrb[41].mxu1  ;;  %3456 = vrot.lane.b32.xlu1 %v3425_v22, %s4620_s29 }
 0x69f   : > { %v3309_v56 = vpop.f32.mrb[42].mxu1  ;;  %v3439_v35 = vpop.permute.xlu0 %3438 }
 0x6a0   : > { %v3323_v11 = vmax.f32 %v3307_v61, 0.0  ;;  %v3310_v10 = vadd.f32 %v3309_v56, %v6467_v57  ;;  %3481 = vst.msk [vmem:[#allocation3] sm:$0xff] %vm1758_vm12, %v3439_v35  ;;  %v3311_v54 = vpop.f32.mrb[43].mxu1  ;;  %vm3908_vm12 = vcmask 982016  }
 0x6a2   : > { %v3334_v20 = vmax.f32 %v3310_v10, 0.0  ;;  %v3404_v63 = vmul.f32 %v3382_v52, %v3323_v11 }
 0x6a3   : > { %v3441_v6 = vpop.permute.xlu0 %3440 }
 0x6a4   : > { %v3415_v4 = vmul.f32 %v3382_v52, %v3334_v20  ;;  %v3460_v32 = vsel %vm418_vm14, %v3439_v35, %v3441_v6 }
 0x6a5   : > { %3537 = vrot.lane.b32.xlu1 %v3460_v32, %s4608_s21 }
 0x6a6   : > { %v3426_v31 = vpack.c.bf16 %v3415_v4, %v3404_v63 }
 0x6a8   : > { %3458 = vrot.lane.b32.xlu0 %v3426_v31, %s4620_s29  ;;  %s4621_s29 = smov 120  }
 0x6a9   : > { %3563 = vrot.lane.b32.xlu1 %v3460_v32, %s4611_s24 }
 0x6ac   : > { %3511 = vrot.lane.b32.xlu0 %v3460_v32, %s4610_s23 }
 0x6ad   : > { %3589 = vrot.lane.b32.xlu1 %v3460_v32, %s4609_s22 }
 0x6b0   : > { %v3443_v47 = vpop.permute.xlu1 %3442  ;;  %3671 = vrot.lane.b32.xlu0 %v3460_v32, %s4614_s27 }
 0x6b1   : > { %v3461_v57 = vsel %vm418_vm14, %v3441_v6, %v3443_v47  ;;  %v3445_v45 = vpop.permute.xlu0 %3444  ;;  %3615 = vrot.lane.b32.xlu1 %v3460_v32, %s4612_s25 }
 0x6b2   : > { %v3462_v19 = vsel %vm418_vm14, %v3443_v47, %v3445_v45 }
 0x6b4   : > { %3700 = vrot.lane.b32.xlu0 %v3460_v32, %s4615_s28 }
 0x6b5   : > { %3642 = vrot.lane.b32.xlu1 %v3460_v32, %s4613_s26 }
 0x6b8   : > { %3539 = vrot.lane.b32.xlu0 %v3461_v57, %s4608_s21 }
 0x6b9   : > { %3746 = vrot.lane.b32.xlu1 %v3460_v32, %s4621_s29 }
 0x6bc   : > { %3565 = vrot.lane.b32.xlu0 %v3461_v57, %s4611_s24 }
 0x6bd   : > { %3513 = vrot.lane.b32.xlu1 %v3461_v57, %s4610_s23 }
 0x6c0   : > { %3591 = vrot.lane.b32.xlu0 %v3461_v57, %s4609_s22 }
 0x6c1   : > { %3673 = vrot.lane.b32.xlu1 %v3461_v57, %s4614_s27 }
 0x6c4   : > { %3617 = vrot.lane.b32.xlu0 %v3461_v57, %s4612_s25 }
 0x6c5   : > { %3702 = vrot.lane.b32.xlu1 %v3461_v57, %s4615_s28 }
 0x6c8   : > { %3644 = vrot.lane.b32.xlu0 %v3461_v57, %s4613_s26 }
 0x6c9   : > { %3748 = vrot.lane.b32.xlu1 %v3461_v57, %s4621_s29 }
 0x6cc   : > { %3515 = vrot.lane.b32.xlu0 %v3462_v19, %s4610_s23 }
 0x6cd   : > { %3541 = vrot.lane.b32.xlu1 %v3462_v19, %s4608_s21 }
 0x6cf   : > { %v3447_v42 = vpop.permute.xlu1 %3446 }
 0x6d0   : > { %v3463_v46 = vsel %vm418_vm14, %v3445_v45, %v3447_v42  ;;  %3675 = vrot.lane.b32.xlu0 %v3462_v19, %s4614_s27 }
 0x6d1   : > { %3567 = vrot.lane.b32.xlu1 %v3462_v19, %s4611_s24 }
 0x6d3   : > { %v3449_v1 = vpop.permute.xlu1 %3448 }
 0x6d4   : > { %v3464_v2 = vsel %vm418_vm14, %v3447_v42, %v3449_v1  ;;  %3704 = vrot.lane.b32.xlu0 %v3462_v19, %s4615_s28 }
 0x6d5   : > { %3593 = vrot.lane.b32.xlu1 %v3462_v19, %s4609_s22 }
 0x6d8   : > { %3750 = vrot.lane.b32.xlu0 %v3462_v19, %s4621_s29 }
 0x6d9   : > { %3619 = vrot.lane.b32.xlu1 %v3462_v19, %s4612_s25 }
 0x6dc   : > { %3543 = vrot.lane.b32.xlu0 %v3463_v46, %s4608_s21 }
 0x6dd   : > { %3646 = vrot.lane.b32.xlu1 %v3462_v19, %s4613_s26 }
 0x6e0   : > { %3569 = vrot.lane.b32.xlu0 %v3463_v46, %s4611_s24 }
 0x6e1   : > { %3517 = vrot.lane.b32.xlu1 %v3463_v46, %s4610_s23 }
 0x6e4   : > { %3595 = vrot.lane.b32.xlu0 %v3463_v46, %s4609_s22 }
 0x6e5   : > { %3677 = vrot.lane.b32.xlu1 %v3463_v46, %s4614_s27 }
 0x6e8   : > { %3621 = vrot.lane.b32.xlu0 %v3463_v46, %s4612_s25 }
 0x6e9   : > { %3706 = vrot.lane.b32.xlu1 %v3463_v46, %s4615_s28 }
 0x6ec   : > { %3648 = vrot.lane.b32.xlu0 %v3463_v46, %s4613_s26 }
 0x6ed   : > { %3519 = vrot.lane.b32.xlu1 %v3464_v2, %s4610_s23 }
 0x6ef   : > { %v3451_v8 = vpop.permute.xlu0 %3450 }
 0x6f0   : > { %3752 = vrot.lane.b32.xlu0 %v3463_v46, %s4621_s29  ;;  %v3465_v13 = vsel %vm418_vm14, %v3449_v1, %v3451_v8  ;;  %v3453_v17 = vpop.permute.xlu1 %3452 }
 0x6f1   : > { %v3466_v41 = vsel %vm418_vm14, %v3451_v8, %v3453_v17  ;;  %3545 = vrot.lane.b32.xlu1 %v3464_v2, %s4608_s21 }
 0x6f4   : > { %3679 = vrot.lane.b32.xlu0 %v3464_v2, %s4614_s27 }
 0x6f5   : > { %3571 = vrot.lane.b32.xlu1 %v3464_v2, %s4611_s24 }
 0x6f8   : > { %3521 = vrot.lane.b32.xlu0 %v3465_v13, %s4610_s23 }
 0x6f9   : > { %3597 = vrot.lane.b32.xlu1 %v3464_v2, %s4609_s22 }
 0x6fc   : > { %3547 = vrot.lane.b32.xlu0 %v3465_v13, %s4608_s21 }
 0x6fd   : > { %3623 = vrot.lane.b32.xlu1 %v3464_v2, %s4612_s25 }
 0x700   : > { %3573 = vrot.lane.b32.xlu0 %v3465_v13, %s4611_s24 }
 0x701   : > { %3650 = vrot.lane.b32.xlu1 %v3464_v2, %s4613_s26 }
 0x704   : > { %3599 = vrot.lane.b32.xlu0 %v3465_v13, %s4609_s22 }
 0x705   : > { %3708 = vrot.lane.b32.xlu1 %v3464_v2, %s4615_s28 }
 0x708   : > { %3625 = vrot.lane.b32.xlu0 %v3465_v13, %s4612_s25 }
 0x709   : > { %3754 = vrot.lane.b32.xlu1 %v3464_v2, %s4621_s29 }
 0x70c   : > { %3652 = vrot.lane.b32.xlu0 %v3465_v13, %s4613_s26 }
 0x70d   : > { %3681 = vrot.lane.b32.xlu1 %v3465_v13, %s4614_s27 }
 0x70f   : > { %v3455_v5 = vpop.permute.xlu0 %3454 }
 0x710   : > { %v6584_v38 = vsel %vm418_vm14, %v3453_v17, %v3455_v5  ;;  %v3457_v18 = vpop.permute.xlu1 %3456  ;;  %3710 = vrot.lane.b32.xlu0 %v3465_v13, %s4615_s28 }
 0x711   : > { %v6588_v33 = vsel %vm418_vm14, %v3455_v5, %v3457_v18  ;;  %3756 = vrot.lane.b32.xlu1 %v3465_v13, %s4621_s29 }
 0x714   : > { %3683 = vrot.lane.b32.xlu0 %v3466_v41, %s4614_s27 }
 0x715   : > { %3523 = vrot.lane.b32.xlu1 %v3466_v41, %s4610_s23 }
 0x717   : > { %v6593_v55 = vpop.permute.xlu1 %3537 }
 0x718   : > { %3758 = vrot.lane.b32.xlu0 %v3466_v41, %s4621_s29 }
 0x719   : > { %3549 = vrot.lane.b32.xlu1 %v3466_v41, %s4608_s21 }
 0x71a   : > { %v3459_v21 = vpop.permute.xlu0 %3458 }
 0x71b   : > { %v3469_v49 = vsel %vm418_vm14, %v3457_v18, %v3459_v21  ;;  %v3564_v60 = vpop.permute.xlu1 %3563  ;;  %vm7328_vm14 = vmmov %vm7323_vm15 }
 0x71c   : > { %3491 = vst.msk [vmem:[#allocation3 + $0x50] sm:$0xff] %vm1769_vm6, %v3469_v49  ;;  %3525 = vrot.lane.b32.xlu0 %v6584_v38, %s4610_s23  ;;  %vm7329_vm6 = vmmov %vm7317_vm8 }
 0x71d   : > { %3575 = vrot.lane.b32.xlu1 %v3466_v41, %s4611_s24  ;;  %vm7330_vm15 = vmmov %vm7315_vm2 }
 0x71e   : > { %v3512_v14 = vpop.permute.xlu0 %3511  ;;  %vm7332_vm10 = vmmov %vm7328_vm14 }
 0x71f   : > { %v3590_v48 = vpop.permute.xlu1 %3589  ;;  %vm7333_vm8 = vmmov %vm7332_vm10 }
 0x720   : > { %3551 = vrot.lane.b32.xlu0 %v6584_v38, %s4608_s21  ;;  %vm7334_vm11 = vmmov %vm7329_vm6 }
 0x721   : > { %3601 = vrot.lane.b32.xlu1 %v3466_v41, %s4609_s22  ;;  %vm7335_vm7 = vmmov %vm7329_vm6 }
 0x722   : > { %v6605_v53 = vpop.permute.xlu0 %3671 }
 0x723   : > { %v3616_v0 = vpop.permute.xlu1 %3615  ;;  %v3501_v59 = vld [vmem:[#allocation3 + $0x50] sm:$0xff] }
 0x724   : > { %3577 = vrot.lane.b32.xlu0 %v6584_v38, %s4611_s24 }
 0x725   : > { %3627 = vrot.lane.b32.xlu1 %v3466_v41, %s4612_s25 }
 0x726   : > { %v6610_v7 = vpop.permute.xlu0 %3700 }
 0x727   : > { %v3643_v9 = vpop.permute.xlu1 %3642 }
 0x728   : > { %3603 = vrot.lane.b32.xlu0 %v6584_v38, %s4609_s22 }
 0x729   : > { %3654 = vrot.lane.b32.xlu1 %v3466_v41, %s4613_s26 }
 0x72a   : > { %v3540_v44 = vpop.permute.xlu0 %3539 }
 0x72b   : > { %v3747_v25 = vpop.permute.xlu1 %3746  ;;  %v3555_v10 = vsel %vm7330_vm15, %v6593_v55, %v3540_v44  ;;  %vm7338_vm15 = vmmov %vm7315_vm2 }
 0x72c   : > { %3629 = vrot.lane.b32.xlu0 %v6584_v38, %s4612_s25 }
 0x72d   : > { %3712 = vrot.lane.b32.xlu1 %v3466_v41, %s4615_s28 }
 0x72e   : > { %v6618_v26 = vpop.permute.xlu0 %3565 }
 0x72f   : > { %v6620_v51 = vpop.permute.xlu1 %3513  ;;  %v3581_v39 = vsel %vm706_vm9, %v3564_v60, %v6618_v26 }
 0x730   : > { %3656 = vrot.lane.b32.xlu0 %v6584_v38, %s4613_s26  ;;  %v3529_v27 = vsel %vm7328_vm14, %v3512_v14, %v6620_v51  ;;  %vm7336_vm14 = vmmov %vm7327_vm0 }
 0x731   : > { %3685 = vrot.lane.b32.xlu1 %v6584_v38, %s4614_s27 }
 0x732   : > { %v6626_v24 = vpop.permute.xlu0 %3591 }
 0x733   : > { %v6628_v36 = vpop.permute.xlu1 %3673  ;;  %v3607_v34 = vsel %vm7329_vm6, %v3590_v48, %v6626_v24  ;;  %vm7337_vm6 = vmmov %vm7333_vm8 }
 0x734   : > { %3714 = vrot.lane.b32.xlu0 %v6584_v38, %s4615_s28  ;;  %v3691_v20 = vsel %vm990_vm5, %v6605_v53, %v6628_v36 }
 0x735   : > { %3527 = vrot.lane.b32.xlu1 %v6588_v33, %s4610_s23 }
 0x736   : > { %v6634_v62 = vpop.permute.xlu0 %3617 }
 0x737   : > { %v6636_v50 = vpop.permute.xlu1 %3702  ;;  %v3633_v43 = vsel %vm838_vm1, %v3616_v0, %v6634_v62 }
 0x738   : > { %3660 = vrot.lane.b32.xlu0 %v3501_v59, %s4613_s26  ;;  %v3720_v32 = vsel %vm7331_vm3, %v6610_v7, %v6636_v50  ;;  %vm7339_vm3 = vmmov %vm7337_vm6 }
 0x739   : > { %3553 = vrot.lane.b32.xlu1 %v6588_v33, %s4608_s21 }
 0x73a   : > { %v6641_v30 = vpop.permute.xlu0 %3644 }
 0x73b   : > { %v3749_v23 = vpop.permute.xlu1 %3748  ;;  %v3662_v11 = vsel %vm908_vm4, %v3643_v9, %v6641_v30 }
 0x73c   : > { %3689 = vrot.lane.b32.xlu0 %v3501_v59, %s4614_s27  ;;  %v3909_v37 = vsel %vm3908_vm12, %v3747_v25, %v3749_v23 }
 0x73d   : > { %3579 = vrot.lane.b32.xlu1 %v6588_v33, %s4611_s24 }
 0x73e   : > { %v3516_v16 = vpop.permute.xlu0 %3515 }
 0x73f   : > { %v6646_v40 = vpop.permute.xlu1 %3541  ;;  %v3530_v45 = vsel %vm7333_vm8, %v6620_v51, %v3516_v16  ;;  %vm7341_vm8 = vmmov %vm7335_vm7 }
 0x740   : > { %3718 = vrot.lane.b32.xlu0 %v3501_v59, %s4615_s28  ;;  %v3556_v63 = vsel %vm7315_vm2, %v3540_v44, %v6646_v40 }
 0x741   : > { %3605 = vrot.lane.b32.xlu1 %v6588_v33, %s4609_s22 }
 0x742   : > { %v6651_v15 = vpop.permute.xlu0 %3675 }
 0x743   : > { %v3568_v58 = vpop.permute.xlu1 %3567  ;;  %v3692_v7 = vsel %vm990_vm5, %v6628_v36, %v6651_v15 }
 0x744   : > { %3764 = vrot.lane.b32.xlu0 %v3529_v27, %s4621_s29  ;;  %v3582_v1 = vsel %vm706_vm9, %v6618_v26, %v3568_v58 }
 0x745   : > { %3631 = vrot.lane.b32.xlu1 %v6588_v33, %s4612_s25  ;;  %s4622_s25 = smov 85  }
 0x746   : > { %v6658_v3 = vpop.permute.xlu0 %3704 }
 0x747   : > { %v3594_v12 = vpop.permute.xlu1 %3593  ;;  %v3721_v26 = vsel %vm7336_vm14, %v6636_v50, %v6658_v3 }
 0x748   : > { %3800 = vrot.lane.b32.xlu0 %v3581_v39, %s4621_s29  ;;  %v3608_v17 = vsel %vm7335_vm7, %v6626_v24, %v3594_v12 }
 0x749   : > { %3658 = vrot.lane.b32.xlu1 %v6588_v33, %s4613_s26  ;;  %s4497_s26 = smul.u32 36, %s7362_s13 }
 0x74a   : > { %v6665_v28 = vpop.permute.xlu0 %3750 }
 0x74b   : > { %v3910_v29 = vsel %vm3908_vm12, %v3749_v23, %v6665_v28  ;;  %v3620_v22 = vpop.permute.xlu1 %3619  ;;  %s7188_s19 = scalar_lea.vmem %s7220_s10, %s4497_s26 }
 0x74c   : > { %4065 = vmatprep.subr.bf16.mxu0 %v3910_v29  ;;  %3818 = vrot.lane.b32.xlu0 %v3607_v34, %s4621_s29  ;;  %v3634_v55 = vsel %vm838_vm1, %v6634_v62, %v3620_v22 }
 0x74d   : > { %4066 = vmatpush1.bf16.msra.mxu0 %v3909_v37  ;;  %3687 = vrot.lane.b32.xlu1 %v6588_v33, %s4614_s27  ;;  %v6814_v37 = vld.sshfl [vmem:[%s7218_s8] sm:$0x33 pattern:$0x76325410] }
 0x74e   : > { %v6675_v61 = vpop.permute.xlu0 %3543 }
 0x74f   : > { %v3647_v56 = vpop.permute.xlu1 %3646  ;;  %v3557_v62 = vsel %vm7338_vm15, %v6646_v40, %v6675_v61 }
 0x750   : > { %3836 = vrot.lane.b32.xlu0 %v3633_v43, %s4621_s29  ;;  %v3663_v14 = vsel %vm908_vm4, %v6641_v30, %v3647_v56  ;;  %v6820_v43 = vcombine.high %v6814_v37, %v6814_v37 }
 0x751   : > { %3716 = vrot.lane.b32.xlu1 %v6588_v33, %s4615_s28 }
 0x752   : > { %v6682_v35 = vpop.permute.xlu0 %3569  ;;  %4478 = vmatprep.mubr.msk.bf16.mxu0 %vm2193_vm13, %v6820_v43  ;;  %4479 = vmatprep.mubr.msk.bf16.mxu1 %vm2193_vm13, %v6820_v43 }
 0x753   : > { %v3518_v52 = vpop.permute.xlu1 %3517  ;;  %v3583_v42 = vsel %vm706_vm9, %v3568_v58, %v6682_v35 }
 0x754   : > { %3854 = vrot.lane.b32.xlu0 %v3662_v11, %s4621_s29  ;;  %v3531_v47 = vsel %vm7332_vm10, %v3516_v16, %v3518_v52  ;;  %vm7340_vm10 = vmmov %vm7315_vm2 }
 0x755   : > { %3782 = vrot.lane.b32.xlu1 %v3555_v10, %s4621_s29 }
 0x756   : > { %v6690_v54 = vpop.permute.xlu0 %3595 }
 0x757   : > { %v6695_v6 = vpop.permute.xlu1 %3677  ;;  %v3609_v8 = vsel %vm7334_vm11, %v3594_v12, %v6690_v54  ;;  %vm7342_vm11 = vmmov %vm7335_vm7 }
 0x758   : > { %3872 = vrot.lane.b32.xlu0 %v3691_v20, %s4621_s29  ;;  %v3693_v53 = vsel %vm990_vm5, %v6651_v15, %v6695_v6  ;;  %vm7343_vm7 = vmmov %vm7327_vm0 }
 0x759   : > { %3784 = vrot.lane.b32.xlu1 %v3556_v63, %s4621_s29  ;;  %vm7345_vm14 = vmmov %vm7343_vm7 }
 0x75a   : > { %v6701_v4 = vpop.permute.xlu0 %3621 }
 0x75b   : > { %v6706_v31 = vpop.permute.xlu1 %3706  ;;  %v3635_v5 = vsel %vm838_vm1, %v3620_v22, %v6701_v4 }
 0x75c   : > { %3890 = vrot.lane.b32.xlu0 %v3720_v32, %s4621_s29  ;;  %v3722_v44 = vsel %vm7327_vm0, %v6658_v3, %v6706_v31  ;;  %vm7344_vm0 = vmmov %vm7339_vm3 }
 0x75d   : > { %3768 = vrot.lane.b32.xlu1 %v3531_v47, %s4621_s29  ;;  %vm7347_vm15 = vmmov %vm7344_vm0 }
 0x75e   : > { %v6711_v57 = vpop.permute.xlu0 %3648 }
 0x75f   : > { %v3520_v19 = vpop.permute.xlu1 %3519  ;;  %v3664_v49 = vsel %vm908_vm4, %v3647_v56, %v6711_v57 }
 0x760   : > { %3766 = vrot.lane.b32.xlu0 %v3530_v45, %s4621_s29  ;;  %v3532_v24 = vsel %vm7337_vm6, %v3518_v52, %v3520_v19  ;;  %vm7346_vm6 = vmmov %vm7315_vm2 }
 0x761   : > { %3804 = vrot.lane.b32.xlu1 %v3583_v42, %s4621_s29 }
 0x762   : > { %v3753_v46 = vpop.permute.xlu0 %3752 }
 0x763   : > { %v3546_v2 = vpop.permute.xlu1 %3545  ;;  %v3911_v23 = vsel %vm3908_vm12, %v6665_v28, %v3753_v46 }
 0x764   : > { %3802 = vrot.lane.b32.xlu0 %v3582_v1, %s4621_s29  ;;  %v3558_v50 = vsel %vm7315_vm2, %v6675_v61, %v3546_v2 }
 0x765   : > { %3822 = vrot.lane.b32.xlu1 %v3609_v8, %s4621_s29 }
 0x766   : > { %v6725_v13 = vpop.permute.xlu0 %3679 }
 0x767   : > { %v3572_v41 = vpop.permute.xlu1 %3571  ;;  %v3694_v20 = vsel %vm990_vm5, %v6695_v6, %v6725_v13 }
 0x768   : > { %3820 = vrot.lane.b32.xlu0 %v3608_v17, %s4621_s29  ;;  %v3584_v27 = vsel %vm706_vm9, %v6682_v35, %v3572_v41 }
 0x769   : > { %3840 = vrot.lane.b32.xlu1 %v3635_v5, %s4621_s29 }
 0x76a   : > { %v6733_v18 = vpop.permute.xlu0 %3521 }
 0x76b   : > { %v3598_v21 = vpop.permute.xlu1 %3597  ;;  %v3533_v40 = vsel %vm7339_vm3, %v3520_v19, %v6733_v18  ;;  %vm7348_vm3 = vmmov %vm7341_vm8 }
 0x76c   : > { %3838 = vrot.lane.b32.xlu0 %v3634_v55, %s4621_s29  ;;  %v3610_v12 = vsel %vm7341_vm8, %v6690_v54, %v3598_v21  ;;  %vm7350_vm8 = vmmov %vm7343_vm7 }
 0x76d   : > { %3858 = vrot.lane.b32.xlu1 %v3664_v49, %s4621_s29 }
 0x76e   : > { %v6741_v60 = vpop.permute.xlu0 %3547 }
 0x76f   : > { %v3624_v48 = vpop.permute.xlu1 %3623  ;;  %v3559_v3 = vsel %vm7340_vm10, %v3546_v2, %v6741_v60  ;;  %vm7349_vm10 = vmmov %vm7348_vm3 }
 0x770   : > { %3856 = vrot.lane.b32.xlu0 %v3663_v14, %s4621_s29  ;;  %v3636_v22 = vsel %vm838_vm1, %v6701_v4, %v3624_v48 }
 0x771   : > { %3876 = vrot.lane.b32.xlu1 %v3693_v53, %s4621_s29 }
 0x772   : > { %v6750_v0 = vpop.permute.xlu0 %3573 }
 0x773   : > { %v3651_v9 = vpop.permute.xlu1 %3650  ;;  %v3585_v29 = vsel %vm706_vm9, %v3572_v41, %v6750_v0 }
 0x774   : > { %3874 = vrot.lane.b32.xlu0 %v3692_v7, %s4621_s29  ;;  %v3665_v11 = vsel %vm908_vm4, %v6711_v57, %v3651_v9 }
 0x775   : > { %3894 = vrot.lane.b32.xlu1 %v3722_v44, %s4621_s29 }
 0x776   : > { %v6760_v25 = vpop.permute.xlu0 %3599 }
 0x777   : > { %v3709_v51 = vpop.permute.xlu1 %3708  ;;  %v3611_v56 = vsel %vm7342_vm11, %v3598_v21, %v6760_v25  ;;  %vm7351_vm11 = vmmov %vm7343_vm7 }
 0x778   : > { %3892 = vrot.lane.b32.xlu0 %v3721_v26, %s4621_s29  ;;  %v3723_v47 = vsel %vm7343_vm7, %v6706_v31, %v3709_v51  ;;  %vm7352_vm7 = vmmov %vm7344_vm0 }
 0x779   : > { %3770 = vrot.lane.b32.xlu1 %v3532_v24, %s4621_s29 }
 0x77a   : > { %v6768_v36 = vpop.permute.xlu0 %3625 }
 0x77b   : > { %v6773_v59 = vpop.permute.xlu1 %3754  ;;  %v3637_v10 = vsel %vm838_vm1, %v3624_v48, %v6768_v36 }
 0x77c   : > { %3786 = vrot.lane.b32.xlu0 %v3557_v62, %s4621_s29  ;;  %v3912_v30 = vsel %vm3908_vm12, %v3753_v46, %v6773_v59 }
 0x77d   : > { %3788 = vrot.lane.b32.xlu1 %v3558_v50, %s4621_s29  ;;  %4106 = vmatprep.subr.bf16.mxu1 %v3912_v30 }
 0x77e   : > { %v6783_v16 = vpop.permute.xlu0 %3652  ;;  %4107 = vmatpush1.bf16.msra.mxu1 %v3911_v23 }
 0x77f   : > { %v6787_v15 = vpop.permute.xlu1 %3681  ;;  %v3666_v4 = vsel %vm908_vm4, %v3651_v9, %v6783_v16 }
 0x780   : > { %3772 = vrot.lane.b32.xlu0 %v3533_v40, %s4621_s29  ;;  %v3695_v6 = vsel %vm990_vm5, %v6725_v13, %v6787_v15 }
 0x781   : > { %3806 = vrot.lane.b32.xlu1 %v3584_v27, %s4621_s29 }
 0x782   : > { %v6793_v58 = vpop.permute.xlu0 %3710 }
 0x783   : > { %v6797_v39 = vpop.permute.xlu1 %3756  ;;  %v3724_v31 = vsel %vm7345_vm14, %v3709_v51, %v6793_v58  ;;  %vm7354_vm14 = vmmov %vm7348_vm3 }
 0x784   : > { %3790 = vrot.lane.b32.xlu0 %v3559_v3, %s4621_s29 }
 0x785   : > { %3824 = vrot.lane.b32.xlu1 %v3610_v12, %s4621_s29 }
 0x786   : > { %v6803_v28 = vpop.permute.xlu0 %3683 }
 0x787   : > { %v3524_v34 = vpop.permute.xlu1 %3523  ;;  %v3696_v26 = vsel %vm990_vm5, %v6787_v15, %v6803_v28 }
 0x788   : > { %3808 = vrot.lane.b32.xlu0 %v3585_v29, %s4621_s29  ;;  %v3534_v19 = vsel %vm7344_vm0, %v6733_v18, %v3524_v34  ;;  %vm7353_vm0 = vmmov %vm7315_vm2 }
 0x789   : > { %3842 = vrot.lane.b32.xlu1 %v3636_v22, %s4621_s29 }
 0x78a   : > { %v6816_v61 = vpop.permute.xlu0 %3758 }
 0x78b   : > { %v3550_v35 = vpop.permute.xlu1 %3549 }
 0x78c   : > { %3826 = vrot.lane.b32.xlu0 %v3611_v56, %s4621_s29  ;;  %v3560_v1 = vsel %vm7346_vm6, %v6741_v60, %v3550_v35 }
 0x78d   : > { %3860 = vrot.lane.b32.xlu1 %v3665_v11, %s4621_s29 }
 0x78e   : > { %v6832_v52 = vpop.permute.xlu0 %3525 }
 0x78f   : > { %v3576_v54 = vpop.permute.xlu1 %3575  ;;  %v3535_v8 = vsel %vm7347_vm15, %v3524_v34, %v6832_v52 }
 0x790   : > { %3844 = vrot.lane.b32.xlu0 %v3637_v10, %s4621_s29  ;;  %v3586_v17 = vsel %vm706_vm9, %v6750_v0, %v3576_v54 }
 0x791   : > { %3878 = vrot.lane.b32.xlu1 %v3694_v20, %s4621_s29 }
 0x792   : > { %v6841_v63 = vpop.permute.xlu0 %3551 }
 0x793   : > { %v3602_v32 = vpop.permute.xlu1 %3601  ;;  %v3561_v5 = vsel %vm7315_vm2, %v3550_v35, %v6841_v63 }
 0x794   : > { %3862 = vrot.lane.b32.xlu0 %v3666_v4, %s4621_s29  ;;  %v3612_v55 = vsel %vm7348_vm3, %v6760_v25, %v3602_v32 }
 0x795   : > { %3896 = vrot.lane.b32.xlu1 %v3723_v47, %s4621_s29 }
 0x796   : > { %v6849_v57 = vpop.permute.xlu0 %3577 }
 0x797   : > { %v3628_v45 = vpop.permute.xlu1 %3627  ;;  %v3587_v49 = vsel %vm706_vm9, %v3576_v54, %v6849_v57 }
 0x798   : > { %3880 = vrot.lane.b32.xlu0 %v3695_v6, %s4621_s29  ;;  %v3638_v14 = vsel %vm838_vm1, %v6768_v36, %v3628_v45 }
 0x799   : > { %3774 = vrot.lane.b32.xlu1 %v3534_v19, %s4621_s29 }
 0x79a   : > { %v6858_v42 = vpop.permute.xlu0 %3603 }
 0x79b   : > { %v3655_v46 = vpop.permute.xlu1 %3654  ;;  %v3613_v53 = vsel %vm7349_vm10, %v3602_v32, %v6858_v42 }
 0x79c   : > { %3898 = vrot.lane.b32.xlu0 %v3724_v31, %s4621_s29  ;;  %v3667_v7 = vsel %vm908_vm4, %v6783_v16, %v3655_v46  ;;  %v3730_v31 = vld [vmem:[%s7219_s9] sm:$0x7] }
 0x79d   : > { %3792 = vrot.lane.b32.xlu1 %v3560_v1, %s4621_s29 }
 0x79e   : > { %v6866_v2 = vpop.permute.xlu0 %3629 }
 0x79f   : > { %v3713_v13 = vpop.permute.xlu1 %3712  ;;  %v3639_v44 = vsel %vm838_vm1, %v3628_v45, %v6866_v2 }
 0x7a0   : > { %3776 = vrot.lane.b32.xlu0 %v3535_v8, %s4621_s29  ;;  %v3725_v62 = vsel %vm7350_vm8, %v6793_v58, %v3713_v13 }
 0x7a1   : > { %3810 = vrot.lane.b32.xlu1 %v3586_v17, %s4621_s29 }
 0x7a2   : > { %v6874_v41 = vpop.permute.xlu0 %3656 }
 0x7a3   : > { %v6878_v18 = vpop.permute.xlu1 %3685  ;;  %v3668_v24 = vsel %vm908_vm4, %v3655_v46, %v6874_v41 }
 0x7a4   : > { %3794 = vrot.lane.b32.xlu0 %v3561_v5, %s4621_s29  ;;  %v3697_v30 = vsel %vm990_vm5, %v6803_v28, %v6878_v18  ;;  %v4270_v5 = vld [vmem:[#allocation2 + $0xc] sm:$0x77] }
 0x7a5   : > { %3828 = vrot.lane.b32.xlu1 %v3612_v55, %s4621_s29 }
 0x7a6   : > { %v6884_v21 = vpop.permute.xlu0 %3714 }
 0x7a7   : > { %v3528_v60 = vpop.permute.xlu1 %3527  ;;  %v3726_v40 = vsel %vm7351_vm11, %v3713_v13, %v6884_v21 }
 0x7a8   : > { %3812 = vrot.lane.b32.xlu0 %v3587_v49, %s4621_s29  ;;  %v3536_v27 = vsel %vm7352_vm7, %v6832_v52, %v3528_v60  ;;  %v4271_v49 = vld [vmem:[#allocation2 + $0x14] sm:$0x77] }
 0x7a9   : > { %3846 = vrot.lane.b32.xlu1 %v3638_v14, %s4621_s29 }
 0x7aa   : > { %v6892_v48 = vpop.permute.xlu0 %3660 }
 0x7ab   : > { %v3554_v0 = vpop.permute.xlu1 %3553 }
 0x7ac   : > { %3830 = vrot.lane.b32.xlu0 %v3613_v53, %s4621_s29  ;;  %v3562_v12 = vsel %vm7353_vm0, %v6841_v63, %v3554_v0  ;;  %v4272_v53 = vld [vmem:[#allocation2 + $0x1c] sm:$0x77] }
 0x7ad   : > { %3864 = vrot.lane.b32.xlu1 %v3667_v7, %s4621_s29 }
 0x7ae   : > { %v6900_v9 = vpop.permute.xlu0 %3689 }
 0x7af   : > { %v3580_v25 = vpop.permute.xlu1 %3579 }
 0x7b0   : > { %3848 = vrot.lane.b32.xlu0 %v3639_v44, %s4621_s29  ;;  %v3588_v29 = vsel %vm706_vm9, %v6849_v57, %v3580_v25  ;;  %vm7355_vm9 = vmmov %vm7350_vm8 }
 0x7b1   : > { %3882 = vrot.lane.b32.xlu1 %v3696_v26, %s4621_s29 }
 0x7b2   : > { %v6909_v51 = vpop.permute.xlu0 %3718 }
 0x7b3   : > { %v3606_v36 = vpop.permute.xlu1 %3605 }
 0x7b4   : > { %3866 = vrot.lane.b32.xlu0 %v3668_v24, %s4621_s29  ;;  %v3614_v56 = vsel %vm7354_vm14, %v6858_v42, %v3606_v36 }
 0x7b5   : > { %3900 = vrot.lane.b32.xlu1 %v3725_v62, %s4621_s29 }
 0x7b6   : > { %v3765_v50 = vpop.permute.xlu0 %3764 }
 0x7b7   : > { %v3632_v23 = vpop.permute.xlu1 %3631 }
 0x7b8   : > { %3884 = vrot.lane.b32.xlu0 %v3697_v30, %s4621_s29  ;;  %v3640_v11 = vsel %vm838_vm1, %v6866_v2, %v3632_v23  ;;  %v4269_v2 = vld [vmem:[#allocation2 + $0x4] sm:$0x77]  ;;  %vm7356_vm1 = vmmov %vm7350_vm8 }
 0x7b9   : > { %3760 = vrot.lane.b32.xlu1 %v6584_v38, %s4621_s29  ;;  %v4279_v8 = vcombine.high %v4269_v2, %v4269_v2 }
 0x7ba   : > { %v6923_v16 = vpop.permute.xlu0 %3800 }
 0x7bb   : > { %v3659_v15 = vpop.permute.xlu1 %3658 }
 0x7bc   : > { %3902 = vrot.lane.b32.xlu0 %v3726_v40, %s4621_s29  ;;  %v3669_v54 = vsel %vm908_vm4, %v6874_v41, %v3659_v15  ;;  %v3670_v6 = vsel %vm908_vm4, %v3659_v15, %v6892_v48  ;;  %vm4301_vm4 = vcmask 695296  }
 0x7bd   : > { %3778 = vrot.lane.b32.xlu1 %v3536_v27, %s4621_s29 }
 0x7be   : > { %v6931_v58 = vpop.permute.xlu0 %3818 }
 0x7bf   : > { %v3688_v3 = vpop.permute.xlu1 %3687 }
 0x7c0   : > { %3762 = vrot.lane.b32.xlu0 %v6588_v33, %s4621_s29  ;;  %v3698_v47 = vsel %vm990_vm5, %v6878_v18, %v3688_v3  ;;  %v3699_v46 = vsel %vm990_vm5, %v3688_v3, %v6900_v9  ;;  %v4280_v18 = vcombine.high %v4270_v5, %v4270_v5  ;;  %vm4348_vm5 = vcmask 518144  }
 0x7c1   : > { %3796 = vrot.lane.b32.xlu1 %v3562_v12, %s4621_s29 }
 0x7c2   : > { %v6938_v38 = vpop.permute.xlu0 %3836 }
 0x7c3   : > { %v3717_v28 = vpop.permute.xlu1 %3716 }
 0x7c4   : > { %3780 = vrot.lane.b32.xlu0 %v3528_v60, %s4621_s29  ;;  %v3727_v19 = vsel %vm7355_vm9, %v6884_v21, %v3717_v28  ;;  %v3728_v17 = vsel %vm7356_vm1, %v3717_v28, %v6909_v51  ;;  %v4281_v60 = vcombine.high %v4271_v49, %v4271_v49 }
 0x7c5   : > { %3814 = vrot.lane.b32.xlu1 %v3588_v29, %s4621_s29 }
 0x7c6   : > { %v6944_v34 = vpop.permute.xlu0 %3854 }
 0x7c7   : > { %v6946_v22 = vpop.permute.xlu1 %3782 }
 0x7c8   : > { %3798 = vrot.lane.b32.xlu0 %v3554_v0, %s4621_s29  ;;  %v4282_v0 = vcombine.high %v4272_v53, %v4272_v53 }
 0x7c9   : > { %3832 = vrot.lane.b32.xlu1 %v3614_v56, %s4621_s29 }
 0x7ca   : > { %v6952_v33 = vpop.permute.xlu0 %3872 }
 0x7cb   : > { %v3785_v35 = vpop.permute.xlu1 %3784 }
 0x7cc   : > { %3816 = vrot.lane.b32.xlu0 %v3580_v25, %s4621_s29  ;;  %v3925_v51 = vsel %vm3908_vm12, %v6946_v22, %v3785_v35 }
 0x7cd   : > { %3850 = vrot.lane.b32.xlu1 %v3640_v11, %s4621_s29 }
 0x7ce   : > { %v6958_v52 = vpop.permute.xlu0 %3890 }
 0x7cf   : > { %v6960_v10 = vpop.permute.xlu1 %3768 }
 0x7d0   : > { %3834 = vrot.lane.b32.xlu0 %v3606_v36, %s4621_s29  ;;  %v4273_v36 = vld [vmem:[#allocation2 + $0x24] sm:$0x7] }
 0x7d1   : > { %3868 = vrot.lane.b32.xlu1 %v3669_v54, %s4621_s29 }
 0x7d2   : > { %v3767_v20 = vpop.permute.xlu0 %3766 }
 0x7d3   : > { %v3917_v63 = vsel %vm3908_vm12, %v3765_v50, %v3767_v20  ;;  %v3918_v4 = vsel %vm3908_vm12, %v3767_v20, %v6960_v10  ;;  %v6969_v32 = vpop.permute.xlu1 %3804 }
 0x7d4   : > { %3852 = vrot.lane.b32.xlu0 %v3632_v23, %s4621_s29  ;;  %4067 = vmatprep.subr.bf16.mxu0 %v3918_v4 }
 0x7d5   : > { %4068 = vmatpush1.bf16.msra.mxu0 %v3917_v63  ;;  %3886 = vrot.lane.b32.xlu1 %v3698_v47, %s4621_s29 }
 0x7d6   : > { %v3803_v57 = vpop.permute.xlu0 %3802 }
 0x7d7   : > { %v6977_v45 = vpop.permute.xlu1 %3822  ;;  %v3934_v24 = vsel %vm3908_vm12, %v3803_v57, %v6969_v32  ;;  %v3933_v23 = vsel %vm3908_vm12, %v6923_v16, %v3803_v57 }
 0x7d8   : > { %3870 = vrot.lane.b32.xlu0 %v3670_v6, %s4621_s29 }
 0x7d9   : > { %3904 = vrot.lane.b32.xlu1 %v3727_v19, %s4621_s29 }
 0x7da   : > { %v3821_v42 = vpop.permute.xlu0 %3820 }
 0x7db   : > { %v6988_v1 = vpop.permute.xlu1 %3840  ;;  %v3942_v15 = vsel %vm3908_vm12, %v3821_v42, %v6977_v45  ;;  %v3941_v16 = vsel %vm3908_vm12, %v6931_v58, %v3821_v42 }
 0x7dc   : > { %3888 = vrot.lane.b32.xlu0 %v3699_v46, %s4621_s29 }
 0x7dd   : > { %3733 = vperm.xlu1 %4562, %v3730_v31  }
 0x7de   : > { %v3839_v13 = vpop.permute.xlu0 %3838 }
 0x7df   : > { %v6993_v41 = vpop.permute.xlu1 %3858  ;;  %v3950_v29 = vsel %vm3908_vm12, %v3839_v13, %v6988_v1  ;;  %v3949_v11 = vsel %vm3908_vm12, %v6938_v38, %v3839_v13 }
 0x7e0   : > { %3906 = vrot.lane.b32.xlu0 %v3728_v17, %s4621_s29 }
 0x7e1   : > { %4285 = vrot.lane.b32.xlu1 %v4279_v8, %s4622_s25 }
 0x7e2   : > { %v3857_v55 = vpop.permute.xlu0 %3856 }
 0x7e3   : > { %v6997_v21 = vpop.permute.xlu1 %3876  ;;  %v3957_v4 = vsel %vm3908_vm12, %v6944_v34, %v3857_v55 }
 0x7e4   : > { %4283 = vrot.lane.b32.xlu0 %v4269_v2, %s4622_s25 }
 0x7e5   : > { %4289 = vrot.lane.b32.xlu1 %v4280_v18, %s4622_s25 }
 0x7e6   : > { %v7001_v14 = vpop.permute.xlu0 %3874 }
 0x7e7   : > { %v7003_v48 = vpop.permute.xlu1 %3894  ;;  %v3965_v34 = vsel %vm3908_vm12, %v6952_v33, %v7001_v14 }
 0x7e8   : > { %4287 = vrot.lane.b32.xlu0 %v4270_v5, %s4622_s25 }
 0x7e9   : > { %4293 = vrot.lane.b32.xlu1 %v4281_v60, %s4622_s25 }
 0x7ea   : > { %v7007_v7 = vpop.permute.xlu0 %3892 }
 0x7eb   : > { %v3771_v9 = vpop.permute.xlu1 %3770  ;;  %v3974_v19 = vsel %vm3908_vm12, %v7007_v7, %v7003_v48  ;;  %v3973_v2 = vsel %vm3908_vm12, %v6958_v52, %v7007_v7  ;;  %v3913_v52 = vsel %vm3908_vm12, %v6773_v59, %v6797_v39 }
 0x7ec   : > { %4291 = vrot.lane.b32.xlu0 %v4271_v49, %s4622_s25  ;;  %v3919_v40 = vsel %vm3908_vm12, %v6960_v10, %v3771_v9  ;;  %v3958_v10 = vsel %vm3908_vm12, %v3857_v55, %v6993_v41 }
 0x7ed   : > { %4297 = vrot.lane.b32.xlu1 %v4282_v0, %s4622_s25 }
 0x7ee   : > { %v3787_v44 = vpop.permute.xlu0 %3786 }
 0x7ef   : > { %v3926_v25 = vsel %vm3908_vm12, %v3785_v35, %v3787_v44  ;;  %v3789_v26 = vpop.permute.xlu1 %3788 }
 0x7f0   : > { %4069 = vmatprep.subr.bf16.mxu0 %v3926_v25  ;;  %4295 = vrot.lane.b32.xlu0 %v4272_v53, %s4622_s25  ;;  %v3927_v28 = vsel %vm3908_vm12, %v3787_v44, %v3789_v26 }
 0x7f1   : > { %4070 = vmatpush1.bf16.msra.mxu0 %v3925_v51 }
 0x7f2   : > { %4071 = vmatprep.subr.bf16.mxu0 %v3934_v24  ;;  %v7017_v62 = vpop.permute.xlu0 %3772 }
 0x7f3   : > { %v3920_v50 = vsel %vm3908_vm12, %v3771_v9, %v7017_v62  ;;  %v3807_v30 = vpop.permute.xlu1 %3806 }
 0x7f4   : > { %4108 = vmatprep.subr.bf16.mxu1 %v3920_v50  ;;  %4299 = vrot.lane.b32.xlu0 %v4273_v36, %s4622_s25  ;;  %v3935_v58 = vsel %vm3908_vm12, %v6969_v32, %v3807_v30  ;;  %v3966_v32 = vsel %vm3908_vm12, %v7001_v14, %v6997_v21 }
 0x7f5   : > { %4072 = vmatpush1.bf16.msra.mxu0 %v3933_v23  ;;  %4109 = vmatpush1.bf16.msra.mxu1 %v3919_v40 }
 0x7f6   : > { %4073 = vmatprep.subr.bf16.mxu0 %v3942_v15  ;;  %v7028_v27 = vpop.permute.xlu0 %3790 }
 0x7f7   : > { %v3928_v3 = vsel %vm3908_vm12, %v3789_v26, %v7028_v27  ;;  %v3825_v12 = vpop.permute.xlu1 %3824 }
 0x7f8   : > { %4110 = vmatprep.subr.bf16.mxu1 %v3928_v3  ;;  %v3943_v38 = vsel %vm3908_vm12, %v6977_v45, %v3825_v12 }
 0x7f9   : > { %4074 = vmatpush1.bf16.msra.mxu0 %v3941_v16  ;;  %4111 = vmatpush1.bf16.msra.mxu1 %v3927_v28 }
 0x7fa   : > { %4075 = vmatprep.subr.bf16.mxu0 %v3950_v29  ;;  %v7037_v22 = vpop.permute.xlu0 %3808 }
 0x7fb   : > { %v3936_v56 = vsel %vm3908_vm12, %v3807_v30, %v7037_v22  ;;  %v3843_v35 = vpop.permute.xlu1 %3842 }
 0x7fc   : > { %4112 = vmatprep.subr.bf16.mxu1 %v3936_v56  ;;  %v3951_v45 = vsel %vm3908_vm12, %v6988_v1, %v3843_v35  ;;  %v3914_v1 = vsel %vm3908_vm12, %v6797_v39, %v6816_v61 }
 0x7fd   : > { %4076 = vmatpush1.bf16.msra.mxu0 %v3949_v11  ;;  %4113 = vmatpush1.bf16.msra.mxu1 %v3935_v58 }
 0x7fe   : > { %4077 = vmatprep.subr.bf16.mxu0 %v3958_v10  ;;  %v7047_v54 = vpop.permute.xlu0 %3826  ;;  %v7139_v10 = vld [vmem:[#allocation3 + $0x58] sm:$0xff] }
 0x7ff   : > { %v3944_v20 = vsel %vm3908_vm12, %v3825_v12, %v7047_v54  ;;  %v3861_v63 = vpop.permute.xlu1 %3860 }
 0x800   : > { %4114 = vmatprep.subr.bf16.mxu1 %v3944_v20  ;;  %v3959_v33 = vsel %vm3908_vm12, %v6993_v41, %v3861_v63 }
 0x801   : > { %4078 = vmatpush1.bf16.msra.mxu0 %v3957_v4  ;;  %4115 = vmatpush1.bf16.msra.mxu1 %v3943_v38 }
 0x802   : > { %4079 = vmatprep.subr.bf16.mxu0 %v3966_v32  ;;  %v7058_v47 = vpop.permute.xlu0 %3844 }
 0x803   : > { %v3952_v57 = vsel %vm3908_vm12, %v3843_v35, %v7058_v47  ;;  %v3879_v6 = vpop.permute.xlu1 %3878 }
 0x804   : > { %4116 = vmatprep.subr.bf16.mxu1 %v3952_v57  ;;  %v3967_v5 = vsel %vm3908_vm12, %v6997_v21, %v3879_v6 }
 0x805   : > { %4080 = vmatpush1.bf16.msra.mxu0 %v3965_v34  ;;  %4117 = vmatpush1.bf16.msra.mxu1 %v3951_v45 }
 0x806   : > { %4081 = vmatprep.subr.bf16.mxu0 %v3974_v19  ;;  %v3863_v42 = vpop.permute.xlu0 %3862 }
 0x807   : > { %v3960_v31 = vsel %vm3908_vm12, %v3861_v63, %v3863_v42  ;;  %v3897_v46 = vpop.permute.xlu1 %3896 }
 0x808   : > { %4118 = vmatprep.subr.bf16.mxu1 %v3960_v31  ;;  %v3975_v49 = vsel %vm3908_vm12, %v7003_v48, %v3897_v46 }
 0x809   : > { %4082 = vmatpush1.bf16.msra.mxu0 %v3973_v2  ;;  %4119 = vmatpush1.bf16.msra.mxu1 %v3959_v33 }
 0x80a   : > { %4147 = vmatprep.subr.bf16.mxu0 %v3914_v1  ;;  %v3881_v8 = vpop.permute.xlu0 %3880 }
 0x80b   : > { %v3968_v13 = vsel %vm3908_vm12, %v3879_v6, %v3881_v8  ;;  %v3775_v17 = vpop.permute.xlu1 %3774 }
 0x80c   : > { %4098 = vmatmul.mubr.bf16.vlgmr.msra.gmra.mrb[28].mxu0 %v6814_v37  ;;  %4120 = vmatprep.subr.bf16.mxu1 %v3968_v13  ;;  %v3921_v39 = vsel %vm3908_vm12, %v7017_v62, %v3775_v17 }
 0x80d   : > { %4121 = vmatpush1.bf16.msra.mxu1 %v3967_v5  ;;  %4148 = vmatpush1.bf16.msra.mxu0 %v3913_v52 }
 0x80e   : > { %v3899_v41 = vpop.permute.xlu0 %3898  ;;  %4480 = vmatprep.mubr.msk.bf16.mxu0 %vm2193_vm13, %v6820_v43 }
 0x80f   : > { %v3976_v18 = vsel %vm3908_vm12, %v3897_v46, %v3899_v41  ;;  %v3793_v55 = vpop.permute.xlu1 %3792 }
 0x810   : > { %4122 = vmatprep.subr.bf16.mxu1 %v3976_v18  ;;  %v3929_v0 = vsel %vm3908_vm12, %v7028_v27, %v3793_v55 }
 0x811   : > { %4123 = vmatpush1.bf16.msra.mxu1 %v3975_v49 }
 0x812   : > { %v7091_v21 = vpop.permute.xlu0 %3776 }
 0x813   : > { %v3922_v60 = vsel %vm3908_vm12, %v3775_v17, %v7091_v21  ;;  %v3811_v59 = vpop.permute.xlu1 %3810 }
 0x814   : > { %4139 = vmatmul.mubr.bf16.vlgmr.msra.gmra.mrb[44].mxu1 %v6814_v37  ;;  %4149 = vmatprep.subr.bf16.mxu0 %v3922_v60  ;;  %v3937_v25 = vsel %vm3908_vm12, %v7037_v22, %v3811_v59 }
 0x815   : > { %4150 = vmatpush1.bf16.msra.mxu0 %v3921_v39  ;;  %4481 = vmatprep.mubr.msk.bf16.mxu1 %vm2193_vm13, %v6820_v43 }
 0x816   : > { %v7100_v14 = vpop.permute.xlu0 %3794 }
 0x817   : > { %v3930_v48 = vsel %vm3908_vm12, %v3793_v55, %v7100_v14  ;;  %v3829_v53 = vpop.permute.xlu1 %3828 }
 0x818   : > { %4151 = vmatprep.subr.bf16.mxu0 %v3930_v48  ;;  %v3945_v36 = vsel %vm3908_vm12, %v7047_v54, %v3829_v53 }
 0x819   : > { %4152 = vmatpush1.bf16.msra.mxu0 %v3929_v0 }
 0x81a   : > { %v7106_v7 = vpop.permute.xlu0 %3812 }
 0x81b   : > { %v3938_v9 = vsel %vm3908_vm12, %v3811_v59, %v7106_v7  ;;  %v3847_v44 = vpop.permute.xlu1 %3846 }
 0x81c   : > { %4153 = vmatprep.subr.bf16.mxu0 %v3938_v9  ;;  %v3953_v23 = vsel %vm3908_vm12, %v7058_v47, %v3847_v44 }
 0x81d   : > { %4154 = vmatpush1.bf16.msra.mxu0 %v3937_v25 }
 0x81e   : > { %v7112_v26 = vpop.permute.xlu0 %3830 }
 0x81f   : > { %v3946_v51 = vsel %vm3908_vm12, %v3829_v53, %v7112_v26  ;;  %v3865_v24 = vpop.permute.xlu1 %3864 }
 0x820   : > { %4155 = vmatprep.subr.bf16.mxu0 %v3946_v51  ;;  %v3961_v3 = vsel %vm3908_vm12, %v3863_v42, %v3865_v24 }
 0x821   : > { %4156 = vmatpush1.bf16.msra.mxu0 %v3945_v36 }
 0x822   : > { %v7118_v62 = vpop.permute.xlu0 %3848 }
 0x823   : > { %v3954_v50 = vsel %vm3908_vm12, %v3847_v44, %v7118_v62  ;;  %v3883_v30 = vpop.permute.xlu1 %3882 }
 0x824   : > { %4157 = vmatprep.subr.bf16.mxu0 %v3954_v50  ;;  %v3969_v29 = vsel %vm3908_vm12, %v3881_v8, %v3883_v30 }
 0x825   : > { %4158 = vmatpush1.bf16.msra.mxu0 %v3953_v23 }
 0x826   : > { %v7124_v40 = vpop.permute.xlu0 %3866 }
 0x827   : > { %v3962_v15 = vsel %vm3908_vm12, %v3865_v24, %v7124_v40  ;;  %v3901_v27 = vpop.permute.xlu1 %3900 }
 0x828   : > { %4159 = vmatprep.subr.bf16.mxu0 %v3962_v15  ;;  %v3977_v11 = vsel %vm3908_vm12, %v3899_v41, %v3901_v27 }
 0x829   : > { %4160 = vmatpush1.bf16.msra.mxu0 %v3961_v3 }
 0x82a   : > { %v7129_v12 = vpop.permute.xlu0 %3884 }
 0x82b   : > { %v3970_v16 = vsel %vm3908_vm12, %v3883_v30, %v7129_v12  ;;  %v3761_v28 = vpop.permute.xlu1 %3760 }
 0x82c   : > { %4161 = vmatprep.subr.bf16.mxu0 %v3970_v16  ;;  %v3915_v63 = vsel %vm3908_vm12, %v6816_v61, %v3761_v28 }
 0x82d   : > { %4162 = vmatpush1.bf16.msra.mxu0 %v3969_v29 }
 0x82e   : > { %v7134_v22 = vpop.permute.xlu0 %3902 }
 0x82f   : > { %v3978_v56 = vsel %vm3908_vm12, %v3901_v27, %v7134_v22  ;;  %v3779_v35 = vpop.permute.xlu1 %3778 }
 0x830   : > { %4163 = vmatprep.subr.bf16.mxu0 %v3978_v56  ;;  %v3923_v47 = vsel %vm3908_vm12, %v7091_v21, %v3779_v35 }
 0x831   : > { %4164 = vmatpush1.bf16.msra.mxu0 %v3977_v11 }
 0x832   : > { %v3763_v58 = vpop.permute.xlu0 %3762  ;;  %4229 = vmatprep.subr.bf16.mxu0 %v7139_v10 }
 0x833   : > { %v3916_v54 = vsel %vm3908_vm12, %v3761_v28, %v3763_v58  ;;  %v3797_v20 = vpop.permute.xlu1 %3796 }
 0x834   : > { %4180 = vmatmul.mubr.bf16.vlgmr.msra.gmra.mrb[32].mxu0 %v6814_v37  ;;  %4188 = vmatprep.subr.bf16.mxu1 %v3916_v54  ;;  %v3931_v34 = vsel %vm3908_vm12, %v7100_v14, %v3797_v20 }
 0x835   : > { %4189 = vmatpush1.bf16.msra.mxu1 %v3915_v63  ;;  %4230 = vmatpush1.bf16.msra.mxu0 %v3763_v58 }
 0x836   : > { %v3781_v4 = vpop.permute.xlu0 %3780  ;;  %4231 = vmatprep.subr.bf16.mxu0 %v7139_v10  ;;  %4482 = vmatprep.mubr.msk.bf16.mxu0 %vm2193_vm13, %v6820_v43 }
 0x837   : > { %v3924_v38 = vsel %vm3908_vm12, %v3779_v35, %v3781_v4  ;;  %v3815_v32 = vpop.permute.xlu1 %3814 }
 0x838   : > { %4190 = vmatprep.subr.bf16.mxu1 %v3924_v38  ;;  %v3939_v42 = vsel %vm3908_vm12, %v7106_v7, %v3815_v32 }
 0x839   : > { %4191 = vmatpush1.bf16.msra.mxu1 %v3923_v47  ;;  %4232 = vmatpush1.bf16.msra.mxu0 %v3781_v4 }
 0x83a   : > { %v3799_v61 = vpop.permute.xlu0 %3798  ;;  %4233 = vmatprep.subr.bf16.mxu0 %v7139_v10 }
 0x83b   : > { %v3932_v57 = vsel %vm3908_vm12, %v3797_v20, %v3799_v61  ;;  %v3833_v6 = vpop.permute.xlu1 %3832 }
 0x83c   : > { %4192 = vmatprep.subr.bf16.mxu1 %v3932_v57  ;;  %v3947_v2 = vsel %vm3908_vm12, %v7112_v26, %v3833_v6 }
 0x83d   : > { %4193 = vmatpush1.bf16.msra.mxu1 %v3931_v34  ;;  %4234 = vmatpush1.bf16.msra.mxu0 %v3799_v61 }
 0x83e   : > { %v3817_v43 = vpop.permute.xlu0 %3816  ;;  %4235 = vmatprep.subr.bf16.mxu0 %v7139_v10 }
 0x83f   : > { %v3940_v45 = vsel %vm3908_vm12, %v3815_v32, %v3817_v43  ;;  %v3851_v19 = vpop.permute.xlu1 %3850 }
 0x840   : > { %4194 = vmatprep.subr.bf16.mxu1 %v3940_v45  ;;  %v3955_v13 = vsel %vm3908_vm12, %v7118_v62, %v3851_v19 }
 0x841   : > { %4195 = vmatpush1.bf16.msra.mxu1 %v3939_v42  ;;  %4236 = vmatpush1.bf16.msra.mxu0 %v3817_v43 }
 0x842   : > { %v3835_v31 = vpop.permute.xlu0 %3834  ;;  %4237 = vmatprep.subr.bf16.mxu0 %v7139_v10 }
 0x843   : > { %v3948_v46 = vsel %vm3908_vm12, %v3833_v6, %v3835_v31  ;;  %v3869_v33 = vpop.permute.xlu1 %3868 }
 0x844   : > { %4196 = vmatprep.subr.bf16.mxu1 %v3948_v46  ;;  %v3963_v41 = vsel %vm3908_vm12, %v7124_v40, %v3869_v33 }
 0x845   : > { %4197 = vmatpush1.bf16.msra.mxu1 %v3947_v2  ;;  %4238 = vmatpush1.bf16.msra.mxu0 %v3835_v31 }
 0x846   : > { %v3853_v1 = vpop.permute.xlu0 %3852  ;;  %4239 = vmatprep.subr.bf16.mxu0 %v7139_v10 }
 0x847   : > { %v3956_v8 = vsel %vm3908_vm12, %v3851_v19, %v3853_v1  ;;  %v3887_v5 = vpop.permute.xlu1 %3886 }
 0x848   : > { %4198 = vmatprep.subr.bf16.mxu1 %v3956_v8  ;;  %v3971_v49 = vsel %vm3908_vm12, %v7129_v12, %v3887_v5 }
 0x849   : > { %4199 = vmatpush1.bf16.msra.mxu1 %v3955_v13  ;;  %4240 = vmatpush1.bf16.msra.mxu0 %v3853_v1 }
 0x84a   : > { %v3871_v17 = vpop.permute.xlu0 %3870  ;;  %4241 = vmatprep.subr.bf16.mxu0 %v7139_v10 }
 0x84b   : > { %v3964_v52 = vsel %vm3908_vm12, %v3869_v33, %v3871_v17  ;;  %v3905_v21 = vpop.permute.xlu1 %3904 }
 0x84c   : > { %4200 = vmatprep.subr.bf16.mxu1 %v3964_v52  ;;  %v3979_v39 = vsel %vm3908_vm12, %v7134_v22, %v3905_v21 }
 0x84d   : > { %4201 = vmatpush1.bf16.msra.mxu1 %v3963_v41  ;;  %4242 = vmatpush1.bf16.msra.mxu0 %v3871_v17 }
 0x84e   : > { %v3889_v18 = vpop.permute.xlu0 %3888  ;;  %4243 = vmatprep.subr.bf16.mxu0 %v7139_v10 }
 0x84f   : > { %v3972_v55 = vsel %vm3908_vm12, %v3887_v5, %v3889_v18 }
 0x850   : > { %4202 = vmatprep.subr.bf16.mxu1 %v3972_v55 }
 0x851   : > { %4203 = vmatpush1.bf16.msra.mxu1 %v3971_v49  ;;  %4244 = vmatpush1.bf16.msra.mxu0 %v3889_v18 }
 0x852   : > { %v3907_v60 = vpop.permute.xlu0 %3906  ;;  %4245 = vmatprep.subr.bf16.mxu0 %v7139_v10 }
 0x853   : > { %v3980_v59 = vsel %vm3908_vm12, %v3905_v21, %v3907_v60 }
 0x854   : > { %4204 = vmatprep.subr.bf16.mxu1 %v3980_v59 }
 0x855   : > { %4205 = vmatpush1.bf16.msra.mxu1 %v3979_v39  ;;  %4246 = vmatpush1.bf16.msra.mxu0 %v3907_v60 }
 0x856   : > { %v4284_v14 = vpop.permute.xlu0 %4283 }
 0x858   : > { %4221 = vmatmul.mubr.bf16.vlgmr.msra.gmra.mrb[48].mxu1 %v6814_v37  ;;  %4262 = vmatmul.mubr.bf16.vlgmr.msra.gmra.mrb[36].mxu0 %v6814_v37 }
 0x85a   : > { %v4288_v0 = vpop.permute.xlu0 %4287 }
 0x85c   : > { %v3734_v48 = vpop.permute.xlu1 %3733 }
 0x85e   : > { %v4292_v23 = vpop.permute.xlu0 %4291 }
 0x860   : > { %v4286_v53 = vpop.permute.xlu1 %4285 }
 0x861   : > { %v4302_v9 = vsel %vm4301_vm4, %v4284_v14, %v4286_v53  ;;  %v4303_v26 = vsel %vm4301_vm4, %v4286_v53, %v4288_v0 }
 0x862   : > { %v4296_v58 = vpop.permute.xlu0 %4295 }
 0x864   : > { %v4290_v37 = vpop.permute.xlu1 %4289 }
 0x865   : > { %v4304_v15 = vsel %vm4301_vm4, %v4288_v0, %v4290_v37  ;;  %v4305_v12 = vsel %vm4301_vm4, %v4290_v37, %v4292_v23 }
 0x866   : > { %v4300_v34 = vpop.permute.xlu0 %4299 }
 0x868   : > { %v4294_v11 = vpop.permute.xlu1 %4293 }
 0x869   : > { %v4306_v54 = vsel %vm4301_vm4, %v4292_v23, %v4294_v11  ;;  %v4307_v4 = vsel %vm4301_vm4, %v4294_v11, %v4296_v58 }
 0x86c   : > { %v4298_v43 = vpop.permute.xlu1 %4297 }
 0x86d   : > { %v4309_v33 = vsel %vm4301_vm4, %v4298_v43, %v4300_v34  ;;  %v4308_v1 = vsel %vm4301_vm4, %v4296_v58, %v4298_v43 }
 0x8df   : > { %v4099_v7 = vpop.f32.mrb[28].mxu0 }
 0x8e0   : > { %v4100_v44 = vadd.f32 %v4099_v7, %v3734_v48  ;;  %v4101_v25 = vpop.f32.mrb[29].mxu0 }
 0x8e1   : > { %v4102_v51 = vadd.f32 %v4101_v25, %v3734_v48  ;;  %v4103_v24 = vpop.f32.mrb[30].mxu0 }
 0x8e2   : > { %v4319_v36 = vadd.f32 %v4302_v9, %v4100_v44  ;;  %v4104_v62 = vpop.f32.mrb[31].mxu0 }
 0x8e3   : > { %v4320_v50 = vadd.f32 %v4303_v26, %v4102_v51 }
 0x8e5   : > { %v4336_v30 = vcombine.low %v4319_v36, %v4320_v50 }
 0x8e7   : > { %4344 = vst [vmem:[%s7188_s19] sm:$0x77] %v4336_v30  ;;  %v4140_v40 = vpop.f32.mrb[44].mxu1 }
 0x8e8   : > { %v4141_v27 = vadd.f32 %v4140_v40, %v3734_v48  ;;  %v4142_v3 = vpop.f32.mrb[45].mxu1 }
 0x8e9   : > { %v4143_v16 = vadd.f32 %v4142_v3, %v3734_v48  ;;  %v4144_v28 = vpop.f32.mrb[46].mxu1 }
 0x8ea   : > { %v4321_v29 = vadd.f32 %v4304_v15, %v4141_v27  ;;  %v4145_v22 = vpop.f32.mrb[47].mxu1 }
 0x8eb   : > { %v4322_v56 = vadd.f32 %v4305_v12, %v4143_v16 }
 0x8ed   : > { %v4337_v35 = vcombine.low %v4321_v29, %v4322_v56 }
 0x8ef   : > { %4345 = vst [vmem:[%s7188_s19 + $0x8] sm:$0x77] %v4337_v35 }
 0x907   : > { %v4181_v10 = vpop.f32.mrb[32].mxu0 }
 0x908   : > { %v4182_v20 = vadd.f32 %v4181_v10, %v3734_v48  ;;  %v4183_v63 = vpop.f32.mrb[33].mxu0 }
 0x909   : > { %v4184_v38 = vadd.f32 %v4183_v63, %v3734_v48  ;;  %v4185_v32 = vpop.f32.mrb[34].mxu0 }
 0x90a   : > { %v4323_v47 = vadd.f32 %v4306_v54, %v4182_v20  ;;  %v4186_v61 = vpop.f32.mrb[35].mxu0 }
 0x90b   : > { %v4324_v57 = vadd.f32 %v4307_v4, %v4184_v38 }
 0x90d   : > { %v4338_v6 = vcombine.low %v4323_v47, %v4324_v57 }
 0x90f   : > { %4346 = vst [vmem:[%s7188_s19 + $0x10] sm:$0x77] %v4338_v6 }
 0x92b   : > { %v4222_v45 = vpop.f32.mrb[48].mxu1  ;;  %v4263_v19 = vpop.f32.mrb[36].mxu0 }
 0x92c   : > { %v4223_v42 = vadd.f32 %v4222_v45, %v3734_v48  ;;  %v4264_v31 = vadd.f32 %v4263_v19, %v3734_v48  ;;  %v4224_v46 = vpop.f32.mrb[49].mxu1  ;;  %v4265_v2 = vpop.f32.mrb[37].mxu0 }
 0x92d   : > { %v4225_v8 = vadd.f32 %v4224_v46, %v3734_v48  ;;  %v4226_v13 = vpop.f32.mrb[50].mxu1  ;;  %v4266_v17 = vpop.f32.mrb[38].mxu0 }
 0x92e   : > { %v4325_v5 = vadd.f32 %v4308_v1, %v4223_v42  ;;  %v4327_v52 = vadd.f32 %v4300_v34, %v4264_v31  ;;  %v4227_v41 = vpop.f32.mrb[51].mxu1  ;;  %v4267_v18 = vpop.f32.mrb[39].mxu0 }
 0x92f   : > { %v4326_v55 = vadd.f32 %v4309_v33, %v4225_v8 }
 0x930   : > { %4349 = vst.msk [vmem:[%s7188_s19 + $0x20] sm:$0x7] %vm4348_vm5, %v4327_v52 }
 0x931   : > { %v4339_v49 = vcombine.low %v4325_v5, %v4326_v55 }
 0x933   : > { %4347 = vst [vmem:[%s7188_s19 + $0x18] sm:$0x77] %v4339_v49 }
 0x934 PF: > { %s20_s15 = sadd.s32 1, %s4606_s15   ;;  %s7357_s13 = smov %s4602_s14 }
 0x935   : > { %p17_p5 = scmp.ge.s32.totalorder %s20_s15, 4   ;;  %s7358_s14 = smov %s7360_s16 }
 0x937   :  { %19 = sbr.rel (!%p17_p5) target bundleno = 2 (0x2), region = 93 }

</bundles_post_ra>
